<compile_context>
chip_gen: v5e
topology: v5e:2x2
jax: 0.10.0
libtpu: 0.0.40
codegen_flags: <defaults>
</compile_context>

<pallas_src>
import functools

import jax
import jax.numpy as jnp
from jax.experimental import pallas as pl
from jax.experimental.pallas import tpu as pltpu

PAD = 8                      # max dilation -> one halo ring covers all branches
DILATIONS = (1, 2, 4, 8)


def _make_dblock_kernel(C, H, W, B):
    Hp, Wp = H + 2 * PAD, W + 2 * PAD
    Sp = Hp * Wp                   # padded-flat spatial extent of ONE image
    SpB = B * Sp                   # lane extent of one grid step (B images)
    # Lane margin so every tap shift is an in-bounds contiguous lane slice.
    max_off = PAD * Wp + PAD
    M = ((max_off + 127) // 128) * 128   # 128-aligned -> interior stores stay aligned

    def kernel(x_ref, w_ref, mask_ref, out_ref, src_ref):
        # x_ref   : (1, C, SpB)      padded-flat activations (zero halo)
        # w_ref   : (4, 9, C, C)     bf16 per-(conv, tap) weights, (Cout, Cin)
        # mask_ref: (C, SpB)         f32 interior mask (1 on real HxW pixels)
        # out_ref : (1, C, SpB)
        # src_ref : (C, M + SpB + M) bf16 scratch with the current activation
        zeros_m = jnp.zeros((C, M), jnp.bfloat16)
        src_ref[:, :M] = zeros_m
        src_ref[:, M + SpB:] = zeros_m

        x0 = x_ref[0].astype(jnp.float32)            # (C, SpB), halo already 0
        src_ref[:, M:M + SpB] = x0.astype(jnp.bfloat16)
        res = x0                                     # incremental residual (f32)
        mask = mask_ref[...]

        for ci, dil in enumerate(DILATIONS):
            acc = None
            t = 0
            for ky in (-1, 0, 1):
                for kx in (-1, 0, 1):
                    off = dil * ky * Wp + dil * kx
                    rhs = src_ref[:, M + off:M + off + SpB]       # bf16, read once
                    part = jnp.dot(w_ref[ci, t], rhs,
                                   preferred_element_type=jnp.float32)
                    acc = part if acc is None else acc + part
                    t += 1
            cur = jnp.maximum(acc, 0.0)                           # ReLU in f32
            if ci + 1 < len(DILATIONS):
                cur = cur * mask                  # clean halo for the next dilation
                src_ref[:, M:M + SpB] = cur.astype(jnp.bfloat16)
            res = res + cur
        out_ref[0] = res.astype(out_ref.dtype)

    return kernel, Sp, SpB, M


def _pick_images_per_step(N, C, Sp):
    """Largest divisor B of N that keeps >= 2 grid steps (v7x megacore) and a
    modest lane-batched VMEM footprint (v5e/v6e/v7x safe)."""
    best = 1
    for b in range(1, N + 1):
        if N % b:
            continue
        if N >= 2 and N // b < 2:
            continue
        if 6 * C * b * Sp * 4 > (8 << 20):       # x/out/mask/scratch blocks
            continue
        best = b
    return best


@functools.partial(jax.jit, static_argnames=("images_per_step",))
def dblock_pallas(x_nchw, w1, w2, w3, w4, images_per_step=None):
    """x_nchw: (N, C, H, W) (PyTorch layout).  w*: (3, 3, Cin, Cout) HWIO."""
    N, C, H, W = x_nchw.shape
    Hp, Wp = H + 2 * PAD, W + 2 * PAD
    B = images_per_step or _pick_images_per_step(N, C, Hp * Wp)
    assert N % B == 0
    G = N // B
    kernel, Sp, SpB, M = _make_dblock_kernel(C, H, W, B)

    # Spatial zero padding + flatten once (input keeps its original dtype).
    x_pad = jnp.pad(x_nchw, ((0, 0), (0, 0), (PAD, PAD), (PAD, PAD)))
    x_flat = (x_pad.reshape(G, B, C, Sp).transpose(0, 2, 1, 3)
              .reshape(G, C, SpB))

    # HWIO (3,3,Cin,Cout) -> (9, Cout, Cin); tap index t = (ky+1)*3 + (kx+1).
    def to_taps(w):
        return jnp.transpose(w, (0, 1, 3, 2)).reshape(9, C, C)
    w_all = jnp.stack([to_taps(w1), to_taps(w2), to_taps(w3), to_taps(w4)],
                      axis=0).astype(jnp.bfloat16)            # (4, 9, C, C)

    # Interior mask (1.0 on real HxW pixels, 0.0 on the halo), tiled per image.
    yy = jnp.arange(Hp)
    xx = jnp.arange(Wp)
    interior = (((yy >= PAD) & (yy < PAD + H))[:, None]
                & ((xx >= PAD) & (xx < PAD + W))[None, :])
    mask = jnp.tile(interior.reshape(1, Sp).astype(jnp.float32), (C, B))

    grid_spec = pltpu.PrefetchScalarGridSpec(
        num_scalar_prefetch=0,
        grid=(G,),
        in_specs=[
            pl.BlockSpec((1, C, SpB), lambda g: (g, 0, 0)),
            pl.BlockSpec((4, 9, C, C), lambda g: (0, 0, 0, 0)),   # fetched once
            pl.BlockSpec((C, SpB), lambda g: (0, 0)),             # fetched once
        ],
        out_specs=pl.BlockSpec((1, C, SpB), lambda g: (g, 0, 0)),
        scratch_shapes=[pltpu.VMEM((C, M + SpB + M), jnp.bfloat16)],
    )
    out_flat = pl.pallas_call(
        kernel,
        out_shape=jax.ShapeDtypeStruct((G, C, SpB), x_nchw.dtype),
        grid_spec=grid_spec,
        compiler_params=pltpu.CompilerParams(
            dimension_semantics=("parallel",)),
    )(x_flat, w_all, mask)

    # Undo the lane batching and drop the halo ring (output stays lane-dense).
    out = (out_flat.reshape(G, C, B, Sp).transpose(0, 2, 1, 3)
           .reshape(N, C, Hp, Wp))
    # TODO(synk): measure a cropped (C, H*W) in-kernel store vs. this padded
    # store + wrapper crop (trades per-row gathers for a 4x smaller output DMA).
    return out[:, :, PAD:PAD + H, PAD:PAD + W]


def _reference_dblock(x_nchw, weights, *, mxu_bf16=True):
    """Pure-JAX reference (NCHW / HWIO).  With mxu_bf16=True the conv operands
    are rounded to bf16 with f32 accumulation, matching the kernel's MXU use."""
    def conv(inp, w, d):
        if mxu_bf16:
            inp = inp.astype(jnp.bfloat16)
            w = w.astype(jnp.bfloat16)
        y = jax.lax.conv_general_dilated(
            inp, w, window_strides=(1, 1),
            padding=[(d, d), (d, d)], rhs_dilation=(d, d),
            dimension_numbers=("NCHW", "HWIO", "NCHW"),
            preferred_element_type=jnp.float32,
            precision=jax.lax.Precision.HIGHEST)
        return jax.nn.relu(y)

    x32 = x_nchw.astype(jnp.float32)
    d1 = conv(x32, weights[0], 1)
    d2 = conv(d1, weights[1], 2)
    d3 = conv(d2, weights[2], 4)
    d4 = conv(d3, weights[3], 8)
    return x32 + d1 + d2 + d3 + d4


if __name__ == "__main__":
    key = jax.random.PRNGKey(0)
    N, C, H, W = 2, 4, 16, 16          # PyTorch-side NCHW shape

    kx_, k1, k2, k3, k4 = jax.random.split(key, 5)
    x = jax.random.normal(kx_, (N, C, H, W), jnp.float32)

    # Deterministic synthetic conv weights (HWIO); biases are zero per __init__.
    scale = 0.1
    w1 = scale * jax.random.normal(k1, (3, 3, C, C), jnp.float32)
    w2 = scale * jax.random.normal(k2, (3, 3, C, C), jnp.float32)
    w3 = scale * jax.random.normal(k3, (3, 3, C, C), jnp.float32)
    w4 = scale * jax.random.normal(k4, (3, 3, C, C), jnp.float32)

    out = dblock_pallas(x, w1, w2, w3, w4)
    out = jax.block_until_ready(out)
    assert out.shape == (N, C, H, W)

    # Tight check vs. a reference using the same bf16-operand / f32-accum
    # matmul semantics as the kernel.
    ref_bf16 = _reference_dblock(x, (w1, w2, w3, w4), mxu_bf16=True)
    err = float(jnp.max(jnp.abs(out - ref_bf16)))
    assert jnp.allclose(out, ref_bf16, atol=2e-2, rtol=2e-2), (
        f"mismatch vs. bf16-matched reference: max abs diff {err}")

    # Loose sanity check vs. the full-f32 reference (bf16 MXU operands drift
    # by a few 1e-3 at this scale).
    ref_f32 = _reference_dblock(x, (w1, w2, w3, w4), mxu_bf16=False)
    err32 = float(jnp.max(jnp.abs(out - ref_f32)))
    assert jnp.allclose(out, ref_f32, atol=1e-1, rtol=1e-1), (
        f"mismatch vs. f32 reference: max abs diff {err32}")

    print("KERNEL_OK")
</pallas_src>

<mosaic_0001>
module attributes {stable_mosaic.version = 11 : i64} {
  func.func @kernel(%arg0: i32, %arg1: memref<1x4x1024xf32, #tpu.memory_space<vmem>>, %arg2: memref<4x9x4x4xbf16, #tpu.memory_space<vmem>>, %arg3: memref<4x1024xf32, #tpu.memory_space<vmem>>, %arg4: memref<1x4x1024xf32, #tpu.memory_space<vmem>>, %arg5: memref<4x1792xbf16, #tpu.memory_space<vmem>>) attributes {dimension_semantics = [#tpu.dimension_semantics<parallel>], iteration_bounds = array<i64: 2>, scalar_prefetch = 0 : i64, scratch_operands = 1 : i64, tpu.core_type = #tpu.core_type<tc>, window_params = [{transform_indices = @transform_0, window_bounds = array<i64: 1, 4, 1024>}, {pipeline_mode = #tpu.pipeline_mode<synchronous>, transform_indices = @transform_1, window_bounds = array<i64: 4, 9, 4, 4>}, {pipeline_mode = #tpu.pipeline_mode<synchronous>, transform_indices = @transform_2, window_bounds = array<i64: 4, 1024>}, {transform_indices = @transform_3, window_bounds = array<i64: 1, 4, 1024>}]} {
    %cst = arith.constant 0.000000e+00 : bf16
    %0 = vector.broadcast %cst : bf16 to vector<4x384xbf16>
    %c0 = arith.constant 0 : index
    %c0_0 = arith.constant 0 : index
    %1 = vector.load %arg5[%c0, %c0_0] : memref<4x1792xbf16, #tpu.memory_space<vmem>>, vector<4x384xbf16>
    tpu.vector_store %arg5[%c0, %c0_0], %0 {strides = array<i32>} : memref<4x1792xbf16, #tpu.memory_space<vmem>>, vector<4x384xbf16>,
    %c0_1 = arith.constant 0 : index
    %c1408 = arith.constant 1408 : index
    %2 = vector.load %arg5[%c0_1, %c1408] : memref<4x1792xbf16, #tpu.memory_space<vmem>>, vector<4x384xbf16>
    tpu.vector_store %arg5[%c0_1, %c1408], %0 {strides = array<i32>} : memref<4x1792xbf16, #tpu.memory_space<vmem>>, vector<4x384xbf16>,
    %c0_2 = arith.constant 0 : index
    %c0_3 = arith.constant 0 : index
    %c0_4 = arith.constant 0 : index
    %3 = vector.load %arg1[%c0_2, %c0_3, %c0_4] : memref<1x4x1024xf32, #tpu.memory_space<vmem>>, vector<1x4x1024xf32>
    %4 = vector.shape_cast %3 : vector<1x4x1024xf32> to vector<4x1024xf32>
    %5 = arith.truncf %4 : vector<4x1024xf32> to vector<4x1024xbf16>
    %c0_5 = arith.constant 0 : index
    %c384 = arith.constant 384 : index
    %6 = vector.load %arg5[%c0_5, %c384] : memref<4x1792xbf16, #tpu.memory_space<vmem>>, vector<4x1024xbf16>
    tpu.vector_store %arg5[%c0_5, %c384], %5 {strides = array<i32>} : memref<4x1792xbf16, #tpu.memory_space<vmem>>, vector<4x1024xbf16>,
    %c0_6 = arith.constant 0 : index
    %c0_7 = arith.constant 0 : index
    %7 = vector.load %arg3[%c0_6, %c0_7] : memref<4x1024xf32, #tpu.memory_space<vmem>>, vector<4x1024xf32>
    %c0_8 = arith.constant 0 : index
    %c351 = arith.constant 351 : index
    %8 = vector.load %arg5[%c0_8, %c351] : memref<4x1792xbf16, #tpu.memory_space<vmem>>, vector<4x1024xbf16>
    %c0_9 = arith.constant 0 : index
    %c0_10 = arith.constant 0 : index
    %c0_11 = arith.constant 0 : index
    %c0_12 = arith.constant 0 : index
    %9 = vector.load %arg2[%c0_9, %c0_10, %c0_11, %c0_12] : memref<4x9x4x4xbf16, #tpu.memory_space<vmem>>, vector<1x1x4x4xbf16>
    %10 = vector.shape_cast %9 : vector<1x1x4x4xbf16> to vector<4x4xbf16>
    %cst_13 = arith.constant dense<0.000000e+00> : vector<4x1024xf32>
    %11 = tpu.matmul %10, %8, %cst_13 {dimension_numbers = #tpu.dot_dimension_numbers<[1], [0], [0], [1], [0, 0, 1, 1], [], []>} : vector<4x4xbf16>, vector<4x1024xbf16>, vector<4x1024xf32> -> vector<4x1024xf32>
    %c0_14 = arith.constant 0 : index
    %c352 = arith.constant 352 : index
    %12 = vector.load %arg5[%c0_14, %c352] : memref<4x1792xbf16, #tpu.memory_space<vmem>>, vector<4x1024xbf16>
    %c0_15 = arith.constant 0 : index
    %c1 = arith.constant 1 : index
    %c0_16 = arith.constant 0 : index
    %c0_17 = arith.constant 0 : index
    %13 = vector.load %arg2[%c0_15, %c1, %c0_16, %c0_17] : memref<4x9x4x4xbf16, #tpu.memory_space<vmem>>, vector<1x1x4x4xbf16>
    %14 = vector.shape_cast %13 : vector<1x1x4x4xbf16> to vector<4x4xbf16>
    %cst_18 = arith.constant dense<0.000000e+00> : vector<4x1024xf32>
    %15 = tpu.matmul %14, %12, %cst_18 {dimension_numbers = #tpu.dot_dimension_numbers<[1], [0], [0], [1], [0, 0, 1, 1], [], []>} : vector<4x4xbf16>, vector<4x1024xbf16>, vector<4x1024xf32> -> vector<4x1024xf32>
    %16 = arith.addf %11, %15 : vector<4x1024xf32>
    %c0_19 = arith.constant 0 : index
    %c353 = arith.constant 353 : index
    %17 = vector.load %arg5[%c0_19, %c353] : memref<4x1792xbf16, #tpu.memory_space<vmem>>, vector<4x1024xbf16>
    %c0_20 = arith.constant 0 : index
    %c2 = arith.constant 2 : index
    %c0_21 = arith.constant 0 : index
    %c0_22 = arith.constant 0 : index
    %18 = vector.load %arg2[%c0_20, %c2, %c0_21, %c0_22] : memref<4x9x4x4xbf16, #tpu.memory_space<vmem>>, vector<1x1x4x4xbf16>
    %19 = vector.shape_cast %18 : vector<1x1x4x4xbf16> to vector<4x4xbf16>
    %cst_23 = arith.constant dense<0.000000e+00> : vector<4x1024xf32>
    %20 = tpu.matmul %19, %17, %cst_23 {dimension_numbers = #tpu.dot_dimension_numbers<[1], [0], [0], [1], [0, 0, 1, 1], [], []>} : vector<4x4xbf16>, vector<4x1024xbf16>, vector<4x1024xf32> -> vector<4x1024xf32>
    %21 = arith.addf %16, %20 : vector<4x1024xf32>
    %c0_24 = arith.constant 0 : index
    %c383 = arith.constant 383 : index
    %22 = vector.load %arg5[%c0_24, %c383] : memref<4x1792xbf16, #tpu.memory_space<vmem>>, vector<4x1024xbf16>
    %c0_25 = arith.constant 0 : index
    %c3 = arith.constant 3 : index
    %c0_26 = arith.constant 0 : index
    %c0_27 = arith.constant 0 : index
    %23 = vector.load %arg2[%c0_25, %c3, %c0_26, %c0_27] : memref<4x9x4x4xbf16, #tpu.memory_space<vmem>>, vector<1x1x4x4xbf16>
    %24 = vector.shape_cast %23 : vector<1x1x4x4xbf16> to vector<4x4xbf16>
    %cst_28 = arith.constant dense<0.000000e+00> : vector<4x1024xf32>
    %25 = tpu.matmul %24, %22, %cst_28 {dimension_numbers = #tpu.dot_dimension_numbers<[1], [0], [0], [1], [0, 0, 1, 1], [], []>} : vector<4x4xbf16>, vector<4x1024xbf16>, vector<4x1024xf32> -> vector<4x1024xf32>
    %26 = arith.addf %21, %25 : vector<4x1024xf32>
    %c0_29 = arith.constant 0 : index
    %c384_30 = arith.constant 384 : index
    %27 = vector.load %arg5[%c0_29, %c384_30] : memref<4x1792xbf16, #tpu.memory_space<vmem>>, vector<4x1024xbf16>
    %c0_31 = arith.constant 0 : index
    %c4 = arith.constant 4 : index
    %c0_32 = arith.constant 0 : index
    %c0_33 = arith.constant 0 : index
    %28 = vector.load %arg2[%c0_31, %c4, %c0_32, %c0_33] : memref<4x9x4x4xbf16, #tpu.memory_space<vmem>>, vector<1x1x4x4xbf16>
    %29 = vector.shape_cast %28 : vector<1x1x4x4xbf16> to vector<4x4xbf16>
    %cst_34 = arith.constant dense<0.000000e+00> : vector<4x1024xf32>
    %30 = tpu.matmul %29, %27, %cst_34 {dimension_numbers = #tpu.dot_dimension_numbers<[1], [0], [0], [1], [0, 0, 1, 1], [], []>} : vector<4x4xbf16>, vector<4x1024xbf16>, vector<4x1024xf32> -> vector<4x1024xf32>
    %31 = arith.addf %26, %30 : vector<4x1024xf32>
    %c0_35 = arith.constant 0 : index
    %c385 = arith.constant 385 : index
    %32 = vector.load %arg5[%c0_35, %c385] : memref<4x1792xbf16, #tpu.memory_space<vmem>>, vector<4x1024xbf16>
    %c0_36 = arith.constant 0 : index
    %c5 = arith.constant 5 : index
    %c0_37 = arith.constant 0 : index
    %c0_38 = arith.constant 0 : index
    %33 = vector.load %arg2[%c0_36, %c5, %c0_37, %c0_38] : memref<4x9x4x4xbf16, #tpu.memory_space<vmem>>, vector<1x1x4x4xbf16>
    %34 = vector.shape_cast %33 : vector<1x1x4x4xbf16> to vector<4x4xbf16>
    %cst_39 = arith.constant dense<0.000000e+00> : vector<4x1024xf32>
    %35 = tpu.matmul %34, %32, %cst_39 {dimension_numbers = #tpu.dot_dimension_numbers<[1], [0], [0], [1], [0, 0, 1, 1], [], []>} : vector<4x4xbf16>, vector<4x1024xbf16>, vector<4x1024xf32> -> vector<4x1024xf32>
    %36 = arith.addf %31, %35 : vector<4x1024xf32>
    %c0_40 = arith.constant 0 : index
    %c415 = arith.constant 415 : index
    %37 = vector.load %arg5[%c0_40, %c415] : memref<4x1792xbf16, #tpu.memory_space<vmem>>, vector<4x1024xbf16>
    %c0_41 = arith.constant 0 : index
    %c6 = arith.constant 6 : index
    %c0_42 = arith.constant 0 : index
    %c0_43 = arith.constant 0 : index
    %38 = vector.load %arg2[%c0_41, %c6, %c0_42, %c0_43] : memref<4x9x4x4xbf16, #tpu.memory_space<vmem>>, vector<1x1x4x4xbf16>
    %39 = vector.shape_cast %38 : vector<1x1x4x4xbf16> to vector<4x4xbf16>
    %cst_44 = arith.constant dense<0.000000e+00> : vector<4x1024xf32>
    %40 = tpu.matmul %39, %37, %cst_44 {dimension_numbers = #tpu.dot_dimension_numbers<[1], [0], [0], [1], [0, 0, 1, 1], [], []>} : vector<4x4xbf16>, vector<4x1024xbf16>, vector<4x1024xf32> -> vector<4x1024xf32>
    %41 = arith.addf %36, %40 : vector<4x1024xf32>
    %c0_45 = arith.constant 0 : index
    %c416 = arith.constant 416 : index
    %42 = vector.load %arg5[%c0_45, %c416] : memref<4x1792xbf16, #tpu.memory_space<vmem>>, vector<4x1024xbf16>
    %c0_46 = arith.constant 0 : index
    %c7 = arith.constant 7 : index
    %c0_47 = arith.constant 0 : index
    %c0_48 = arith.constant 0 : index
    %43 = vector.load %arg2[%c0_46, %c7, %c0_47, %c0_48] : memref<4x9x4x4xbf16, #tpu.memory_space<vmem>>, vector<1x1x4x4xbf16>
    %44 = vector.shape_cast %43 : vector<1x1x4x4xbf16> to vector<4x4xbf16>
    %cst_49 = arith.constant dense<0.000000e+00> : vector<4x1024xf32>
    %45 = tpu.matmul %44, %42, %cst_49 {dimension_numbers = #tpu.dot_dimension_numbers<[1], [0], [0], [1], [0, 0, 1, 1], [], []>} : vector<4x4xbf16>, vector<4x1024xbf16>, vector<4x1024xf32> -> vector<4x1024xf32>
    %46 = arith.addf %41, %45 : vector<4x1024xf32>
    %c0_50 = arith.constant 0 : index
    %c417 = arith.constant 417 : index
    %47 = vector.load %arg5[%c0_50, %c417] : memref<4x1792xbf16, #tpu.memory_space<vmem>>, vector<4x1024xbf16>
    %c0_51 = arith.constant 0 : index
    %c8 = arith.constant 8 : index
    %c0_52 = arith.constant 0 : index
    %c0_53 = arith.constant 0 : index
    %48 = vector.load %arg2[%c0_51, %c8, %c0_52, %c0_53] : memref<4x9x4x4xbf16, #tpu.memory_space<vmem>>, vector<1x1x4x4xbf16>
    %49 = vector.shape_cast %48 : vector<1x1x4x4xbf16> to vector<4x4xbf16>
    %cst_54 = arith.constant dense<0.000000e+00> : vector<4x1024xf32>
    %50 = tpu.matmul %49, %47, %cst_54 {dimension_numbers = #tpu.dot_dimension_numbers<[1], [0], [0], [1], [0, 0, 1, 1], [], []>} : vector<4x4xbf16>, vector<4x1024xbf16>, vector<4x1024xf32> -> vector<4x1024xf32>
    %51 = arith.addf %46, %50 : vector<4x1024xf32>
    %cst_55 = arith.constant 0.000000e+00 : f32
    %52 = vector.broadcast %cst_55 : f32 to vector<4x1024xf32>
    %53 = arith.maximumf %51, %52 : vector<4x1024xf32>
    %54 = arith.mulf %53, %7 : vector<4x1024xf32>
    %55 = arith.truncf %54 : vector<4x1024xf32> to vector<4x1024xbf16>
    %c0_56 = arith.constant 0 : index
    %c384_57 = arith.constant 384 : index
    %56 = vector.load %arg5[%c0_56, %c384_57] : memref<4x1792xbf16, #tpu.memory_space<vmem>>, vector<4x1024xbf16>
    tpu.vector_store %arg5[%c0_56, %c384_57], %55 {strides = array<i32>} : memref<4x1792xbf16, #tpu.memory_space<vmem>>, vector<4x1024xbf16>,
    %57 = arith.addf %4, %54 : vector<4x1024xf32>
    %c0_58 = arith.constant 0 : index
    %c318 = arith.constant 318 : index
    %58 = vector.load %arg5[%c0_58, %c318] : memref<4x1792xbf16, #tpu.memory_space<vmem>>, vector<4x1024xbf16>
    %c1_59 = arith.constant 1 : index
    %c0_60 = arith.constant 0 : index
    %c0_61 = arith.constant 0 : index
    %c0_62 = arith.constant 0 : index
    %59 = vector.load %arg2[%c1_59, %c0_60, %c0_61, %c0_62] : memref<4x9x4x4xbf16, #tpu.memory_space<vmem>>, vector<1x1x4x4xbf16>
    %60 = vector.shape_cast %59 : vector<1x1x4x4xbf16> to vector<4x4xbf16>
    %cst_63 = arith.constant dense<0.000000e+00> : vector<4x1024xf32>
    %61 = tpu.matmul %60, %58, %cst_63 {dimension_numbers = #tpu.dot_dimension_numbers<[1], [0], [0], [1], [0, 0, 1, 1], [], []>} : vector<4x4xbf16>, vector<4x1024xbf16>, vector<4x1024xf32> -> vector<4x1024xf32>
    %c0_64 = arith.constant 0 : index
    %c320 = arith.constant 320 : index
    %62 = vector.load %arg5[%c0_64, %c320] : memref<4x1792xbf16, #tpu.memory_space<vmem>>, vector<4x1024xbf16>
    %c1_65 = arith.constant 1 : index
    %c1_66 = arith.constant 1 : index
    %c0_67 = arith.constant 0 : index
    %c0_68 = arith.constant 0 : index
    %63 = vector.load %arg2[%c1_65, %c1_66, %c0_67, %c0_68] : memref<4x9x4x4xbf16, #tpu.memory_space<vmem>>, vector<1x1x4x4xbf16>
    %64 = vector.shape_cast %63 : vector<1x1x4x4xbf16> to vector<4x4xbf16>
    %cst_69 = arith.constant dense<0.000000e+00> : vector<4x1024xf32>
    %65 = tpu.matmul %64, %62, %cst_69 {dimension_numbers = #tpu.dot_dimension_numbers<[1], [0], [0], [1], [0, 0, 1, 1], [], []>} : vector<4x4xbf16>, vector<4x1024xbf16>, vector<4x1024xf32> -> vector<4x1024xf32>
    %66 = arith.addf %61, %65 : vector<4x1024xf32>
    %c0_70 = arith.constant 0 : index
    %c322 = arith.constant 322 : index
    %67 = vector.load %arg5[%c0_70, %c322] : memref<4x1792xbf16, #tpu.memory_space<vmem>>, vector<4x1024xbf16>
    %c1_71 = arith.constant 1 : index
    %c2_72 = arith.constant 2 : index
    %c0_73 = arith.constant 0 : index
    %c0_74 = arith.constant 0 : index
    %68 = vector.load %arg2[%c1_71, %c2_72, %c0_73, %c0_74] : memref<4x9x4x4xbf16, #tpu.memory_space<vmem>>, vector<1x1x4x4xbf16>
    %69 = vector.shape_cast %68 : vector<1x1x4x4xbf16> to vector<4x4xbf16>
    %cst_75 = arith.constant dense<0.000000e+00> : vector<4x1024xf32>
    %70 = tpu.matmul %69, %67, %cst_75 {dimension_numbers = #tpu.dot_dimension_numbers<[1], [0], [0], [1], [0, 0, 1, 1], [], []>} : vector<4x4xbf16>, vector<4x1024xbf16>, vector<4x1024xf32> -> vector<4x1024xf32>
    %71 = arith.addf %66, %70 : vector<4x1024xf32>
    %c0_76 = arith.constant 0 : index
    %c382 = arith.constant 382 : index
    %72 = vector.load %arg5[%c0_76, %c382] : memref<4x1792xbf16, #tpu.memory_space<vmem>>, vector<4x1024xbf16>
    %c1_77 = arith.constant 1 : index
    %c3_78 = arith.constant 3 : index
    %c0_79 = arith.constant 0 : index
    %c0_80 = arith.constant 0 : index
    %73 = vector.load %arg2[%c1_77, %c3_78, %c0_79, %c0_80] : memref<4x9x4x4xbf16, #tpu.memory_space<vmem>>, vector<1x1x4x4xbf16>
    %74 = vector.shape_cast %73 : vector<1x1x4x4xbf16> to vector<4x4xbf16>
    %cst_81 = arith.constant dense<0.000000e+00> : vector<4x1024xf32>
    %75 = tpu.matmul %74, %72, %cst_81 {dimension_numbers = #tpu.dot_dimension_numbers<[1], [0], [0], [1], [0, 0, 1, 1], [], []>} : vector<4x4xbf16>, vector<4x1024xbf16>, vector<4x1024xf32> -> vector<4x1024xf32>
    %76 = arith.addf %71, %75 : vector<4x1024xf32>
    %c0_82 = arith.constant 0 : index
    %c384_83 = arith.constant 384 : index
    %77 = vector.load %arg5[%c0_82, %c384_83] : memref<4x1792xbf16, #tpu.memory_space<vmem>>, vector<4x1024xbf16>
    %c1_84 = arith.constant 1 : index
    %c4_85 = arith.constant 4 : index
    %c0_86 = arith.constant 0 : index
    %c0_87 = arith.constant 0 : index
    %78 = vector.load %arg2[%c1_84, %c4_85, %c0_86, %c0_87] : memref<4x9x4x4xbf16, #tpu.memory_space<vmem>>, vector<1x1x4x4xbf16>
    %79 = vector.shape_cast %78 : vector<1x1x4x4xbf16> to vector<4x4xbf16>
    %cst_88 = arith.constant dense<0.000000e+00> : vector<4x1024xf32>
    %80 = tpu.matmul %79, %77, %cst_88 {dimension_numbers = #tpu.dot_dimension_numbers<[1], [0], [0], [1], [0, 0, 1, 1], [], []>} : vector<4x4xbf16>, vector<4x1024xbf16>, vector<4x1024xf32> -> vector<4x1024xf32>
    %81 = arith.addf %76, %80 : vector<4x1024xf32>
    %c0_89 = arith.constant 0 : index
    %c386 = arith.constant 386 : index
    %82 = vector.load %arg5[%c0_89, %c386] : memref<4x1792xbf16, #tpu.memory_space<vmem>>, vector<4x1024xbf16>
    %c1_90 = arith.constant 1 : index
    %c5_91 = arith.constant 5 : index
    %c0_92 = arith.constant 0 : index
    %c0_93 = arith.constant 0 : index
    %83 = vector.load %arg2[%c1_90, %c5_91, %c0_92, %c0_93] : memref<4x9x4x4xbf16, #tpu.memory_space<vmem>>, vector<1x1x4x4xbf16>
    %84 = vector.shape_cast %83 : vector<1x1x4x4xbf16> to vector<4x4xbf16>
    %cst_94 = arith.constant dense<0.000000e+00> : vector<4x1024xf32>
    %85 = tpu.matmul %84, %82, %cst_94 {dimension_numbers = #tpu.dot_dimension_numbers<[1], [0], [0], [1], [0, 0, 1, 1], [], []>} : vector<4x4xbf16>, vector<4x1024xbf16>, vector<4x1024xf32> -> vector<4x1024xf32>
    %86 = arith.addf %81, %85 : vector<4x1024xf32>
    %c0_95 = arith.constant 0 : index
    %c446 = arith.constant 446 : index
    %87 = vector.load %arg5[%c0_95, %c446] : memref<4x1792xbf16, #tpu.memory_space<vmem>>, vector<4x1024xbf16>
    %c1_96 = arith.constant 1 : index
    %c6_97 = arith.constant 6 : index
    %c0_98 = arith.constant 0 : index
    %c0_99 = arith.constant 0 : index
    %88 = vector.load %arg2[%c1_96, %c6_97, %c0_98, %c0_99] : memref<4x9x4x4xbf16, #tpu.memory_space<vmem>>, vector<1x1x4x4xbf16>
    %89 = vector.shape_cast %88 : vector<1x1x4x4xbf16> to vector<4x4xbf16>
    %cst_100 = arith.constant dense<0.000000e+00> : vector<4x1024xf32>
    %90 = tpu.matmul %89, %87, %cst_100 {dimension_numbers = #tpu.dot_dimension_numbers<[1], [0], [0], [1], [0, 0, 1, 1], [], []>} : vector<4x4xbf16>, vector<4x1024xbf16>, vector<4x1024xf32> -> vector<4x1024xf32>
    %91 = arith.addf %86, %90 : vector<4x1024xf32>
    %c0_101 = arith.constant 0 : index
    %c448 = arith.constant 448 : index
    %92 = vector.load %arg5[%c0_101, %c448] : memref<4x1792xbf16, #tpu.memory_space<vmem>>, vector<4x1024xbf16>
    %c1_102 = arith.constant 1 : index
    %c7_103 = arith.constant 7 : index
    %c0_104 = arith.constant 0 : index
    %c0_105 = arith.constant 0 : index
    %93 = vector.load %arg2[%c1_102, %c7_103, %c0_104, %c0_105] : memref<4x9x4x4xbf16, #tpu.memory_space<vmem>>, vector<1x1x4x4xbf16>
    %94 = vector.shape_cast %93 : vector<1x1x4x4xbf16> to vector<4x4xbf16>
    %cst_106 = arith.constant dense<0.000000e+00> : vector<4x1024xf32>
    %95 = tpu.matmul %94, %92, %cst_106 {dimension_numbers = #tpu.dot_dimension_numbers<[1], [0], [0], [1], [0, 0, 1, 1], [], []>} : vector<4x4xbf16>, vector<4x1024xbf16>, vector<4x1024xf32> -> vector<4x1024xf32>
    %96 = arith.addf %91, %95 : vector<4x1024xf32>
    %c0_107 = arith.constant 0 : index
    %c450 = arith.constant 450 : index
    %97 = vector.load %arg5[%c0_107, %c450] : memref<4x1792xbf16, #tpu.memory_space<vmem>>, vector<4x1024xbf16>
    %c1_108 = arith.constant 1 : index
    %c8_109 = arith.constant 8 : index
    %c0_110 = arith.constant 0 : index
    %c0_111 = arith.constant 0 : index
    %98 = vector.load %arg2[%c1_108, %c8_109, %c0_110, %c0_111] : memref<4x9x4x4xbf16, #tpu.memory_space<vmem>>, vector<1x1x4x4xbf16>
    %99 = vector.shape_cast %98 : vector<1x1x4x4xbf16> to vector<4x4xbf16>
    %cst_112 = arith.constant dense<0.000000e+00> : vector<4x1024xf32>
    %100 = tpu.matmul %99, %97, %cst_112 {dimension_numbers = #tpu.dot_dimension_numbers<[1], [0], [0], [1], [0, 0, 1, 1], [], []>} : vector<4x4xbf16>, vector<4x1024xbf16>, vector<4x1024xf32> -> vector<4x1024xf32>
    %101 = arith.addf %96, %100 : vector<4x1024xf32>
    %cst_113 = arith.constant 0.000000e+00 : f32
    %102 = vector.broadcast %cst_113 : f32 to vector<4x1024xf32>
    %103 = arith.maximumf %101, %102 : vector<4x1024xf32>
    %104 = arith.mulf %103, %7 : vector<4x1024xf32>
    %105 = arith.truncf %104 : vector<4x1024xf32> to vector<4x1024xbf16>
    %c0_114 = arith.constant 0 : index
    %c384_115 = arith.constant 384 : index
    %106 = vector.load %arg5[%c0_114, %c384_115] : memref<4x1792xbf16, #tpu.memory_space<vmem>>, vector<4x1024xbf16>
    tpu.vector_store %arg5[%c0_114, %c384_115], %105 {strides = array<i32>} : memref<4x1792xbf16, #tpu.memory_space<vmem>>, vector<4x1024xbf16>,
    %107 = arith.addf %57, %104 : vector<4x1024xf32>
    %c0_116 = arith.constant 0 : index
    %c252 = arith.constant 252 : index
    %108 = vector.load %arg5[%c0_116, %c252] : memref<4x1792xbf16, #tpu.memory_space<vmem>>, vector<4x1024xbf16>
    %c2_117 = arith.constant 2 : index
    %c0_118 = arith.constant 0 : index
    %c0_119 = arith.constant 0 : index
    %c0_120 = arith.constant 0 : index
    %109 = vector.load %arg2[%c2_117, %c0_118, %c0_119, %c0_120] : memref<4x9x4x4xbf16, #tpu.memory_space<vmem>>, vector<1x1x4x4xbf16>
    %110 = vector.shape_cast %109 : vector<1x1x4x4xbf16> to vector<4x4xbf16>
    %cst_121 = arith.constant dense<0.000000e+00> : vector<4x1024xf32>
    %111 = tpu.matmul %110, %108, %cst_121 {dimension_numbers = #tpu.dot_dimension_numbers<[1], [0], [0], [1], [0, 0, 1, 1], [], []>} : vector<4x4xbf16>, vector<4x1024xbf16>, vector<4x1024xf32> -> vector<4x1024xf32>
    %c0_122 = arith.constant 0 : index
    %c256 = arith.constant 256 : index
    %112 = vector.load %arg5[%c0_122, %c256] : memref<4x1792xbf16, #tpu.memory_space<vmem>>, vector<4x1024xbf16>
    %c2_123 = arith.constant 2 : index
    %c1_124 = arith.constant 1 : index
    %c0_125 = arith.constant 0 : index
    %c0_126 = arith.constant 0 : index
    %113 = vector.load %arg2[%c2_123, %c1_124, %c0_125, %c0_126] : memref<4x9x4x4xbf16, #tpu.memory_space<vmem>>, vector<1x1x4x4xbf16>
    %114 = vector.shape_cast %113 : vector<1x1x4x4xbf16> to vector<4x4xbf16>
    %cst_127 = arith.constant dense<0.000000e+00> : vector<4x1024xf32>
    %115 = tpu.matmul %114, %112, %cst_127 {dimension_numbers = #tpu.dot_dimension_numbers<[1], [0], [0], [1], [0, 0, 1, 1], [], []>} : vector<4x4xbf16>, vector<4x1024xbf16>, vector<4x1024xf32> -> vector<4x1024xf32>
    %116 = arith.addf %111, %115 : vector<4x1024xf32>
    %c0_128 = arith.constant 0 : index
    %c260 = arith.constant 260 : index
    %117 = vector.load %arg5[%c0_128, %c260] : memref<4x1792xbf16, #tpu.memory_space<vmem>>, vector<4x1024xbf16>
    %c2_129 = arith.constant 2 : index
    %c2_130 = arith.constant 2 : index
    %c0_131 = arith.constant 0 : index
    %c0_132 = arith.constant 0 : index
    %118 = vector.load %arg2[%c2_129, %c2_130, %c0_131, %c0_132] : memref<4x9x4x4xbf16, #tpu.memory_space<vmem>>, vector<1x1x4x4xbf16>
    %119 = vector.shape_cast %118 : vector<1x1x4x4xbf16> to vector<4x4xbf16>
    %cst_133 = arith.constant dense<0.000000e+00> : vector<4x1024xf32>
    %120 = tpu.matmul %119, %117, %cst_133 {dimension_numbers = #tpu.dot_dimension_numbers<[1], [0], [0], [1], [0, 0, 1, 1], [], []>} : vector<4x4xbf16>, vector<4x1024xbf16>, vector<4x1024xf32> -> vector<4x1024xf32>
    %121 = arith.addf %116, %120 : vector<4x1024xf32>
    %c0_134 = arith.constant 0 : index
    %c380 = arith.constant 380 : index
    %122 = vector.load %arg5[%c0_134, %c380] : memref<4x1792xbf16, #tpu.memory_space<vmem>>, vector<4x1024xbf16>
    %c2_135 = arith.constant 2 : index
    %c3_136 = arith.constant 3 : index
    %c0_137 = arith.constant 0 : index
    %c0_138 = arith.constant 0 : index
    %123 = vector.load %arg2[%c2_135, %c3_136, %c0_137, %c0_138] : memref<4x9x4x4xbf16, #tpu.memory_space<vmem>>, vector<1x1x4x4xbf16>
    %124 = vector.shape_cast %123 : vector<1x1x4x4xbf16> to vector<4x4xbf16>
    %cst_139 = arith.constant dense<0.000000e+00> : vector<4x1024xf32>
    %125 = tpu.matmul %124, %122, %cst_139 {dimension_numbers = #tpu.dot_dimension_numbers<[1], [0], [0], [1], [0, 0, 1, 1], [], []>} : vector<4x4xbf16>, vector<4x1024xbf16>, vector<4x1024xf32> -> vector<4x1024xf32>
    %126 = arith.addf %121, %125 : vector<4x1024xf32>
    %c0_140 = arith.constant 0 : index
    %c384_141 = arith.constant 384 : index
    %127 = vector.load %arg5[%c0_140, %c384_141] : memref<4x1792xbf16, #tpu.memory_space<vmem>>, vector<4x1024xbf16>
    %c2_142 = arith.constant 2 : index
    %c4_143 = arith.constant 4 : index
    %c0_144 = arith.constant 0 : index
    %c0_145 = arith.constant 0 : index
    %128 = vector.load %arg2[%c2_142, %c4_143, %c0_144, %c0_145] : memref<4x9x4x4xbf16, #tpu.memory_space<vmem>>, vector<1x1x4x4xbf16>
    %129 = vector.shape_cast %128 : vector<1x1x4x4xbf16> to vector<4x4xbf16>
    %cst_146 = arith.constant dense<0.000000e+00> : vector<4x1024xf32>
    %130 = tpu.matmul %129, %127, %cst_146 {dimension_numbers = #tpu.dot_dimension_numbers<[1], [0], [0], [1], [0, 0, 1, 1], [], []>} : vector<4x4xbf16>, vector<4x1024xbf16>, vector<4x1024xf32> -> vector<4x1024xf32>
    %131 = arith.addf %126, %130 : vector<4x1024xf32>
    %c0_147 = arith.constant 0 : index
    %c388 = arith.constant 388 : index
    %132 = vector.load %arg5[%c0_147, %c388] : memref<4x1792xbf16, #tpu.memory_space<vmem>>, vector<4x1024xbf16>
    %c2_148 = arith.constant 2 : index
    %c5_149 = arith.constant 5 : index
    %c0_150 = arith.constant 0 : index
    %c0_151 = arith.constant 0 : index
    %133 = vector.load %arg2[%c2_148, %c5_149, %c0_150, %c0_151] : memref<4x9x4x4xbf16, #tpu.memory_space<vmem>>, vector<1x1x4x4xbf16>
    %134 = vector.shape_cast %133 : vector<1x1x4x4xbf16> to vector<4x4xbf16>
    %cst_152 = arith.constant dense<0.000000e+00> : vector<4x1024xf32>
    %135 = tpu.matmul %134, %132, %cst_152 {dimension_numbers = #tpu.dot_dimension_numbers<[1], [0], [0], [1], [0, 0, 1, 1], [], []>} : vector<4x4xbf16>, vector<4x1024xbf16>, vector<4x1024xf32> -> vector<4x1024xf32>
    %136 = arith.addf %131, %135 : vector<4x1024xf32>
    %c0_153 = arith.constant 0 : index
    %c508 = arith.constant 508 : index
    %137 = vector.load %arg5[%c0_153, %c508] : memref<4x1792xbf16, #tpu.memory_space<vmem>>, vector<4x1024xbf16>
    %c2_154 = arith.constant 2 : index
    %c6_155 = arith.constant 6 : index
    %c0_156 = arith.constant 0 : index
    %c0_157 = arith.constant 0 : index
    %138 = vector.load %arg2[%c2_154, %c6_155, %c0_156, %c0_157] : memref<4x9x4x4xbf16, #tpu.memory_space<vmem>>, vector<1x1x4x4xbf16>
    %139 = vector.shape_cast %138 : vector<1x1x4x4xbf16> to vector<4x4xbf16>
    %cst_158 = arith.constant dense<0.000000e+00> : vector<4x1024xf32>
    %140 = tpu.matmul %139, %137, %cst_158 {dimension_numbers = #tpu.dot_dimension_numbers<[1], [0], [0], [1], [0, 0, 1, 1], [], []>} : vector<4x4xbf16>, vector<4x1024xbf16>, vector<4x1024xf32> -> vector<4x1024xf32>
    %141 = arith.addf %136, %140 : vector<4x1024xf32>
    %c0_159 = arith.constant 0 : index
    %c512 = arith.constant 512 : index
    %142 = vector.load %arg5[%c0_159, %c512] : memref<4x1792xbf16, #tpu.memory_space<vmem>>, vector<4x1024xbf16>
    %c2_160 = arith.constant 2 : index
    %c7_161 = arith.constant 7 : index
    %c0_162 = arith.constant 0 : index
    %c0_163 = arith.constant 0 : index
    %143 = vector.load %arg2[%c2_160, %c7_161, %c0_162, %c0_163] : memref<4x9x4x4xbf16, #tpu.memory_space<vmem>>, vector<1x1x4x4xbf16>
    %144 = vector.shape_cast %143 : vector<1x1x4x4xbf16> to vector<4x4xbf16>
    %cst_164 = arith.constant dense<0.000000e+00> : vector<4x1024xf32>
    %145 = tpu.matmul %144, %142, %cst_164 {dimension_numbers = #tpu.dot_dimension_numbers<[1], [0], [0], [1], [0, 0, 1, 1], [], []>} : vector<4x4xbf16>, vector<4x1024xbf16>, vector<4x1024xf32> -> vector<4x1024xf32>
    %146 = arith.addf %141, %145 : vector<4x1024xf32>
    %c0_165 = arith.constant 0 : index
    %c516 = arith.constant 516 : index
    %147 = vector.load %arg5[%c0_165, %c516] : memref<4x1792xbf16, #tpu.memory_space<vmem>>, vector<4x1024xbf16>
    %c2_166 = arith.constant 2 : index
    %c8_167 = arith.constant 8 : index
    %c0_168 = arith.constant 0 : index
    %c0_169 = arith.constant 0 : index
    %148 = vector.load %arg2[%c2_166, %c8_167, %c0_168, %c0_169] : memref<4x9x4x4xbf16, #tpu.memory_space<vmem>>, vector<1x1x4x4xbf16>
    %149 = vector.shape_cast %148 : vector<1x1x4x4xbf16> to vector<4x4xbf16>
    %cst_170 = arith.constant dense<0.000000e+00> : vector<4x1024xf32>
    %150 = tpu.matmul %149, %147, %cst_170 {dimension_numbers = #tpu.dot_dimension_numbers<[1], [0], [0], [1], [0, 0, 1, 1], [], []>} : vector<4x4xbf16>, vector<4x1024xbf16>, vector<4x1024xf32> -> vector<4x1024xf32>
    %151 = arith.addf %146, %150 : vector<4x1024xf32>
    %cst_171 = arith.constant 0.000000e+00 : f32
    %152 = vector.broadcast %cst_171 : f32 to vector<4x1024xf32>
    %153 = arith.maximumf %151, %152 : vector<4x1024xf32>
    %154 = arith.mulf %153, %7 : vector<4x1024xf32>
    %155 = arith.truncf %154 : vector<4x1024xf32> to vector<4x1024xbf16>
    %c0_172 = arith.constant 0 : index
    %c384_173 = arith.constant 384 : index
    %156 = vector.load %arg5[%c0_172, %c384_173] : memref<4x1792xbf16, #tpu.memory_space<vmem>>, vector<4x1024xbf16>
    tpu.vector_store %arg5[%c0_172, %c384_173], %155 {strides = array<i32>} : memref<4x1792xbf16, #tpu.memory_space<vmem>>, vector<4x1024xbf16>,
    %157 = arith.addf %107, %154 : vector<4x1024xf32>
    %c0_174 = arith.constant 0 : index
    %c120 = arith.constant 120 : index
    %158 = vector.load %arg5[%c0_174, %c120] : memref<4x1792xbf16, #tpu.memory_space<vmem>>, vector<4x1024xbf16>
    %c3_175 = arith.constant 3 : index
    %c0_176 = arith.constant 0 : index
    %c0_177 = arith.constant 0 : index
    %c0_178 = arith.constant 0 : index
    %159 = vector.load %arg2[%c3_175, %c0_176, %c0_177, %c0_178] : memref<4x9x4x4xbf16, #tpu.memory_space<vmem>>, vector<1x1x4x4xbf16>
    %160 = vector.shape_cast %159 : vector<1x1x4x4xbf16> to vector<4x4xbf16>
    %cst_179 = arith.constant dense<0.000000e+00> : vector<4x1024xf32>
    %161 = tpu.matmul %160, %158, %cst_179 {dimension_numbers = #tpu.dot_dimension_numbers<[1], [0], [0], [1], [0, 0, 1, 1], [], []>} : vector<4x4xbf16>, vector<4x1024xbf16>, vector<4x1024xf32> -> vector<4x1024xf32>
    %c0_180 = arith.constant 0 : index
    %c128 = arith.constant 128 : index
    %162 = vector.load %arg5[%c0_180, %c128] : memref<4x1792xbf16, #tpu.memory_space<vmem>>, vector<4x1024xbf16>
    %c3_181 = arith.constant 3 : index
    %c1_182 = arith.constant 1 : index
    %c0_183 = arith.constant 0 : index
    %c0_184 = arith.constant 0 : index
    %163 = vector.load %arg2[%c3_181, %c1_182, %c0_183, %c0_184] : memref<4x9x4x4xbf16, #tpu.memory_space<vmem>>, vector<1x1x4x4xbf16>
    %164 = vector.shape_cast %163 : vector<1x1x4x4xbf16> to vector<4x4xbf16>
    %cst_185 = arith.constant dense<0.000000e+00> : vector<4x1024xf32>
    %165 = tpu.matmul %164, %162, %cst_185 {dimension_numbers = #tpu.dot_dimension_numbers<[1], [0], [0], [1], [0, 0, 1, 1], [], []>} : vector<4x4xbf16>, vector<4x1024xbf16>, vector<4x1024xf32> -> vector<4x1024xf32>
    %166 = arith.addf %161, %165 : vector<4x1024xf32>
    %c0_186 = arith.constant 0 : index
    %c136 = arith.constant 136 : index
    %167 = vector.load %arg5[%c0_186, %c136] : memref<4x1792xbf16, #tpu.memory_space<vmem>>, vector<4x1024xbf16>
    %c3_187 = arith.constant 3 : index
    %c2_188 = arith.constant 2 : index
    %c0_189 = arith.constant 0 : index
    %c0_190 = arith.constant 0 : index
    %168 = vector.load %arg2[%c3_187, %c2_188, %c0_189, %c0_190] : memref<4x9x4x4xbf16, #tpu.memory_space<vmem>>, vector<1x1x4x4xbf16>
    %169 = vector.shape_cast %168 : vector<1x1x4x4xbf16> to vector<4x4xbf16>
    %cst_191 = arith.constant dense<0.000000e+00> : vector<4x1024xf32>
    %170 = tpu.matmul %169, %167, %cst_191 {dimension_numbers = #tpu.dot_dimension_numbers<[1], [0], [0], [1], [0, 0, 1, 1], [], []>} : vector<4x4xbf16>, vector<4x1024xbf16>, vector<4x1024xf32> -> vector<4x1024xf32>
    %171 = arith.addf %166, %170 : vector<4x1024xf32>
    %c0_192 = arith.constant 0 : index
    %c376 = arith.constant 376 : index
    %172 = vector.load %arg5[%c0_192, %c376] : memref<4x1792xbf16, #tpu.memory_space<vmem>>, vector<4x1024xbf16>
    %c3_193 = arith.constant 3 : index
    %c3_194 = arith.constant 3 : index
    %c0_195 = arith.constant 0 : index
    %c0_196 = arith.constant 0 : index
    %173 = vector.load %arg2[%c3_193, %c3_194, %c0_195, %c0_196] : memref<4x9x4x4xbf16, #tpu.memory_space<vmem>>, vector<1x1x4x4xbf16>
    %174 = vector.shape_cast %173 : vector<1x1x4x4xbf16> to vector<4x4xbf16>
    %cst_197 = arith.constant dense<0.000000e+00> : vector<4x1024xf32>
    %175 = tpu.matmul %174, %172, %cst_197 {dimension_numbers = #tpu.dot_dimension_numbers<[1], [0], [0], [1], [0, 0, 1, 1], [], []>} : vector<4x4xbf16>, vector<4x1024xbf16>, vector<4x1024xf32> -> vector<4x1024xf32>
    %176 = arith.addf %171, %175 : vector<4x1024xf32>
    %c0_198 = arith.constant 0 : index
    %c384_199 = arith.constant 384 : index
    %177 = vector.load %arg5[%c0_198, %c384_199] : memref<4x1792xbf16, #tpu.memory_space<vmem>>, vector<4x1024xbf16>
    %c3_200 = arith.constant 3 : index
    %c4_201 = arith.constant 4 : index
    %c0_202 = arith.constant 0 : index
    %c0_203 = arith.constant 0 : index
    %178 = vector.load %arg2[%c3_200, %c4_201, %c0_202, %c0_203] : memref<4x9x4x4xbf16, #tpu.memory_space<vmem>>, vector<1x1x4x4xbf16>
    %179 = vector.shape_cast %178 : vector<1x1x4x4xbf16> to vector<4x4xbf16>
    %cst_204 = arith.constant dense<0.000000e+00> : vector<4x1024xf32>
    %180 = tpu.matmul %179, %177, %cst_204 {dimension_numbers = #tpu.dot_dimension_numbers<[1], [0], [0], [1], [0, 0, 1, 1], [], []>} : vector<4x4xbf16>, vector<4x1024xbf16>, vector<4x1024xf32> -> vector<4x1024xf32>
    %181 = arith.addf %176, %180 : vector<4x1024xf32>
    %c0_205 = arith.constant 0 : index
    %c392 = arith.constant 392 : index
    %182 = vector.load %arg5[%c0_205, %c392] : memref<4x1792xbf16, #tpu.memory_space<vmem>>, vector<4x1024xbf16>
    %c3_206 = arith.constant 3 : index
    %c5_207 = arith.constant 5 : index
    %c0_208 = arith.constant 0 : index
    %c0_209 = arith.constant 0 : index
    %183 = vector.load %arg2[%c3_206, %c5_207, %c0_208, %c0_209] : memref<4x9x4x4xbf16, #tpu.memory_space<vmem>>, vector<1x1x4x4xbf16>
    %184 = vector.shape_cast %183 : vector<1x1x4x4xbf16> to vector<4x4xbf16>
    %cst_210 = arith.constant dense<0.000000e+00> : vector<4x1024xf32>
    %185 = tpu.matmul %184, %182, %cst_210 {dimension_numbers = #tpu.dot_dimension_numbers<[1], [0], [0], [1], [0, 0, 1, 1], [], []>} : vector<4x4xbf16>, vector<4x1024xbf16>, vector<4x1024xf32> -> vector<4x1024xf32>
    %186 = arith.addf %181, %185 : vector<4x1024xf32>
    %c0_211 = arith.constant 0 : index
    %c632 = arith.constant 632 : index
    %187 = vector.load %arg5[%c0_211, %c632] : memref<4x1792xbf16, #tpu.memory_space<vmem>>, vector<4x1024xbf16>
    %c3_212 = arith.constant 3 : index
    %c6_213 = arith.constant 6 : index
    %c0_214 = arith.constant 0 : index
    %c0_215 = arith.constant 0 : index
    %188 = vector.load %arg2[%c3_212, %c6_213, %c0_214, %c0_215] : memref<4x9x4x4xbf16, #tpu.memory_space<vmem>>, vector<1x1x4x4xbf16>
    %189 = vector.shape_cast %188 : vector<1x1x4x4xbf16> to vector<4x4xbf16>
    %cst_216 = arith.constant dense<0.000000e+00> : vector<4x1024xf32>
    %190 = tpu.matmul %189, %187, %cst_216 {dimension_numbers = #tpu.dot_dimension_numbers<[1], [0], [0], [1], [0, 0, 1, 1], [], []>} : vector<4x4xbf16>, vector<4x1024xbf16>, vector<4x1024xf32> -> vector<4x1024xf32>
    %191 = arith.addf %186, %190 : vector<4x1024xf32>
    %c0_217 = arith.constant 0 : index
    %c640 = arith.constant 640 : index
    %192 = vector.load %arg5[%c0_217, %c640] : memref<4x1792xbf16, #tpu.memory_space<vmem>>, vector<4x1024xbf16>
    %c3_218 = arith.constant 3 : index
    %c7_219 = arith.constant 7 : index
    %c0_220 = arith.constant 0 : index
    %c0_221 = arith.constant 0 : index
    %193 = vector.load %arg2[%c3_218, %c7_219, %c0_220, %c0_221] : memref<4x9x4x4xbf16, #tpu.memory_space<vmem>>, vector<1x1x4x4xbf16>
    %194 = vector.shape_cast %193 : vector<1x1x4x4xbf16> to vector<4x4xbf16>
    %cst_222 = arith.constant dense<0.000000e+00> : vector<4x1024xf32>
    %195 = tpu.matmul %194, %192, %cst_222 {dimension_numbers = #tpu.dot_dimension_numbers<[1], [0], [0], [1], [0, 0, 1, 1], [], []>} : vector<4x4xbf16>, vector<4x1024xbf16>, vector<4x1024xf32> -> vector<4x1024xf32>
    %196 = arith.addf %191, %195 : vector<4x1024xf32>
    %c0_223 = arith.constant 0 : index
    %c648 = arith.constant 648 : index
    %197 = vector.load %arg5[%c0_223, %c648] : memref<4x1792xbf16, #tpu.memory_space<vmem>>, vector<4x1024xbf16>
    %c3_224 = arith.constant 3 : index
    %c8_225 = arith.constant 8 : index
    %c0_226 = arith.constant 0 : index
    %c0_227 = arith.constant 0 : index
    %198 = vector.load %arg2[%c3_224, %c8_225, %c0_226, %c0_227] : memref<4x9x4x4xbf16, #tpu.memory_space<vmem>>, vector<1x1x4x4xbf16>
    %199 = vector.shape_cast %198 : vector<1x1x4x4xbf16> to vector<4x4xbf16>
    %cst_228 = arith.constant dense<0.000000e+00> : vector<4x1024xf32>
    %200 = tpu.matmul %199, %197, %cst_228 {dimension_numbers = #tpu.dot_dimension_numbers<[1], [0], [0], [1], [0, 0, 1, 1], [], []>} : vector<4x4xbf16>, vector<4x1024xbf16>, vector<4x1024xf32> -> vector<4x1024xf32>
    %201 = arith.addf %196, %200 : vector<4x1024xf32>
    %cst_229 = arith.constant 0.000000e+00 : f32
    %202 = vector.broadcast %cst_229 : f32 to vector<4x1024xf32>
    %203 = arith.maximumf %201, %202 : vector<4x1024xf32>
    %204 = arith.addf %157, %203 : vector<4x1024xf32>
    %c0_230 = arith.constant 0 : index
    %c0_231 = arith.constant 0 : index
    %c0_232 = arith.constant 0 : index
    %205 = vector.load %arg4[%c0_230, %c0_231, %c0_232] : memref<1x4x1024xf32, #tpu.memory_space<vmem>>, vector<1x4x1024xf32>
    %206 = vector.shape_cast %205 : vector<1x4x1024xf32> to vector<4x1024xf32>
    %207 = vector.shape_cast %204 : vector<4x1024xf32> to vector<1x4x1024xf32>
    tpu.vector_store %arg4[%c0_230, %c0_231, %c0_232], %207 {strides = array<i32>} : memref<1x4x1024xf32, #tpu.memory_space<vmem>>, vector<1x4x1024xf32>,
    return
  }
  func.func @transform_0(%arg0: i32) -> (i32, i32, i32) {
    %c0_i32 = arith.constant 0 : i32
    %c0_i32_0 = arith.constant 0 : i32
    %c0_i32_1 = arith.constant 0 : i32
    return %arg0, %c0_i32, %c0_i32_0 : i32, i32, i32
  }
  func.func @transform_1(%arg0: i32) -> (i32, i32, i32, i32) {
    %c0_i32 = arith.constant 0 : i32
    %c0_i32_0 = arith.constant 0 : i32
    %c0_i32_1 = arith.constant 0 : i32
    %c0_i32_2 = arith.constant 0 : i32
    %c0_i32_3 = arith.constant 0 : i32
    return %c0_i32, %c0_i32_0, %c0_i32_1, %c0_i32_2 : i32, i32, i32, i32
  }
  func.func @transform_2(%arg0: i32) -> (i32, i32) {
    %c0_i32 = arith.constant 0 : i32
    %c0_i32_0 = arith.constant 0 : i32
    %c0_i32_1 = arith.constant 0 : i32
    return %c0_i32, %c0_i32_0 : i32, i32
  }
  func.func @transform_3(%arg0: i32) -> (i32, i32, i32) {
    %c0_i32 = arith.constant 0 : i32
    %c0_i32_0 = arith.constant 0 : i32
    %c0_i32_1 = arith.constant 0 : i32
    return %arg0, %c0_i32, %c0_i32_0 : i32, i32, i32
  }
}

</mosaic_0001>

<bundles_post_ra>
// kernel: dblock_pallas.1
= control target key start
LH: loop header
LB: loop body
LE: loop exit
PB: predicated region body
PF: predicated region fallthrough
CT: control target
= control target key end

     0   :  { %s7617_s12 = smov 0   ;;  %s9639_s0 = inlined_call_operand.vmem [shape: f32[2,4,1024], index: 0, kind: input, shape index: {}]   ;;  %s9640_s1 = inlined_call_operand.vmem [shape: bf16[4,9,4,4], index: 1, kind: input, shape index: {}]   ;;  %s9641_s2 = inlined_call_operand.vmem [shape: f32[4,1024], index: 2, kind: input, shape index: {}]   ;;  %s9642_s3 = inlined_call_operand.vmem [shape: f32[2,4,1024], index: 3, kind: output, shape index: {}]  }
   0x1 LB: > { %s7209_s13 = sadd.s32 4294967295, %s7577_s12   ;;  %p7213_p0 = scmp.ge.s32.totalorder %s7577_s12, 1  ;;  %s7577_s12 = sphi %s7617_s12, %s13_s12  }
   0x2   : > { %p137_p1 = scmp.lt.s32.totalorder %s7577_s12, 3 }
   0x4   : > { %p138_p2 = pnand %p7213_p0, %p137_p1 }
   0x5   : > { %p161_p3 = scmp.lt.s32.totalorder (!%p138_p2), %s7209_s13, 1  ;;  %s7580_s18 = smov (!%p138_p2), 32  }
   0x6   : > { %141 = sbr.rel (%p138_p2) target bundleno = 2178 (0x882), region = 32  ;;  %s7581_s19 = smov (!%p138_p2), 33  }
   0x7   : > { %s7582_s20 = smov (!%p138_p2), 31   ;;  %s7583_s21 = smov (!%p138_p2), 1  }
   0x8   : > { %s7584_s22 = smov (!%p138_p2), 127   ;;  %s7585_s25 = smov (!%p138_p2), 97  }
   0x9   : > { %s7586_s30 = smov (!%p138_p2), 96   ;;  %s7587_s6 = smov (!%p138_p2), 95  }
   0xa   : > { %s7588_s28 = smov (!%p138_p2), 64   ;;  %s7589_s29 = smov (!%p138_p2), 66  }
   0xb   : > { %v7579_v0 = vmov 0   ;;  %s9644_s13 = smov (!%p161_p3, %s7209_s13), 1  ;;  %vm219_vm0 = vcmask 1041408   ;;  %vm223_vm1 = vcmask 1045508   ;;  %vm227_vm2 = vcmask 1043456   ;;  %s7591_s4 = smov 2  }
   0xc   : > { %172 = vst [vmem:[#allocation2] sm:$0x3f] %v7579_v0  ;;  %s7543_s14 = sshll.u32 %s9644_s13, 5  ;;  %vm293_vm3 = vcmask 261120   ;;  %vm302_vm4 = vcmask 31744   ;;  %vm474_vm5 = vcmask 269312  }
   0xd   : > { %173 = vst [vmem:[#allocation2 + $0x16] sm:$0x3f] %v7579_v0  ;;  %s165_s17 = scalar_lea.vmem %s9639_s0, %s7543_s14  ;;  %vm662_vm6 = vcmask 252928   ;;  %vm858_vm7 = vcmask 7168   ;;  %vm1202_vm8 = vcmask 1039360   ;;  %vm1398_vm9 = vcmask 793600  }
   0xe   : > { %v7633_v1 = vld [vmem:[%s165_s17] sm:$0xff]  ;;  %v7635_v2 = vld [vmem:[%s165_s17 + $0x8] sm:$0xff]  ;;  %v7637_v3 = vld [vmem:[%s165_s17 + $0x10] sm:$0xff]  ;;  %vm1594_vm10 = vcmask 785408   ;;  %vm1790_vm11 = vcmask 777216   ;;  %s7592_s5 = smov 126  }
   0xf   : > { %v7639_v4 = vld [vmem:[%s165_s17 + $0x18] sm:$0xff]  ;;  %182 = vst [vmem:[#allocation1] ss:$2 sm:$0xff] %v7633_v1  ;;  %vm2087_vm12 = vcmask 523264   ;;  %vm2267_vm13 = vcmask 539648   ;;  %vm2455_vm14 = vcmask 506880  }
  0x10   : > { %184 = vst [vmem:[#allocation1 + $0x10] ss:$2 sm:$0xff] %v7635_v2  ;;  %vm2651_vm15 = vcmask 15360   ;;  %s7593_s27 = smov 4   ;;  %s7595_s23 = smov 8  }
  0x11   : > { %186 = vst [vmem:[#allocation1 + $0x20] ss:$2 sm:$0xff] %v7637_v3  ;;  %s7596_s24 = smov 120  }
  0x12   : > { %188 = vst [vmem:[#allocation1 + $0x30] ss:$2 sm:$0xff] %v7639_v4 }
  0x16   : > { %v189_v5 = vld.sshfl [vmem:[#allocation1] sm:$0xff pattern:$0x75316420]  ;;  %v190_v6 = vld.sshfl [vmem:[#allocation1 + $0x8] sm:$0xff pattern:$0x75316420] }
  0x17   : > { %v191_v7 = vld.sshfl [vmem:[#allocation1 + $0x10] sm:$0xff pattern:$0x75316420]  ;;  %v192_v8 = vld.sshfl [vmem:[#allocation1 + $0x18] sm:$0xff pattern:$0x75316420]  ;;  %v205_v9 = vpack.c.bf16 %v190_v6, %v189_v5 }
  0x18   : > { %v193_v10 = vld.sshfl [vmem:[#allocation1 + $0x20] sm:$0xff pattern:$0x75316420]  ;;  %v194_v11 = vld.sshfl [vmem:[#allocation1 + $0x28] sm:$0xff pattern:$0x75316420]  ;;  %v206_v12 = vpack.c.bf16 %v192_v8, %v191_v7 }
  0x19   : > { %v195_v13 = vld.sshfl [vmem:[#allocation1 + $0x30] sm:$0xff pattern:$0x75316420]  ;;  %v196_v14 = vld.sshfl [vmem:[#allocation1 + $0x38] sm:$0xff pattern:$0x75316420]  ;;  %v207_v15 = vpack.c.bf16 %v194_v11, %v193_v10 }
  0x1a   : > { %v208_v16 = vpack.c.bf16 %v196_v14, %v195_v13  ;;  %v213_v17 = vrot.slane %v205_v9, 2  ;;  %v214_v18 = vrot.slane %v206_v12, 4  ;;  %v215_v19 = vrot.slane %v206_v12, 6  ;;  %v1156_v10 = vld [vmem:[#allocation2 + $0x16] sm:$0x3] }
  0x1b   : > { %v216_v20 = vrot.slane %v207_v15, 2 }
  0x1c   : > { %v217_v21 = vrot.slane %v208_v16, 4  ;;  %v218_v22 = vrot.slane %v208_v16, 6  ;;  %v222_v23 = vsel %vm219_vm0, %v205_v9, %v213_v17  ;;  %v226_v24 = vsel %vm223_vm1, %v214_v18, %v215_v19  ;;  %v1352_v19 = vld [vmem:[#allocation2 + $0x16] sm:$0x3] }
  0x1d   : > { %v7648_v25 = vsel %vm227_vm2, %v222_v23, %v226_v24  ;;  %v231_v26 = vsel %vm219_vm0, %v207_v15, %v216_v20 }
  0x1e   : > { %v234_v27 = vsel %vm223_vm1, %v217_v21, %v218_v22  ;;  %238 = vst [vmem:[#allocation2 + $0x6] sm:$0xff] %v7648_v25 }
  0x1f   : > { %v7654_v28 = vsel %vm227_vm2, %v231_v26, %v234_v27 }
  0x20   : > { %239 = vst [vmem:[#allocation2 + $0xe] sm:$0xff] %v7654_v28 }
  0x25   : > { %v614_v29 = vld [vmem:[#allocation2 + $0x4] sm:$0xff] }
  0x26   : > { %251 = vst [vmem:[#allocation1] ss:$4 sm:$0xff] %v614_v29 }
  0x27   : > { %v7657_v30 = vld [vmem:[#allocation2 + $0xc] sm:$0xff]  ;;  %v246_v31 = vld [vmem:[#allocation2 + $0x14] sm:$0x3] }
  0x28   : > { %254 = vst [vmem:[#allocation1 + $0x20] ss:$4 sm:$0xff] %v7657_v30  ;;  %v616_v48 = vld [vmem:[#allocation2 + $0x14] sm:$0x3] }
  0x29   : > { %v812_v56 = vld [vmem:[#allocation2 + $0x14] sm:$0x3] }
  0x2d   : > { %v255_v32 = vld.sshfl [vmem:[#allocation1] sm:$0xff pattern:$0x73625140]  ;;  %v257_v33 = vld.sshfl [vmem:[#allocation1 + $0x8] sm:$0xff pattern:$0x73625140] }
  0x2e   : > { %v259_v34 = vld.sshfl [vmem:[#allocation1 + $0x10] sm:$0xff pattern:$0x73625140]  ;;  %v261_v35 = vld.sshfl [vmem:[#allocation1 + $0x18] sm:$0xff pattern:$0x73625140]  ;;  %277 = vrot.lane.b32.xlu2 %v257_v33, %s7580_s18 }
  0x2f   : > { %v263_v36 = vld.sshfl [vmem:[#allocation1 + $0x20] sm:$0xff pattern:$0x73625140]  ;;  %272 = vst [vmem:[#allocation1] ss:$4 sm:$0xff] %v246_v31  ;;  %279 = vrot.lane.b32.xlu0 %v259_v34, %s7580_s18 }
  0x30   : > { %283 = vrot.lane.b32.xlu1 %v263_v36, %s7580_s18  ;;  %v269_v37 = vld.sshfl [vmem:[#allocation1 + $0x38] sm:$0xff pattern:$0x73625140]  ;;  %v267_v38 = vld.sshfl [vmem:[#allocation1 + $0x30] sm:$0xff pattern:$0x73625140] }
  0x31   : > { %v265_v39 = vld.sshfl [vmem:[#allocation1 + $0x28] sm:$0xff pattern:$0x73625140]  ;;  %v1548_v34 = vld [vmem:[#allocation2 + $0x16] sm:$0x3] }
  0x32   : > { %436 = vst [vmem:[#allocation1 + $0x20] ss:$4 sm:$0xff] %v7657_v30 }
  0x36   : > { %v273_v40 = vld.sshfl [vmem:[#allocation1] sm:$0xff pattern:$0x73625140]  ;;  %287 = vrot.lane.b32.xlu2 %v267_v38, %s7580_s18 }
  0x37   : > { %434 = vst [vmem:[#allocation1] ss:$4 sm:$0xff] %v614_v29  ;;  %281 = vrot.lane.b32.xlu0 %v261_v35, %s7580_s18 }
  0x38   : > { %275 = vrot.lane.b32.xlu1 %v255_v32, %s7580_s18 }
  0x39   : > { %v445_v45 = vld.sshfl [vmem:[#allocation1 + $0x20] sm:$0xff pattern:$0x73625140]  ;;  %v449_v47 = vld.sshfl [vmem:[#allocation1 + $0x30] sm:$0xff pattern:$0x73625140] }
  0x3a   : > { %v451_v51 = vld.sshfl [vmem:[#allocation1 + $0x38] sm:$0xff pattern:$0x73625140]  ;;  %v447_v54 = vld.sshfl [vmem:[#allocation1 + $0x28] sm:$0xff pattern:$0x73625140] }
  0x3b   : > { %623 = vst [vmem:[#allocation1 + $0x20] ss:$4 sm:$0xff] %v7657_v30 }
  0x3e   : > { %v437_v41 = vld.sshfl [vmem:[#allocation1] sm:$0xff pattern:$0x73625140]  ;;  %v439_v42 = vld.sshfl [vmem:[#allocation1 + $0x8] sm:$0xff pattern:$0x73625140]  ;;  %285 = vrot.lane.b32.xlu2 %v265_v39, %s7580_s18 }
  0x3f   : > { %v441_v43 = vld.sshfl [vmem:[#allocation1 + $0x10] sm:$0xff pattern:$0x73625140]  ;;  %v443_v44 = vld.sshfl [vmem:[#allocation1 + $0x18] sm:$0xff pattern:$0x73625140]  ;;  %289 = vrot.lane.b32.xlu0 %v269_v37, %s7580_s18 }
  0x40   : > { %453 = vst [vmem:[#allocation1] ss:$4 sm:$0xff] %v246_v31  ;;  %291 = vrot.lane.b32.xlu1 %v273_v40, %s7580_s18 }
  0x42   : > { %v632_v57 = vld.sshfl [vmem:[#allocation1 + $0x20] sm:$0xff pattern:$0x73625140]  ;;  %v636_v62 = vld.sshfl [vmem:[#allocation1 + $0x30] sm:$0xff pattern:$0x73625140] }
  0x43   : > { %v638_v0 = vld.sshfl [vmem:[#allocation1 + $0x38] sm:$0xff pattern:$0x73625140]  ;;  %v634_v5 = vld.sshfl [vmem:[#allocation1 + $0x28] sm:$0xff pattern:$0x73625140] }
  0x44   : > { %819 = vst [vmem:[#allocation1 + $0x20] ss:$4 sm:$0xff] %v7657_v30 }
  0x46   : > { %464 = vrot.lane.b32.xlu2 %v445_v45, %s7581_s19 }
  0x47   : > { %v454_v46 = vld.sshfl [vmem:[#allocation1] sm:$0xff pattern:$0x73625140]  ;;  %460 = vrot.lane.b32.xlu0 %v441_v43, %s7581_s19 }
  0x48   : > { %620 = vst [vmem:[#allocation1] ss:$4 sm:$0xff] %v614_v29  ;;  %462 = vrot.lane.b32.xlu1 %v443_v44, %s7581_s19 }
  0x4b   : > { %v828_v15 = vld.sshfl [vmem:[#allocation1 + $0x20] sm:$0xff pattern:$0x73625140]  ;;  %v834_v17 = vld.sshfl [vmem:[#allocation1 + $0x38] sm:$0xff pattern:$0x73625140] }
  0x4c   : > { %v832_v18 = vld.sshfl [vmem:[#allocation1 + $0x30] sm:$0xff pattern:$0x73625140]  ;;  %v830_v26 = vld.sshfl [vmem:[#allocation1 + $0x28] sm:$0xff pattern:$0x73625140] }
  0x4d   : > { %1014 = vst [vmem:[#allocation1 + $0x20] ss:$4 sm:$0xff] %v7654_v28 }
  0x4e   : > { %468 = vrot.lane.b32.xlu2 %v449_v47, %s7581_s19 }
  0x4f   : > { %v624_v49 = vld.sshfl [vmem:[#allocation1] sm:$0xff pattern:$0x73625140]  ;;  %v626_v50 = vld.sshfl [vmem:[#allocation1 + $0x8] sm:$0xff pattern:$0x73625140]  ;;  %456 = vrot.lane.b32.xlu0 %v437_v41, %s7581_s19 }
  0x50   : > { %v628_v52 = vld.sshfl [vmem:[#allocation1 + $0x10] sm:$0xff pattern:$0x73625140]  ;;  %v630_v53 = vld.sshfl [vmem:[#allocation1 + $0x18] sm:$0xff pattern:$0x73625140]  ;;  %458 = vrot.lane.b32.xlu1 %v439_v42, %s7581_s19 }
  0x51   : > { %641 = vst [vmem:[#allocation1] ss:$4 sm:$0xff] %v616_v48 }
  0x54   : > { %v7698_v30 = vld.sshfl [vmem:[#allocation1 + $0x20] sm:$0xff pattern:$0x73625140]  ;;  %v7700_v31 = vld.sshfl [vmem:[#allocation1 + $0x28] sm:$0xff pattern:$0x73625140] }
  0x55   : > { %v7703_v32 = vld.sshfl [vmem:[#allocation1 + $0x30] sm:$0xff pattern:$0x73625140]  ;;  %v7705_v33 = vld.sshfl [vmem:[#allocation1 + $0x38] sm:$0xff pattern:$0x73625140] }
  0x56   : > { %466 = vrot.lane.b32.xlu2 %v447_v54, %s7581_s19  ;;  %1163 = vst [vmem:[#allocation1 + $0x20] ss:$4 sm:$0xff] %v7654_v28 }
  0x57   : > { %470 = vrot.lane.b32.xlu0 %v451_v51, %s7581_s19 }
  0x58   : > { %v642_v55 = vld.sshfl [vmem:[#allocation1] sm:$0xff pattern:$0x73625140]  ;;  %472 = vrot.lane.b32.xlu1 %v454_v46, %s7581_s19 }
  0x59   : > { %816 = vst [vmem:[#allocation1] ss:$4 sm:$0xff] %v614_v29  ;;  %v7725_v46 = vld [vmem:[%s9640_s1 + $0x2] sm:$0x3] }
  0x5e   : > { %652 = vrot.lane.b32.xlu2 %v632_v57, %s7582_s20  ;;  %v1744_v57 = vld [vmem:[#allocation2 + $0x16] sm:$0x3] }
  0x5f   : > { %648 = vrot.lane.b32.xlu0 %v628_v52, %s7582_s20 }
  0x60   : > { %v820_v58 = vld.sshfl [vmem:[#allocation1] sm:$0xff pattern:$0x73625140]  ;;  %v822_v59 = vld.sshfl [vmem:[#allocation1 + $0x8] sm:$0xff pattern:$0x73625140]  ;;  %650 = vrot.lane.b32.xlu1 %v630_v53, %s7582_s20 }
  0x61   : > { %v824_v60 = vld.sshfl [vmem:[#allocation1 + $0x10] sm:$0xff pattern:$0x73625140]  ;;  %v826_v61 = vld.sshfl [vmem:[#allocation1 + $0x18] sm:$0xff pattern:$0x73625140] }
  0x62   : > { %837 = vst [vmem:[#allocation1] ss:$4 sm:$0xff] %v812_v56  ;;  %v7742_v56 = vld [vmem:[%s9641_s2 + $0x8] sm:$0xff] }
  0x66   : > { %656 = vrot.lane.b32.xlu2 %v636_v62, %s7582_s20 }
  0x67   : > { %644 = vrot.lane.b32.xlu0 %v624_v49, %s7582_s20 }
  0x68   : > { %646 = vrot.lane.b32.xlu1 %v626_v50, %s7582_s20 }
  0x69   : > { %v838_v63 = vld.sshfl [vmem:[#allocation1] sm:$0xff pattern:$0x73625140] }
  0x6a   : > { %1011 = vst [vmem:[#allocation1] ss:$4 sm:$0xff] %v7648_v25 }
  0x6e   : > { %654 = vrot.lane.b32.xlu2 %v634_v5, %s7582_s20 }
  0x6f   : > { %658 = vrot.lane.b32.xlu0 %v638_v0, %s7582_s20 }
  0x70   : > { %660 = vrot.lane.b32.xlu1 %v642_v55, %s7582_s20 }
  0x71   : > { %v7664_v6 = vld.sshfl [vmem:[#allocation1] sm:$0xff pattern:$0x73625140]  ;;  %v7666_v7 = vld.sshfl [vmem:[#allocation1 + $0x8] sm:$0xff pattern:$0x73625140] }
  0x72   : > { %v7668_v8 = vld.sshfl [vmem:[#allocation1 + $0x10] sm:$0xff pattern:$0x73625140]  ;;  %v7670_v9 = vld.sshfl [vmem:[#allocation1 + $0x18] sm:$0xff pattern:$0x73625140] }
  0x73   : > { %1160 = vst [vmem:[#allocation1] ss:$4 sm:$0xff] %v7648_v25 }
  0x76   : > { %848 = vrot.lane.b32.xlu2 %v828_v15, %s7583_s21 }
  0x77   : > { %844 = vrot.lane.b32.xlu0 %v824_v60, %s7583_s21 }
  0x78   : > { %846 = vrot.lane.b32.xlu1 %v826_v61, %s7583_s21 }
  0x7a   : > { %v1164_v11 = vld.sshfl [vmem:[#allocation1] sm:$0xff pattern:$0x73625140]  ;;  %v1166_v12 = vld.sshfl [vmem:[#allocation1 + $0x8] sm:$0xff pattern:$0x73625140] }
  0x7b   : > { %v1168_v13 = vld.sshfl [vmem:[#allocation1 + $0x10] sm:$0xff pattern:$0x73625140]  ;;  %v1170_v14 = vld.sshfl [vmem:[#allocation1 + $0x18] sm:$0xff pattern:$0x73625140] }
  0x7c   : > { %1181 = vst [vmem:[#allocation1] ss:$4 sm:$0xff] %v1156_v10 }
  0x7e   : > { %852 = vrot.lane.b32.xlu2 %v832_v18, %s7583_s21  ;;  %v1172_v18 = vld.sshfl [vmem:[#allocation1 + $0x20] sm:$0xff pattern:$0x73625140] }
  0x7f   : > { %840 = vrot.lane.b32.xlu0 %v820_v58, %s7583_s21 }
  0x80   : > { %842 = vrot.lane.b32.xlu1 %v822_v59, %s7583_s21 }
  0x83   : > { %v1182_v16 = vld.sshfl [vmem:[#allocation1] sm:$0xff pattern:$0x73625140] }
  0x84   : > { %1356 = vst [vmem:[#allocation1] ss:$4 sm:$0xff] %v7648_v25 }
  0x86   : > { %850 = vrot.lane.b32.xlu2 %v830_v26, %s7583_s21 }
  0x87   : > { %854 = vrot.lane.b32.xlu0 %v834_v17, %s7583_s21 }
  0x88   : > { %856 = vrot.lane.b32.xlu1 %v838_v63, %s7583_s21  ;;  %v278_v20 = vpop.permute.xlu2 %277  ;;  %s9619_s21 = scalar_lea.vmem %s9642_s3, %s7543_s14 }
  0x8b   : > { %v7682_v21 = vld.sshfl [vmem:[#allocation1] sm:$0xff pattern:$0x73625140]  ;;  %v7684_v22 = vld.sshfl [vmem:[#allocation1 + $0x8] sm:$0xff pattern:$0x73625140] }
  0x8c   : > { %v7686_v23 = vld.sshfl [vmem:[#allocation1 + $0x10] sm:$0xff pattern:$0x73625140]  ;;  %v1366_v24 = vld.sshfl [vmem:[#allocation1 + $0x18] sm:$0xff pattern:$0x73625140] }
  0x8d   : > { %1377 = vst [vmem:[#allocation1] ss:$4 sm:$0xff] %v1352_v19 }
  0x8e   : > { %1192 = vrot.lane.b32.xlu2 %v1172_v18, %s7584_s22 }
  0x8f   : > { %1188 = vrot.lane.b32.xlu0 %v1168_v13, %s7584_s22 }
  0x90   : > { %1190 = vrot.lane.b32.xlu1 %v1170_v14, %s7584_s22  ;;  %v7694_v29 = vpop.permute.xlu2 %287  ;;  %v7770_v14 = vld [vmem:[%s9641_s2] sm:$0xff] }
  0x94   : > { %v7692_v27 = vld.sshfl [vmem:[#allocation1] sm:$0xff pattern:$0x73625140] }
  0x95   : > { %1552 = vst [vmem:[#allocation1] ss:$4 sm:$0xff] %v7648_v25 }
  0x97   : > { %1184 = vrot.lane.b32.xlu0 %v1164_v11, %s7584_s22 }
  0x98   : > { %1186 = vrot.lane.b32.xlu1 %v1166_v12, %s7584_s22  ;;  %v286_v39 = vpop.permute.xlu2 %285 }
  0x99   : > { %v299_v40 = vsel %vm293_vm3, %v286_v39, %v7694_v29 }
  0x9a   : > { %v322_v44 = vsel %vm219_vm0, %v299_v40, 0  ;;  %v1176_v40 = vld.sshfl [vmem:[#allocation1 + $0x30] sm:$0xff pattern:$0x73625140] }
  0x9b   : > { %1196 = vrot.lane.b32.xlu2 %v1176_v40, %s7584_s22 }
  0x9c   : > { %v7708_v35 = vld.sshfl [vmem:[#allocation1] sm:$0xff pattern:$0x73625140]  ;;  %v7710_v36 = vld.sshfl [vmem:[#allocation1 + $0x8] sm:$0xff pattern:$0x73625140] }
  0x9d   : > { %v7712_v37 = vld.sshfl [vmem:[#allocation1 + $0x10] sm:$0xff pattern:$0x73625140]  ;;  %v7714_v38 = vld.sshfl [vmem:[#allocation1 + $0x18] sm:$0xff pattern:$0x73625140] }
  0x9e   : > { %1573 = vst [vmem:[#allocation1] ss:$4 sm:$0xff] %v1548_v34 }
  0xa0   : > { %1200 = vrot.lane.b32.xlu1 %v1182_v16, %s7584_s22  ;;  %v465_v48 = vpop.permute.xlu2 %464 }
  0xa1   : > { %v280_v41 = vpop.permute.xlu0 %279 }
  0xa2   : > { %v284_v42 = vpop.permute.xlu1 %283  ;;  %v295_v43 = vsel %vm293_vm3, %v278_v20, %v280_v41 }
  0xa3   : > { %v310_v45 = vsel %vm219_vm0, %v295_v43, 0  ;;  %v298_v50 = vsel %vm293_vm3, %v284_v42, %v286_v39  ;;  %v1178_v39 = vld.sshfl [vmem:[#allocation1 + $0x38] sm:$0xff pattern:$0x73625140] }
  0xa4   : > { %350 = vmatpush.bf16.msra.mxu1 %v310_v45  ;;  %v319_v59 = vsel %vm219_vm0, %v298_v50, 0  ;;  %1198 = vrot.lane.b32.xlu0 %v1178_v39, %s7584_s22 }
  0xa5   : > { %v7727_v47 = vld.sshfl [vmem:[#allocation1] sm:$0xff pattern:$0x73625140] }
  0xa6   : > { %1748 = vst [vmem:[#allocation1] ss:$4 sm:$0xff] %v7648_v25 }
  0xa7   : > { %7220 = vmatmul.msk.bf16.vlgmr.msra.gmra.mxu1 %vm302_vm4, %v7725_v46 }
  0xa8   : > { %402 = vmatpush.bf16.msrb.mxu1 %v322_v44  ;;  %1386 = vrot.lane.b32.xlu1 %v1366_v24, %s7585_s25  ;;  %v469_v0 = vpop.permute.xlu2 %468 }
  0xa9   : > { %v282_v49 = vpop.permute.xlu0 %281 }
  0xaa   : > { %v276_v51 = vpop.permute.xlu1 %275  ;;  %v296_v52 = vsel %vm293_vm3, %v280_v41, %v282_v49  ;;  %v297_v53 = vsel %vm293_vm3, %v282_v49, %v284_v42 }
  0xab   : > { %v294_v54 = vsel %vm293_vm3, %v276_v51, %v278_v20  ;;  %v313_v55 = vsel %vm219_vm0, %v296_v52, 0  ;;  %v316_v25 = vsel %vm219_vm0, %v297_v53, 0  ;;  %v1174_v51 = vld.sshfl [vmem:[#allocation1 + $0x28] sm:$0xff pattern:$0x73625140] }
  0xac   : > { %v307_v58 = vsel %vm219_vm0, %v294_v54, 0  ;;  %363 = vmatpush.bf16.msra.mxu2 %v313_v55  ;;  %376 = vmatpush.bf16.msra.mxu3 %v316_v25  ;;  %1359 = vst [vmem:[#allocation1 + $0x20] ss:$4 sm:$0xff] %v7654_v28 }
  0xad   : > { %v7746_v60 = vld.sshfl [vmem:[#allocation1] sm:$0xff pattern:$0x73625140]  ;;  %v7748_v61 = vld.sshfl [vmem:[#allocation1 + $0x8] sm:$0xff pattern:$0x73625140]  ;;  %337 = vmatpush.bf16.msra.mxu0 %v307_v58  ;;  %1384 = vrot.lane.b32.xlu0 %v7686_v23, %s7585_s25 }
  0xae   : > { %v7750_v62 = vld.sshfl [vmem:[#allocation1 + $0x10] sm:$0xff pattern:$0x73625140]  ;;  %v7752_v63 = vld.sshfl [vmem:[#allocation1 + $0x18] sm:$0xff pattern:$0x73625140]  ;;  %1194 = vrot.lane.b32.xlu2 %v1174_v51, %s7584_s22 }
  0xaf   : > { %1769 = vst [vmem:[#allocation1] ss:$4 sm:$0xff] %v1744_v57  ;;  %7221 = vmatmul.msk.bf16.vlgmr.msra.gmra.mxu2 %vm302_vm4, %v7725_v46  ;;  %7222 = vmatmul.msk.bf16.vlgmr.msra.gmra.mxu3 %vm302_vm4, %v7725_v46 }
  0xb0   : > { %1952 = vst [vmem:[#allocation1 + $0x10] ss:$2 sm:$0xff] %v7742_v56  ;;  %7219 = vmatmul.msk.bf16.vlgmr.msra.gmra.mxu0 %vm302_vm4, %v7725_v46  ;;  %1382 = vrot.lane.b32.xlu1 %v7684_v22, %s7585_s25  ;;  %v467_v20 = vpop.permute.xlu2 %466 }
  0xb1   : > { %389 = vmatpush.bf16.msrb.mxu0 %v319_v59  ;;  %v290_v5 = vpop.permute.xlu0 %289  ;;  %v480_v34 = vsel %vm474_vm5, %v467_v20, %v469_v0 }
  0xb2   : > { %v292_v10 = vpop.permute.xlu1 %291  ;;  %v300_v11 = vsel %vm293_vm3, %v7694_v29, %v290_v5 }
  0xb3   : > { %v325_v12 = vsel %vm219_vm0, %v300_v11, 0  ;;  %v301_v13 = vsel %vm293_vm3, %v290_v5, %v292_v10  ;;  %vm2995_vm3 = vcmask 1031168  }
  0xb4   : > { %415 = vmatpush.bf16.msrb.mxu2 %v325_v12  ;;  %v328_v15 = vsel %vm219_vm0, %v301_v13, 0  ;;  %v1368_v12 = vld.sshfl [vmem:[#allocation1 + $0x20] sm:$0xff pattern:$0x73625140] }
  0xb5   : > { %428 = vmatpush.bf16.msrb.mxu3 %v328_v15  ;;  %1380 = vrot.lane.b32.xlu0 %v7682_v21, %s7585_s25 }
  0xb6   : > { %v7773_v16 = vld.sshfl [vmem:[#allocation1] sm:$0xff pattern:$0x73625140]  ;;  %1388 = vrot.lane.b32.xlu2 %v1368_v12, %s7585_s25 }
  0xb7   : > { %1950 = vst [vmem:[#allocation1] ss:$2 sm:$0xff] %v7770_v14  ;;  %7224 = vmatmul.msk.bf16.vlgmr.msrb.gmra.mxu1 %vm302_vm4, %v7725_v46  ;;  %v7244_v12 = vld [vmem:[%s9640_s1 + $0x6] sm:$0x3] }
  0xb8   : > { %1396 = vrot.lane.b32.xlu1 %v7692_v27, %s7585_s25  ;;  %v479_v27 = vsel %vm474_vm5, %v465_v48, %v467_v20  ;;  %v653_v43 = vpop.permute.xlu2 %652 }
  0xb9   : > { %v461_v17 = vpop.permute.xlu0 %460 }
  0xba   : > { %v463_v19 = vpop.permute.xlu1 %462 }
  0xbb   : > { %v478_v22 = vsel %vm474_vm5, %v463_v19, %v465_v48  ;;  %v477_v24 = vsel %vm474_vm5, %v461_v17, %v463_v19  ;;  %v502_v48 = vsel %vm219_vm0, %v480_v34, 0 }
  0xbc   : > { %v493_v26 = vsel %vm219_vm0, %v477_v24, 0  ;;  %v496_v29 = vsel %vm219_vm0, %v478_v22, 0 }
  0xbd   : > { %543 = vmatpush.bf16.msra.mxu2 %v493_v26  ;;  %556 = vmatpush.bf16.msra.mxu3 %v496_v29  ;;  %v1374_v26 = vld.sshfl [vmem:[#allocation1 + $0x38] sm:$0xff pattern:$0x73625140]  ;;  %v1372_v29 = vld.sshfl [vmem:[#allocation1 + $0x30] sm:$0xff pattern:$0x73625140] }
  0xbe   : > { %1394 = vrot.lane.b32.xlu0 %v1374_v26, %s7585_s25  ;;  %1392 = vrot.lane.b32.xlu2 %v1372_v29, %s7585_s25 }
  0xbf   : > { %7225 = vmatmul.msk.bf16.vlgmr.msrb.gmra.mxu2 %vm302_vm4, %v7725_v46  ;;  %7226 = vmatmul.msk.bf16.vlgmr.msrb.gmra.mxu3 %vm302_vm4, %v7725_v46 }
  0xc0   : > { %7223 = vmatmul.msk.bf16.vlgmr.msrb.gmra.mxu0 %vm302_vm4, %v7725_v46  ;;  %1582 = vrot.lane.b32.xlu1 %v7714_v38, %s7586_s30  ;;  %v499_v46 = vsel %vm219_vm0, %v479_v27, 0  ;;  %v247_v38 = vld [vmem:[%s9640_s1] sm:$0x3]  ;;  %v657_v58 = vpop.permute.xlu2 %656 }
  0xc1   : > { %v457_v41 = vpop.permute.xlu0 %456 }
  0xc2   : > { %v459_v42 = vpop.permute.xlu1 %458 }
  0xc3   : > { %v476_v44 = vsel %vm474_vm5, %v459_v42, %v461_v17  ;;  %v475_v45 = vsel %vm474_vm5, %v457_v41, %v459_v42 }
  0xc4   : > { %v490_v49 = vsel %vm219_vm0, %v476_v44, 0  ;;  %v487_v50 = vsel %vm219_vm0, %v475_v45, 0  ;;  %v1370_v44 = vld.sshfl [vmem:[#allocation1 + $0x28] sm:$0xff pattern:$0x73625140] }
  0xc5   : > { %530 = vmatpush.bf16.msra.mxu1 %v490_v49  ;;  %517 = vmatpush.bf16.msra.mxu0 %v487_v50  ;;  %1555 = vst [vmem:[#allocation1 + $0x20] ss:$4 sm:$0xff] %v7654_v28 }
  0xc6   : > { %1580 = vrot.lane.b32.xlu0 %v7712_v37, %s7586_s30  ;;  %1390 = vrot.lane.b32.xlu2 %v1370_v44, %s7585_s25 }
  0xc8   : > { %7228 = vmatmul.msk.bf16.vlgmr.msra.gmra.mxu1 %vm302_vm4, %v247_v38  ;;  %1578 = vrot.lane.b32.xlu1 %v7710_v36, %s7586_s30  ;;  %v655_v11 = vpop.permute.xlu2 %654 }
  0xc9   : > { %569 = vmatpush.bf16.msrb.mxu0 %v499_v46  ;;  %582 = vmatpush.bf16.msrb.mxu1 %v502_v48  ;;  %v471_v52 = vpop.permute.xlu0 %470  ;;  %v667_v18 = vsel %vm662_vm6, %v653_v43, %v655_v11 }
  0xca   : > { %v473_v53 = vpop.permute.xlu1 %472  ;;  %v481_v54 = vsel %vm474_vm5, %v469_v0, %v471_v52 }
  0xcb   : > { %v482_v55 = vsel %vm474_vm5, %v471_v52, %v473_v53  ;;  %v505_v25 = vsel %vm219_vm0, %v481_v54, 0  ;;  %vm4199_vm5 = vcmask 1014784  }
  0xcc   : > { %595 = vmatpush.bf16.msrb.mxu2 %v505_v25  ;;  %v508_v57 = vsel %vm219_vm0, %v482_v55, 0 }
  0xcd   : > { %608 = vmatpush.bf16.msrb.mxu3 %v508_v57 }
  0xce   : > { %1576 = vrot.lane.b32.xlu0 %v7708_v35, %s7586_s30 }
  0xcf   : > { %7229 = vmatmul.msk.bf16.vlgmr.msra.gmra.mxu2 %vm302_vm4, %v247_v38  ;;  %7230 = vmatmul.msk.bf16.vlgmr.msra.gmra.mxu3 %vm302_vm4, %v247_v38 }
  0xd0   : > { %7227 = vmatmul.msk.bf16.vlgmr.msra.gmra.mxu0 %vm302_vm4, %v247_v38  ;;  %1592 = vrot.lane.b32.xlu1 %v7727_v47, %s7586_s30  ;;  %v668_v47 = vsel %vm662_vm6, %v655_v11, %v657_v58  ;;  %v849_v24 = vpop.permute.xlu2 %848 }
  0xd1   : > { %v649_v23 = vpop.permute.xlu0 %648  ;;  %v690_v19 = vsel %vm219_vm0, %v668_v47, 0  ;;  %v1570_v47 = vld.sshfl [vmem:[#allocation1 + $0x38] sm:$0xff pattern:$0x73625140] }
  0xd2   : > { %v651_v36 = vpop.permute.xlu1 %650 }
  0xd3   : > { %v666_v59 = vsel %vm662_vm6, %v651_v36, %v653_v43  ;;  %v665_v0 = vsel %vm662_vm6, %v649_v23, %v651_v36 }
  0xd4   : > { %v681_v5 = vsel %vm219_vm0, %v665_v0, 0  ;;  %v684_v10 = vsel %vm219_vm0, %v666_v59, 0 }
  0xd5   : > { %731 = vmatpush.bf16.msra.mxu2 %v681_v5  ;;  %744 = vmatpush.bf16.msra.mxu3 %v684_v10 }
  0xd6   : > { %1590 = vrot.lane.b32.xlu0 %v1570_v47, %s7586_s30 }
  0xd8   : > { %7232 = vmatmul.msk.bf16.vlgmr.msrb.gmra.mxu1 %vm302_vm4, %v247_v38  ;;  %1778 = vrot.lane.b32.xlu1 %v7752_v63, %s7587_s6  ;;  %v687_v63 = vsel %vm219_vm0, %v667_v18, 0  ;;  %v853_v43 = vpop.permute.xlu2 %852  ;;  %v1026_v18 = vsel %vm219_vm0, %v7664_v6, 0  ;;  %v1036_v6 = vsel %vm219_vm0, %v7700_v31, 0 }
  0xd9   : > { %v645_v21 = vpop.permute.xlu0 %644 }
  0xda   : > { %v647_v13 = vpop.permute.xlu1 %646 }
  0xdb   : > { %v664_v15 = vsel %vm662_vm6, %v647_v13, %v649_v23  ;;  %v663_v17 = vsel %vm662_vm6, %v645_v21, %v647_v13  ;;  %v1568_v21 = vld.sshfl [vmem:[#allocation1 + $0x30] sm:$0xff pattern:$0x73625140]  ;;  %v1028_v13 = vsel %vm219_vm0, %v7666_v7, 0 }
  0xdc   : > { %v678_v20 = vsel %vm219_vm0, %v664_v15, 0  ;;  %v675_v22 = vsel %vm219_vm0, %v663_v17, 0  ;;  %v1030_v15 = vsel %vm219_vm0, %v7668_v8, 0  ;;  %v1566_v17 = vld.sshfl [vmem:[#allocation1 + $0x28] sm:$0xff pattern:$0x73625140] }
  0xdd   : > { %718 = vmatpush.bf16.msra.mxu1 %v678_v20  ;;  %705 = vmatpush.bf16.msra.mxu0 %v675_v22  ;;  %v1038_v8 = vsel %vm219_vm0, %v7703_v32, 0  ;;  %v1040_v20 = vsel %vm219_vm0, %v7705_v33, 0  ;;  %v7253_v33 = vld [vmem:[%s9640_s1 + $0x8] sm:$0x3] }
  0xde   : > { %1776 = vrot.lane.b32.xlu0 %v7750_v62, %s7587_s6  ;;  %v1034_v62 = vsel %vm219_vm0, %v7698_v30, 0 }
  0xdf   : > { %7233 = vmatmul.msk.bf16.vlgmr.msrb.gmra.mxu2 %vm302_vm4, %v247_v38  ;;  %7234 = vmatmul.msk.bf16.vlgmr.msrb.gmra.mxu3 %vm302_vm4, %v247_v38 }
  0xe0   : > { %7231 = vmatmul.msk.bf16.vlgmr.msrb.gmra.mxu0 %vm302_vm4, %v247_v38  ;;  %1774 = vrot.lane.b32.xlu1 %v7748_v61, %s7587_s6  ;;  %v7235_v61 = vld [vmem:[%s9640_s1 + $0x4] sm:$0x3]  ;;  %v851_v51 = vpop.permute.xlu2 %850 }
  0xe1   : > { %770 = vmatpush.bf16.msrb.mxu1 %v690_v19  ;;  %757 = vmatpush.bf16.msrb.mxu0 %v687_v63  ;;  %v659_v27 = vpop.permute.xlu0 %658  ;;  %v864_v54 = vsel %vm858_vm7, %v851_v51, %v853_v43  ;;  %v863_v59 = vsel %vm858_vm7, %v849_v24, %v851_v51  ;;  %v1032_v19 = vsel %vm219_vm0, %v7670_v9, 0 }
  0xe2   : > { %v661_v34 = vpop.permute.xlu1 %660  ;;  %v669_v39 = vsel %vm662_vm6, %v657_v58, %v659_v27  ;;  %v886_v57 = vsel %vm219_vm0, %v864_v54, 0  ;;  %v1564_v58 = vld.sshfl [vmem:[#allocation1 + $0x20] sm:$0xff pattern:$0x73625140]  ;;  %v883_v10 = vsel %vm219_vm0, %v863_v59, 0 }
  0xe3   : > { %v670_v40 = vsel %vm662_vm6, %v659_v27, %v661_v34  ;;  %v693_v41 = vsel %vm219_vm0, %v669_v39, 0  ;;  %1584 = vrot.lane.b32.xlu2 %v1564_v58, %s7586_s30  ;;  %1751 = vst [vmem:[#allocation1 + $0x20] ss:$4 sm:$0xff] %v7654_v28  ;;  %vm5894_vm6 = vcmask 982016  }
  0xe4   : > { %783 = vmatpush.bf16.msrb.mxu2 %v693_v41  ;;  %v696_v42 = vsel %vm219_vm0, %v670_v40, 0 }
  0xe5   : > { %796 = vmatpush.bf16.msrb.mxu3 %v696_v42 }
  0xe6   : > { %1772 = vrot.lane.b32.xlu0 %v7746_v60, %s7587_s6 }
  0xe8   : > { %7237 = vmatmul.msk.bf16.vlgmr.msra.gmra.mxu1 %vm302_vm4, %v7235_v61  ;;  %1788 = vrot.lane.b32.xlu1 %v7773_v16, %s7587_s6  ;;  %v1193_v28 = vpop.permute.xlu2 %1192 }
  0xe9   : > { %v845_v45 = vpop.permute.xlu0 %844 }
  0xea   : > { %v847_v46 = vpop.permute.xlu1 %846  ;;  %v1760_v9 = vld.sshfl [vmem:[#allocation1 + $0x20] sm:$0xff pattern:$0x73625140]  ;;  %v1764_v63 = vld.sshfl [vmem:[#allocation1 + $0x30] sm:$0xff pattern:$0x73625140] }
  0xeb   : > { %v862_v48 = vsel %vm858_vm7, %v847_v46, %v849_v24  ;;  %v861_v49 = vsel %vm858_vm7, %v845_v45, %v847_v46  ;;  %1588 = vrot.lane.b32.xlu2 %v1568_v21, %s7586_s30  ;;  %v1766_v26 = vld.sshfl [vmem:[#allocation1 + $0x38] sm:$0xff pattern:$0x73625140]  ;;  %v1762_v44 = vld.sshfl [vmem:[#allocation1 + $0x28] sm:$0xff pattern:$0x73625140] }
  0xec   : > { %v877_v50 = vsel %vm219_vm0, %v861_v49, 0  ;;  %v880_v38 = vsel %vm219_vm0, %v862_v48, 0 }
  0xee   : > { %1786 = vrot.lane.b32.xlu0 %v1766_v26, %s7587_s6 }
  0xef   : > { %7238 = vmatmul.msk.bf16.vlgmr.msra.gmra.mxu2 %vm302_vm4, %v7235_v61  ;;  %7239 = vmatmul.msk.bf16.vlgmr.msra.gmra.mxu3 %vm302_vm4, %v7235_v61 }
  0xf0   : > { %7236 = vmatmul.msk.bf16.vlgmr.msra.gmra.mxu0 %vm302_vm4, %v7235_v61  ;;  %927 = vmatpush.bf16.msra.mxu2 %v877_v50 }
  0xf1   : > { %v841_v37 = vpop.permute.xlu0 %840  ;;  %940 = vmatpush.bf16.msra.mxu3 %v880_v38 }
  0xf2   : > { %v843_v16 = vpop.permute.xlu1 %842 }
  0xf3   : > { %v860_v52 = vsel %vm858_vm7, %v843_v16, %v845_v45  ;;  %v859_v53 = vsel %vm858_vm7, %v841_v37, %v843_v16  ;;  %1586 = vrot.lane.b32.xlu2 %v1566_v17, %s7586_s30  ;;  %s7590_s30 = smov 62  }
  0xf4   : > { %v874_v55 = vsel %vm219_vm0, %v860_v52, 0  ;;  %v871_v25 = vsel %vm219_vm0, %v859_v53, 0 }
  0xf5   : > { %914 = vmatpush.bf16.msra.mxu1 %v874_v55  ;;  %901 = vmatpush.bf16.msra.mxu0 %v871_v25  ;;  %v1197_v24 = vpop.permute.xlu2 %1196 }
  0xf8   : > { %7241 = vmatmul.msk.bf16.vlgmr.msrb.gmra.mxu1 %vm302_vm4, %v7235_v61 }
  0xf9   : > { %966 = vmatpush.bf16.msrb.mxu1 %v886_v57  ;;  %v855_v35 = vpop.permute.xlu0 %854 }
  0xfa   : > { %v865_v23 = vsel %vm858_vm7, %v853_v43, %v855_v35  ;;  %v857_v36 = vpop.permute.xlu1 %856 }
  0xfb   : > { %v866_v0 = vsel %vm858_vm7, %v855_v35, %v857_v36  ;;  %v889_v5 = vsel %vm219_vm0, %v865_v23, 0  ;;  %1780 = vrot.lane.b32.xlu2 %v1760_v9, %s7587_s6 }
  0xfc   : > { %v892_v11 = vsel %vm219_vm0, %v866_v0, 0 }
  0xff   : > { %7242 = vmatmul.msk.bf16.vlgmr.msrb.gmra.mxu2 %vm302_vm4, %v7235_v61  ;;  %7243 = vmatmul.msk.bf16.vlgmr.msrb.gmra.mxu3 %vm302_vm4, %v7235_v61 }
 0x100   : > { %7240 = vmatmul.msk.bf16.vlgmr.msrb.gmra.mxu0 %vm302_vm4, %v7235_v61  ;;  %979 = vmatpush.bf16.msrb.mxu2 %v889_v5 }
 0x101   : > { %953 = vmatpush.bf16.msrb.mxu0 %v883_v10  ;;  %992 = vmatpush.bf16.msrb.mxu3 %v892_v11  ;;  %v1189_v31 = vpop.permute.xlu0 %1188 }
 0x102   : > { %v1191_v7 = vpop.permute.xlu1 %1190 }
 0x103   : > { %1784 = vrot.lane.b32.xlu2 %v1764_v63, %s7587_s6  ;;  %v1205_v27 = vsel %vm1202_vm8, %v1189_v31, %v1191_v7  ;;  %v1206_v34 = vsel %vm1202_vm8, %v1191_v7, %v1193_v28 }
 0x104   : > { %v1221_v42 = vsel %vm219_vm0, %v1205_v27, 0  ;;  %v1224_v43 = vsel %vm219_vm0, %v1206_v34, 0 }
 0x108   : > { %7246 = vmatmul.msk.bf16.vlgmr.msra.gmra.mxu1 %vm302_vm4, %v7244_v12  ;;  %v1195_v46 = vpop.permute.xlu2 %1194 }
 0x109   : > { %1062 = vmatpush.bf16.msra.mxu1 %v1028_v13  ;;  %v1185_v29 = vpop.permute.xlu0 %1184  ;;  %v1208_v50 = vsel %vm1202_vm8, %v1195_v46, %v1197_v24  ;;  %v1207_v25 = vsel %vm1202_vm8, %v1193_v28, %v1195_v46 }
 0x10a   : > { %v1187_v32 = vpop.permute.xlu1 %1186  ;;  %v1230_v16 = vsel %vm219_vm0, %v1208_v50, 0  ;;  %v1227_v59 = vsel %vm219_vm0, %v1207_v25, 0 }
 0x10b   : > { %v1204_v60 = vsel %vm1202_vm8, %v1187_v32, %v1189_v31  ;;  %v1203_v39 = vsel %vm1202_vm8, %v1185_v29, %v1187_v32  ;;  %1782 = vrot.lane.b32.xlu2 %v1762_v44, %s7587_s6 }
 0x10c   : > { %v1218_v22 = vsel %vm219_vm0, %v1204_v60, 0  ;;  %v1215_v61 = vsel %vm219_vm0, %v1203_v39, 0 }
 0x10f   : > { %7247 = vmatmul.msk.bf16.vlgmr.msra.gmra.mxu2 %vm302_vm4, %v7244_v12  ;;  %7248 = vmatmul.msk.bf16.vlgmr.msra.gmra.mxu3 %vm302_vm4, %v7244_v12 }
 0x110   : > { %7245 = vmatmul.msk.bf16.vlgmr.msra.gmra.mxu0 %vm302_vm4, %v7244_v12  ;;  %1075 = vmatpush.bf16.msra.mxu2 %v1030_v15  ;;  %v1389_v23 = vpop.permute.xlu2 %1388  ;;  %v7262_v15 = vld [vmem:[%s9640_s1 + $0xa] sm:$0x3] }
 0x111   : > { %1049 = vmatpush.bf16.msra.mxu0 %v1026_v18  ;;  %1088 = vmatpush.bf16.msra.mxu3 %v1032_v19 }
 0x112   : > { %v1201_v45 = vpop.permute.xlu1 %1200 }
 0x116   : > { %v1199_v51 = vpop.permute.xlu0 %1198 }
 0x117   : > { %v1209_v55 = vsel %vm1202_vm8, %v1197_v24, %v1199_v51  ;;  %v1210_v57 = vsel %vm1202_vm8, %v1199_v51, %v1201_v45 }
 0x118   : > { %7250 = vmatmul.msk.bf16.vlgmr.msrb.gmra.mxu1 %vm302_vm4, %v7244_v12  ;;  %v1233_v36 = vsel %vm219_vm0, %v1209_v55, 0  ;;  %v1236_v0 = vsel %vm219_vm0, %v1210_v57, 0  ;;  %v1393_v19 = vpop.permute.xlu2 %1392 }
 0x119   : > { %1114 = vmatpush.bf16.msrb.mxu1 %v1036_v6 }
 0x11a   : > { %v1387_v52 = vpop.permute.xlu1 %1386 }
 0x11b   : > { %v1402_v9 = vsel %vm1398_vm9, %v1387_v52, %v1389_v23 }
 0x11f   : > { %7251 = vmatmul.msk.bf16.vlgmr.msrb.gmra.mxu2 %vm302_vm4, %v7244_v12  ;;  %7252 = vmatmul.msk.bf16.vlgmr.msrb.gmra.mxu3 %vm302_vm4, %v7244_v12  ;;  %v1385_v5 = vpop.permute.xlu0 %1384 }
 0x120   : > { %7249 = vmatmul.msk.bf16.vlgmr.msrb.gmra.mxu0 %vm302_vm4, %v7244_v12  ;;  %1127 = vmatpush.bf16.msrb.mxu2 %v1038_v8  ;;  %v1401_v8 = vsel %vm1398_vm9, %v1385_v5, %v1387_v52  ;;  %v1391_v63 = vpop.permute.xlu2 %1390 }
 0x121   : > { %1101 = vmatpush.bf16.msrb.mxu0 %v1034_v62  ;;  %1140 = vmatpush.bf16.msrb.mxu3 %v1040_v20  ;;  %v1417_v32 = vsel %vm219_vm0, %v1401_v8, 0  ;;  %v1404_v34 = vsel %vm1398_vm9, %v1391_v63, %v1393_v19 }
 0x122   : > { %v1383_v10 = vpop.permute.xlu1 %1382 }
 0x123   : > { %v1400_v12 = vsel %vm1398_vm9, %v1383_v10, %v1385_v5 }
 0x124   : > { %v7924_v30 = vpop.f32.mrf.mxu1  ;;  %v1414_v18 = vsel %vm219_vm0, %v1400_v12, 0 }
 0x127   : > { %v1381_v6 = vpop.permute.xlu0 %1380 }
 0x128   : > { %7255 = vmatmul.msk.bf16.vlgmr.msra.gmra.mxu1 %vm302_vm4, %v7253_v33  ;;  %v1399_v62 = vsel %vm1398_vm9, %v1381_v6, %v1383_v10 }
 0x129   : > { %1258 = vmatpush.bf16.msra.mxu1 %v1218_v22 }
 0x12a   : > { %v1397_v22 = vpop.permute.xlu1 %1396 }
 0x12c   : > { %v354_v40 = vpop.f32.mrf.mxu1 }
 0x12d   : > { %v7936_v41 = vpop.f32.mrf.mxu0 }
 0x12f   : > { %7256 = vmatmul.msk.bf16.vlgmr.msra.gmra.mxu2 %vm302_vm4, %v7253_v33  ;;  %7257 = vmatmul.msk.bf16.vlgmr.msra.gmra.mxu3 %vm302_vm4, %v7253_v33 }
 0x130   : > { %7254 = vmatmul.msk.bf16.vlgmr.msra.gmra.mxu0 %vm302_vm4, %v7253_v33  ;;  %1271 = vmatpush.bf16.msra.mxu2 %v1221_v42  ;;  %v1426_v42 = vsel %vm219_vm0, %v1404_v34, 0 }
 0x131   : > { %1284 = vmatpush.bf16.msra.mxu3 %v1224_v43  ;;  %1245 = vmatpush.bf16.msra.mxu0 %v1215_v61  ;;  %v1395_v61 = vpop.permute.xlu0 %1394 }
 0x132   : > { %v7944_v48 = vpop.f32.mrf.mxu2  ;;  %v7946_v49 = vpop.f32.mrf.mxu3  ;;  %v1405_v46 = vsel %vm1398_vm9, %v1393_v19, %v1395_v61 }
 0x133   : > { %v1583_v43 = vpop.permute.xlu1 %1582 }
 0x134   : > { %v7950_v38 = vpop.f32.mrf.mxu1 }
 0x135   : > { %v341_v37 = vpop.f32.mrf.mxu0 }
 0x138   : > { %7259 = vmatmul.msk.bf16.vlgmr.msrb.gmra.mxu1 %vm302_vm4, %v7253_v33 }
 0x139   : > { %1310 = vmatpush.bf16.msrb.mxu1 %v1230_v16  ;;  %v1429_v16 = vsel %vm219_vm0, %v1405_v46, 0 }
 0x13a   : > { %v367_v53 = vpop.f32.mrf.mxu2  ;;  %v380_v54 = vpop.f32.mrf.mxu3 }
 0x13b   : > { %v1581_v54 = vpop.permute.xlu0 %1580  ;;  %v1579_v55 = vpop.permute.xlu1 %1578 }
 0x13c   : > { %v406_v58 = vpop.f32.mrf.mxu1 }
 0x13d   : > { %v7957_v35 = vpop.f32.mrf.mxu0  ;;  %v8005_v50 = vpop.permute.xlu2 %1584 }
 0x13f   : > { %7260 = vmatmul.msk.bf16.vlgmr.msrb.gmra.mxu2 %vm302_vm4, %v7253_v33  ;;  %7261 = vmatmul.msk.bf16.vlgmr.msrb.gmra.mxu3 %vm302_vm4, %v7253_v33 }
 0x140   : > { %7258 = vmatmul.msk.bf16.vlgmr.msrb.gmra.mxu0 %vm302_vm4, %v7253_v33  ;;  %1323 = vmatpush.bf16.msrb.mxu2 %v1233_v36  ;;  %v1420_v33 = vsel %vm219_vm0, %v1402_v9, 0 }
 0x141   : > { %1297 = vmatpush.bf16.msrb.mxu0 %v1227_v59  ;;  %1336 = vmatpush.bf16.msrb.mxu3 %v1236_v0  ;;  %v7271_v0 = vld [vmem:[%s9640_s1 + $0xc] sm:$0x3] }
 0x142   : > { %v7965_v11 = vpop.f32.mrf.mxu2  ;;  %v7967_v47 = vpop.f32.mrf.mxu3 }
 0x143   : > { %v1593_v9 = vpop.permute.xlu1 %1592 }
 0x145   : > { %v393_v21 = vpop.f32.mrf.mxu0  ;;  %v532_v13 = vpop.f32.mrf.mxu1 }
 0x146   : > { %v7974_v17 = vadd.f32 %v532_v13, %v7924_v30  ;;  %v1411_v30 = vsel %vm219_vm0, %v1399_v62, 0  ;;  %v1589_v12 = vpop.permute.xlu2 %1588  ;;  %v1597_v13 = vsel %vm1594_vm10, %v1581_v54, %v1583_v43 }
 0x148   : > { %7264 = vmatmul.msk.bf16.vlgmr.msra.gmra.mxu1 %vm302_vm4, %v7262_v15 }
 0x149   : > { %1454 = vmatpush.bf16.msra.mxu1 %v1414_v18 }
 0x14a   : > { %v419_v7 = vpop.f32.mrf.mxu2  ;;  %v432_v28 = vpop.f32.mrf.mxu3 }
 0x14b   : > { %v1779_v34 = vpop.permute.xlu1 %1778 }
 0x14d   : > { %v519_v20 = vpop.f32.mrf.mxu0  ;;  %v534_v31 = vpop.f32.mrf.mxu1 }
 0x14e   : > { %v7983_v60 = vadd.f32 %v519_v20, %v7936_v41  ;;  %v1587_v62 = vpop.permute.xlu2 %1586 }
 0x14f   : > { %7265 = vmatmul.msk.bf16.vlgmr.msra.gmra.mxu2 %vm302_vm4, %v7262_v15  ;;  %7266 = vmatmul.msk.bf16.vlgmr.msra.gmra.mxu3 %vm302_vm4, %v7262_v15 }
 0x150   : > { %7263 = vmatmul.msk.bf16.vlgmr.msra.gmra.mxu0 %vm302_vm4, %v7262_v15  ;;  %1467 = vmatpush.bf16.msra.mxu2 %v1417_v32 }
 0x151   : > { %1480 = vmatpush.bf16.msra.mxu3 %v1420_v33  ;;  %1441 = vmatpush.bf16.msra.mxu0 %v1411_v30  ;;  %v1600_v30 = vsel %vm1594_vm10, %v1587_v62, %v1589_v12 }
 0x152   : > { %v545_v24 = vpop.f32.mrf.mxu2  ;;  %v558_v26 = vpop.f32.mrf.mxu3 }
 0x153   : > { %v7991_v29 = vadd.f32 %v545_v24, %v7944_v48  ;;  %v7994_v27 = vadd.f32 %v558_v26, %v7946_v49  ;;  %v1403_v48 = vsel %vm1398_vm9, %v1389_v23, %v1391_v63  ;;  %v1406_v49 = vsel %vm1398_vm9, %v1395_v61, %v1397_v22 }
 0x154   : > { %v1423_v52 = vsel %vm219_vm0, %v1403_v48, 0  ;;  %v1432_v53 = vsel %vm219_vm0, %v1406_v49, 0  ;;  %v1596_v23 = vsel %vm1594_vm10, %v1579_v55, %v1581_v54  ;;  %v1622_v24 = vsel %vm219_vm0, %v1600_v30, 0 }
 0x155   : > { %v521_v39 = vpop.f32.mrf.mxu0  ;;  %v584_v40 = vpop.f32.mrf.mxu1  ;;  %v1610_v10 = vsel %vm219_vm0, %v1596_v23, 0 }
 0x156   : > { %v7998_v41 = vadd.f32 %v584_v40, %v7950_v38  ;;  %v8060_v61 = vpop.permute.xlu2 %1780 }
 0x158   : > { %7268 = vmatmul.msk.bf16.vlgmr.msrb.gmra.mxu1 %vm302_vm4, %v7262_v15 }
 0x159   : > { %1506 = vmatpush.bf16.msrb.mxu1 %v1426_v42 }
 0x15a   : > { %v547_v44 = vpop.f32.mrf.mxu2  ;;  %v560_v45 = vpop.f32.mrf.mxu3 }
 0x15d   : > { %v571_v37 = vpop.f32.mrf.mxu0  ;;  %v586_v38 = vpop.f32.mrf.mxu1 }
 0x15e   : > { %v8009_v51 = vadd.f32 %v571_v37, %v7957_v35  ;;  %v1785_v23 = vpop.permute.xlu2 %1784 }
 0x15f   : > { %7269 = vmatmul.msk.bf16.vlgmr.msrb.gmra.mxu2 %vm302_vm4, %v7262_v15  ;;  %7270 = vmatmul.msk.bf16.vlgmr.msrb.gmra.mxu3 %vm302_vm4, %v7262_v15 }
 0x160   : > { %7267 = vmatmul.msk.bf16.vlgmr.msrb.gmra.mxu0 %vm302_vm4, %v7262_v15  ;;  %1519 = vmatpush.bf16.msrb.mxu2 %v1429_v16  ;;  %v1598_v15 = vsel %vm1594_vm10, %v1583_v43, %v8005_v50 }
 0x161   : > { %1493 = vmatpush.bf16.msrb.mxu0 %v1423_v52  ;;  %1532 = vmatpush.bf16.msrb.mxu3 %v1432_v53  ;;  %v1616_v8 = vsel %vm219_vm0, %v1598_v15, 0 }
 0x162   : > { %v597_v25 = vpop.f32.mrf.mxu2  ;;  %v610_v57 = vpop.f32.mrf.mxu3 }
 0x163   : > { %v8017_v58 = vadd.f32 %v597_v25, %v7965_v11  ;;  %v8020_v35 = vadd.f32 %v610_v57, %v7967_v47  ;;  %v1577_v11 = vpop.permute.xlu0 %1576 }
 0x164   : > { %v1595_v18 = vsel %vm1594_vm10, %v1577_v11, %v1579_v55  ;;  %v7280_v55 = vld [vmem:[%s9640_s1 + $0xe] sm:$0x3] }
 0x165   : > { %v573_v36 = vpop.f32.mrf.mxu0  ;;  %v720_v59 = vpop.f32.mrf.mxu1  ;;  %v1607_v28 = vsel %vm219_vm0, %v1595_v18, 0 }
 0x166   : > { %v8027_v5 = vadd.f32 %v720_v59, %v7974_v17  ;;  %v1613_v17 = vsel %vm219_vm0, %v1597_v13, 0  ;;  %v1783_v15 = vpop.permute.xlu2 %1782 }
 0x168   : > { %7273 = vmatmul.msk.bf16.vlgmr.msra.gmra.mxu1 %vm302_vm4, %v7271_v0 }
 0x169   : > { %1650 = vmatpush.bf16.msra.mxu1 %v1610_v10 }
 0x16a   : > { %v599_v47 = vpop.f32.mrf.mxu2  ;;  %v612_v21 = vpop.f32.mrf.mxu3 }
 0x16b   : > { %v1591_v26 = vpop.permute.xlu0 %1590 }
 0x16c   : > { %v1601_v40 = vsel %vm1594_vm10, %v1589_v12, %v1591_v26  ;;  %v1602_v42 = vsel %vm1594_vm10, %v1591_v26, %v1593_v9 }
 0x16d   : > { %v707_v19 = vpop.f32.mrf.mxu0  ;;  %v722_v6 = vpop.f32.mrf.mxu1  ;;  %v1625_v44 = vsel %vm219_vm0, %v1601_v40, 0  ;;  %v1628_v48 = vsel %vm219_vm0, %v1602_v42, 0 }
 0x16e   : > { %v8037_v7 = vadd.f32 %v707_v19, %v7983_v60 }
 0x16f   : > { %7274 = vmatmul.msk.bf16.vlgmr.msra.gmra.mxu2 %vm302_vm4, %v7271_v0  ;;  %7275 = vmatmul.msk.bf16.vlgmr.msra.gmra.mxu3 %vm302_vm4, %v7271_v0 }
 0x170   : > { %7272 = vmatmul.msk.bf16.vlgmr.msra.gmra.mxu0 %vm302_vm4, %v7271_v0  ;;  %1663 = vmatpush.bf16.msra.mxu2 %v1613_v17 }
 0x171   : > { %1676 = vmatpush.bf16.msra.mxu3 %v1616_v8  ;;  %1637 = vmatpush.bf16.msra.mxu0 %v1607_v28 }
 0x172   : > { %v733_v20 = vpop.f32.mrf.mxu2  ;;  %v746_v31 = vpop.f32.mrf.mxu3 }
 0x173   : > { %v8045_v32 = vadd.f32 %v733_v20, %v7991_v29  ;;  %v8048_v60 = vadd.f32 %v746_v31, %v7994_v27  ;;  %v1599_v27 = vsel %vm1594_vm10, %v8005_v50, %v1587_v62  ;;  %v1777_v49 = vpop.permute.xlu0 %1776  ;;  %v1775_v50 = vpop.permute.xlu1 %1774 }
 0x174   : > { %v1619_v46 = vsel %vm219_vm0, %v1599_v27, 0  ;;  %v1792_v52 = vsel %vm1790_vm11, %v1775_v50, %v1777_v49 }
 0x175   : > { %v709_v33 = vpop.f32.mrf.mxu0  ;;  %v772_v22 = vpop.f32.mrf.mxu1  ;;  %v1806_v57 = vsel %vm219_vm0, %v1792_v52, 0 }
 0x176   : > { %v8052_v63 = vadd.f32 %v772_v22, %v7998_v41  ;;  %v1795_v33 = vsel %vm1790_vm11, %v8060_v61, %v1783_v15 }
 0x178   : > { %7277 = vmatmul.msk.bf16.vlgmr.msrb.gmra.mxu1 %vm302_vm4, %v7271_v0 }
 0x179   : > { %1702 = vmatpush.bf16.msrb.mxu1 %v1622_v24 }
 0x17a   : > { %v735_v39 = vpop.f32.mrf.mxu2  ;;  %v748_v29 = vpop.f32.mrf.mxu3 }
 0x17b   : > { %v1773_v36 = vpop.permute.xlu0 %1772  ;;  %v1789_v20 = vpop.permute.xlu1 %1788  ;;  %v1815_v39 = vsel %vm219_vm0, %v1795_v33, 0 }
 0x17c   : > { %v1791_v10 = vsel %vm1790_vm11, %v1773_v36, %v1775_v50 }
 0x17d   : > { %v759_v41 = vpop.f32.mrf.mxu0  ;;  %v774_v43 = vpop.f32.mrf.mxu1  ;;  %v1803_v21 = vsel %vm219_vm0, %v1791_v10, 0 }
 0x17e   : > { %v8064_v45 = vadd.f32 %v759_v41, %v8009_v51 }
 0x17f   : > { %7278 = vmatmul.msk.bf16.vlgmr.msrb.gmra.mxu2 %vm302_vm4, %v7271_v0  ;;  %7279 = vmatmul.msk.bf16.vlgmr.msrb.gmra.mxu3 %vm302_vm4, %v7271_v0 }
 0x180   : > { %7276 = vmatmul.msk.bf16.vlgmr.msrb.gmra.mxu0 %vm302_vm4, %v7271_v0  ;;  %1715 = vmatpush.bf16.msrb.mxu2 %v1625_v44  ;;  %v1794_v0 = vsel %vm1790_vm11, %v1779_v34, %v8060_v61  ;;  %v7289_v44 = vld [vmem:[%s9640_s1 + $0x10] sm:$0x3] }
 0x181   : > { %1689 = vmatpush.bf16.msrb.mxu0 %v1619_v46  ;;  %1728 = vmatpush.bf16.msrb.mxu3 %v1628_v48  ;;  %v1812_v13 = vsel %vm219_vm0, %v1794_v0, 0 }
 0x182   : > { %v785_v37 = vpop.f32.mrf.mxu2  ;;  %v798_v38 = vpop.f32.mrf.mxu3 }
 0x183   : > { %v808_v16 = vadd.f32 %v785_v37, %v8017_v58  ;;  %v809_v51 = vadd.f32 %v798_v38, %v8020_v35  ;;  %v1793_v35 = vsel %vm1790_vm11, %v1777_v49, %v1779_v34 }
 0x185   : > { %v761_v53 = vpop.f32.mrf.mxu0  ;;  %v916_v54 = vpop.f32.mrf.mxu1 }
 0x186   : > { %v999_v25 = vadd.f32 %v916_v54, %v8027_v5  ;;  %v1809_v5 = vsel %vm219_vm0, %v1793_v35, 0 }
 0x188   : > { %7282 = vmatmul.msk.bf16.vlgmr.msra.gmra.mxu1 %vm302_vm4, %v7280_v55 }
 0x189   : > { %1846 = vmatpush.bf16.msra.mxu1 %v1806_v57 }
 0x18a   : > { %v787_v58 = vpop.f32.mrf.mxu2  ;;  %v800_v59 = vpop.f32.mrf.mxu3 }
 0x18d   : > { %v903_v12 = vpop.f32.mrf.mxu0  ;;  %v918_v11 = vpop.f32.mrf.mxu1 }
 0x18e   : > { %v998_v47 = vadd.f32 %v903_v12, %v8037_v7  ;;  %v1796_v7 = vsel %vm1790_vm11, %v1783_v15, %v1785_v23 }
 0x18f   : > { %7283 = vmatmul.msk.bf16.vlgmr.msra.gmra.mxu2 %vm302_vm4, %v7280_v55  ;;  %7284 = vmatmul.msk.bf16.vlgmr.msra.gmra.mxu3 %vm302_vm4, %v7280_v55  ;;  %v1818_v62 = vsel %vm219_vm0, %v1796_v7, 0 }
 0x190   : > { %7281 = vmatmul.msk.bf16.vlgmr.msra.gmra.mxu0 %vm302_vm4, %v7280_v55  ;;  %1859 = vmatpush.bf16.msra.mxu2 %v1809_v5 }
 0x191   : > { %1872 = vmatpush.bf16.msra.mxu3 %v1812_v13  ;;  %1833 = vmatpush.bf16.msra.mxu0 %v1803_v21 }
 0x192   : > { %v929_v18 = vpop.f32.mrf.mxu2  ;;  %v942_v19 = vpop.f32.mrf.mxu3 }
 0x193   : > { %v1000_v6 = vadd.f32 %v929_v18, %v8045_v32  ;;  %v1001_v17 = vadd.f32 %v942_v19, %v8048_v60  ;;  %v1787_v32 = vpop.permute.xlu0 %1786 }
 0x194   : > { %v1797_v60 = vsel %vm1790_vm11, %v1785_v23, %v1787_v32  ;;  %v1798_v22 = vsel %vm1790_vm11, %v1787_v32, %v1789_v20 }
 0x195   : > { %v905_v28 = vpop.f32.mrf.mxu0  ;;  %v968_v8 = vpop.f32.mrf.mxu1  ;;  %v1824_v29 = vsel %vm219_vm0, %v1798_v22, 0 }
 0x196   : > { %v1003_v9 = vadd.f32 %v968_v8, %v8052_v63  ;;  %v1821_v63 = vsel %vm219_vm0, %v1797_v60, 0 }
 0x198   : > { %7286 = vmatmul.msk.bf16.vlgmr.msrb.gmra.mxu1 %vm302_vm4, %v7280_v55 }
 0x199   : > { %1898 = vmatpush.bf16.msrb.mxu1 %v1818_v62 }
 0x19a   : > { %v931_v31 = vpop.f32.mrf.mxu2  ;;  %v944_v30 = vpop.f32.mrf.mxu3 }
 0x19d   : > { %v955_v24 = vpop.f32.mrf.mxu0  ;;  %v970_v26 = vpop.f32.mrf.mxu1 }
 0x19e   : > { %v1002_v34 = vadd.f32 %v955_v24, %v8064_v45 }
 0x19f   : > { %7287 = vmatmul.msk.bf16.vlgmr.msrb.gmra.mxu2 %vm302_vm4, %v7280_v55  ;;  %7288 = vmatmul.msk.bf16.vlgmr.msrb.gmra.mxu3 %vm302_vm4, %v7280_v55 }
 0x1a0   : > { %7285 = vmatmul.msk.bf16.vlgmr.msrb.gmra.mxu0 %vm302_vm4, %v7280_v55  ;;  %1911 = vmatpush.bf16.msrb.mxu2 %v1821_v63 }
 0x1a1   : > { %1885 = vmatpush.bf16.msrb.mxu0 %v1815_v39  ;;  %1924 = vmatpush.bf16.msrb.mxu3 %v1824_v29 }
 0x1a2   : > { %v981_v40 = vpop.f32.mrf.mxu2  ;;  %v994_v27 = vpop.f32.mrf.mxu3 }
 0x1a3   : > { %v1004_v42 = vadd.f32 %v981_v40, %v808_v16  ;;  %v1005_v61 = vadd.f32 %v994_v27, %v809_v51 }
 0x1a5   : > { %v957_v41 = vpop.f32.mrf.mxu0  ;;  %v1064_v43 = vpop.f32.mrf.mxu1 }
 0x1a6   : > { %v1147_v45 = vadd.f32 %v1064_v43, %v999_v25 }
 0x1a8   : > { %7291 = vmatmul.msk.bf16.vlgmr.msra.gmra.mxu1 %vm302_vm4, %v7289_v44 }
 0x1aa   : > { %v983_v46 = vpop.f32.mrf.mxu2  ;;  %v996_v48 = vpop.f32.mrf.mxu3 }
 0x1ad   : > { %v1051_v49 = vpop.f32.mrf.mxu0  ;;  %v1066_v50 = vpop.f32.mrf.mxu1 }
 0x1ae   : > { %v1146_v37 = vadd.f32 %v1051_v49, %v998_v47 }
 0x1af   : > { %7292 = vmatmul.msk.bf16.vlgmr.msra.gmra.mxu2 %vm302_vm4, %v7289_v44  ;;  %7293 = vmatmul.msk.bf16.vlgmr.msra.gmra.mxu3 %vm302_vm4, %v7289_v44 }
 0x1b0   : > { %7290 = vmatmul.msk.bf16.vlgmr.msra.gmra.mxu0 %vm302_vm4, %v7289_v44 }
 0x1b2   : > { %v1077_v38 = vpop.f32.mrf.mxu2  ;;  %v1090_v16 = vpop.f32.mrf.mxu3 }
 0x1b3   : > { %v1148_v51 = vadd.f32 %v1077_v38, %v1000_v6  ;;  %v1149_v52 = vadd.f32 %v1090_v16, %v1001_v17 }
 0x1b5   : > { %v1053_v53 = vpop.f32.mrf.mxu0  ;;  %v1116_v54 = vpop.f32.mrf.mxu1 }
 0x1b6   : > { %v1151_v55 = vadd.f32 %v1116_v54, %v1003_v9 }
 0x1b8   : > { %7295 = vmatmul.msk.bf16.vlgmr.msrb.gmra.mxu1 %vm302_vm4, %v7289_v44 }
 0x1ba   : > { %v1079_v25 = vpop.f32.mrf.mxu2  ;;  %v1092_v57 = vpop.f32.mrf.mxu3 }
 0x1bb   : > { %v8136_v57 = vld [vmem:[%s9641_s2 + $0x10] sm:$0xff] }
 0x1bc   : > { %1954 = vst [vmem:[#allocation1 + $0x20] ss:$2 sm:$0xff] %v8136_v57 }
 0x1bd   : > { %v1103_v23 = vpop.f32.mrf.mxu0  ;;  %v1118_v36 = vpop.f32.mrf.mxu1 }
 0x1be   : > { %v1150_v58 = vadd.f32 %v1103_v23, %v1002_v34 }
 0x1bf   : > { %7296 = vmatmul.msk.bf16.vlgmr.msrb.gmra.mxu2 %vm302_vm4, %v7289_v44  ;;  %7297 = vmatmul.msk.bf16.vlgmr.msrb.gmra.mxu3 %vm302_vm4, %v7289_v44 }
 0x1c0   : > { %7294 = vmatmul.msk.bf16.vlgmr.msrb.gmra.mxu0 %vm302_vm4, %v7289_v44 }
 0x1c2   : > { %v1129_v59 = vpop.f32.mrf.mxu2  ;;  %v1142_v35 = vpop.f32.mrf.mxu3 }
 0x1c3   : > { %v1152_v0 = vadd.f32 %v1129_v59, %v1004_v42  ;;  %v1153_v10 = vadd.f32 %v1142_v35, %v1005_v61 }
 0x1c5   : > { %v1105_v12 = vpop.f32.mrf.mxu0  ;;  %v1260_v11 = vpop.f32.mrf.mxu1 }
 0x1c6   : > { %v1343_v5 = vadd.f32 %v1260_v11, %v1147_v45  ;;  %v8142_v11 = vld [vmem:[%s9641_s2 + $0x18] sm:$0xff] }
 0x1c7   : > { %1956 = vst [vmem:[#allocation1 + $0x30] ss:$2 sm:$0xff] %v8142_v11 }
 0x1ca   : > { %v1131_v47 = vpop.f32.mrf.mxu2  ;;  %v1144_v21 = vpop.f32.mrf.mxu3 }
 0x1cd   : > { %v1247_v13 = vpop.f32.mrf.mxu0  ;;  %v1262_v15 = vpop.f32.mrf.mxu1 }
 0x1ce   : > { %v1342_v18 = vadd.f32 %v1247_v13, %v1146_v37 }
 0x1d2   : > { %v1273_v19 = vpop.f32.mrf.mxu2  ;;  %v1286_v6 = vpop.f32.mrf.mxu3 }
 0x1d3   : > { %v8119_v17 = vadd.f32 %v1273_v19, %v1148_v51  ;;  %v8121_v7 = vadd.f32 %v1286_v6, %v1149_v52 }
 0x1d5   : > { %v1249_v28 = vpop.f32.mrf.mxu0  ;;  %v1312_v8 = vpop.f32.mrf.mxu1 }
 0x1d6   : > { %v1347_v9 = vadd.f32 %v1312_v8, %v1151_v55  ;;  %v1958_v8 = vld.sshfl [vmem:[#allocation1 + $0x8] sm:$0xff pattern:$0x75316420] }
 0x1da   : > { %v1275_v62 = vpop.f32.mrf.mxu2  ;;  %v1288_v20 = vpop.f32.mrf.mxu3 }
 0x1dd   : > { %v1299_v31 = vpop.f32.mrf.mxu0  ;;  %v1314_v30 = vpop.f32.mrf.mxu1 }
 0x1de   : > { %v1346_v33 = vadd.f32 %v1299_v31, %v1150_v58 }
 0x1e2   : > { %v1325_v32 = vpop.f32.mrf.mxu2  ;;  %v1338_v60 = vpop.f32.mrf.mxu3 }
 0x1e3   : > { %v8123_v22 = vadd.f32 %v1325_v32, %v1152_v0  ;;  %v8125_v24 = vadd.f32 %v1338_v60, %v1153_v10  ;;  %v1957_v60 = vld.sshfl [vmem:[#allocation1] sm:$0xff pattern:$0x75316420] }
 0x1e5   : > { %v1301_v26 = vpop.f32.mrf.mxu0  ;;  %v1456_v63 = vpop.f32.mrf.mxu1 }
 0x1e6   : > { %v1539_v34 = vadd.f32 %v1456_v63, %v1343_v5 }
 0x1ea   : > { %v1327_v39 = vpop.f32.mrf.mxu2  ;;  %v1340_v29 = vpop.f32.mrf.mxu3 }
 0x1ed   : > { %v1443_v40 = vpop.f32.mrf.mxu0  ;;  %v1458_v27 = vpop.f32.mrf.mxu1 }
 0x1ee   : > { %v1538_v42 = vadd.f32 %v1443_v40, %v1342_v18 }
 0x1f2   : > { %v1469_v61 = vpop.f32.mrf.mxu2  ;;  %v1482_v41 = vpop.f32.mrf.mxu3 }
 0x1f3   : > { %v1541_v32 = vadd.f32 %v1482_v41, %v8121_v7 }
 0x1f5   : > { %v1445_v43 = vpop.f32.mrf.mxu0  ;;  %v1508_v44 = vpop.f32.mrf.mxu1 }
 0x1f6   : > { %v1543_v45 = vadd.f32 %v1508_v44, %v1347_v9 }
 0x1fa   : > { %v1471_v46 = vpop.f32.mrf.mxu2  ;;  %v1484_v48 = vpop.f32.mrf.mxu3 }
 0x1fb   : > { %v1959_v46 = vld.sshfl [vmem:[#allocation1 + $0x10] sm:$0xff pattern:$0x75316420] }
 0x1fd   : > { %v1495_v49 = vpop.f32.mrf.mxu0  ;;  %v1510_v50 = vpop.f32.mrf.mxu1 }
 0x1fe   : > { %v8127_v37 = vadd.f32 %v1495_v49, %v1346_v33  ;;  %v1540_v33 = vadd.f32 %v1469_v61, %v8119_v17 }
 0x202   : > { %v8129_v38 = vpop.f32.mrf.mxu2  ;;  %v8131_v16 = vpop.f32.mrf.mxu3 }
 0x205   : > { %v1497_v51 = vpop.f32.mrf.mxu0  ;;  %v1652_v52 = vpop.f32.mrf.mxu1 }
 0x206   : > { %v1735_v21 = vadd.f32 %v1652_v52, %v1539_v34 }
 0x20a   : > { %v1523_v53 = vpop.f32.mrf.mxu2  ;;  %v1536_v54 = vpop.f32.mrf.mxu3 }
 0x20d   : > { %v1639_v55 = vpop.f32.mrf.mxu0  ;;  %v1654_v25 = vpop.f32.mrf.mxu1 }
 0x20e   : > { %v1734_v9 = vadd.f32 %v1639_v55, %v1538_v42  ;;  %v1960_v42 = vld.sshfl [vmem:[#allocation1 + $0x18] sm:$0xff pattern:$0x75316420] }
 0x212   : > { %v1665_v23 = vpop.f32.mrf.mxu2  ;;  %v1678_v36 = vpop.f32.mrf.mxu3 }
 0x213   : > { %v1736_v63 = vadd.f32 %v1665_v23, %v1540_v33  ;;  %v1737_v34 = vadd.f32 %v1678_v36, %v1541_v32 }
 0x215   : > { %v1641_v58 = vpop.f32.mrf.mxu0  ;;  %v1704_v59 = vpop.f32.mrf.mxu1 }
 0x216   : > { %v1739_v48 = vadd.f32 %v1704_v59, %v1543_v45  ;;  %v1962_v59 = vld.sshfl [vmem:[#allocation1 + $0x28] sm:$0xff pattern:$0x75316420] }
 0x21a   : > { %v1667_v35 = vpop.f32.mrf.mxu2  ;;  %v1680_v0 = vpop.f32.mrf.mxu3 }
 0x21d   : > { %v1691_v10 = vpop.f32.mrf.mxu0  ;;  %v1706_v12 = vpop.f32.mrf.mxu1 }
 0x21e   : > { %v1738_v12 = vadd.f32 %v1691_v10, %v8127_v37  ;;  %v1961_v37 = vld.sshfl [vmem:[#allocation1 + $0x20] sm:$0xff pattern:$0x75316420] }
 0x222   : > { %v1717_v5 = vpop.f32.mrf.mxu2  ;;  %v1730_v47 = vpop.f32.mrf.mxu3 }
 0x225   : > { %v1693_v13 = vpop.f32.mrf.mxu0  ;;  %v1848_v15 = vpop.f32.mrf.mxu1 }
 0x226   : > { %v1931_v18 = vadd.f32 %v1848_v15, %v1735_v21 }
 0x228   : > { %v1939_v19 = vmax.f32 %v1931_v18, 0.0 }
 0x22a   : > { %v1719_v6 = vpop.f32.mrf.mxu2  ;;  %v1732_v28 = vpop.f32.mrf.mxu3  ;;  %v1974_v31 = vmul.f32 %v1958_v8, %v1939_v19  ;;  %v1544_v8 = vadd.f32 %v8129_v38, %v8123_v22  ;;  %v1963_v22 = vld.sshfl [vmem:[#allocation1 + $0x30] sm:$0xff pattern:$0x75316420]  ;;  %v1964_v38 = vld.sshfl [vmem:[#allocation1 + $0x38] sm:$0xff pattern:$0x75316420] }
 0x22c   : > { %v2021_v39 = vrot.slane %v1974_v31, 4 }
 0x22d   : > { %v1835_v62 = vpop.f32.mrf.mxu0  ;;  %v1850_v20 = vpop.f32.mrf.mxu1 }
 0x22e   : > { %v1930_v30 = vadd.f32 %v1835_v62, %v1734_v9  ;;  %v1545_v9 = vadd.f32 %v8131_v16, %v8125_v24  ;;  %v1740_v62 = vadd.f32 %v1717_v5, %v1544_v8 }
 0x230   : > { %v1938_v26 = vmax.f32 %v1930_v30, 0.0  ;;  %v1741_v20 = vadd.f32 %v1730_v47, %v1545_v9 }
 0x232   : > { %v1973_v29 = vmul.f32 %v1957_v60, %v1938_v26  ;;  %v1861_v40 = vpop.f32.mrf.mxu2  ;;  %v1874_v27 = vpop.f32.mrf.mxu3 }
 0x233   : > { %v1932_v43 = vadd.f32 %v1861_v40, %v1736_v63  ;;  %v1933_v44 = vadd.f32 %v1874_v27, %v1737_v34 }
 0x234   : > { %v1981_v49 = vpack.c.bf16 %v1974_v31, %v1973_v29  ;;  %v8148_v50 = vsel %vm227_vm2, %v1973_v29, %v2021_v39 }
 0x235   : > { %v1940_v17 = vmax.f32 %v1932_v43, 0.0  ;;  %v1941_v61 = vmax.f32 %v1933_v44, 0.0  ;;  %v1837_v7 = vpop.f32.mrf.mxu0  ;;  %v1900_v41 = vpop.f32.mrf.mxu1 }
 0x236   : > { %v1935_v51 = vadd.f32 %v1900_v41, %v1739_v48  ;;  %v1989_v54 = vrot.slane %v1981_v49, 2 }
 0x237   : > { %v1975_v52 = vmul.f32 %v1959_v46, %v1940_v17  ;;  %v1976_v53 = vmul.f32 %v1960_v42, %v1941_v61 }
 0x238   : > { %v1943_v23 = vmax.f32 %v1935_v51, 0.0  ;;  %v1997_v21 = vsel %vm219_vm0, %v1981_v49, %v1989_v54 }
 0x239   : > { %v1982_v55 = vpack.c.bf16 %v1976_v53, %v1975_v52  ;;  %v2022_v25 = vrot.slane %v1976_v53, 4 }
 0x23a   : > { %v1863_v36 = vpop.f32.mrf.mxu2  ;;  %v1876_v58 = vpop.f32.mrf.mxu3  ;;  %v1978_v6 = vmul.f32 %v1962_v59, %v1943_v23 }
 0x23b   : > { %v1990_v35 = vrot.slane %v1982_v55, 4  ;;  %v1991_v0 = vrot.slane %v1982_v55, 6  ;;  %v8151_v45 = vsel %vm227_vm2, %v1975_v52, %v2022_v25 }
 0x23c   : > { %v2023_v31 = vrot.slane %v1978_v6, 4 }
 0x23d   : > { %v2000_v13 = vsel %vm223_vm1, %v1990_v35, %v1991_v0  ;;  %v1887_v15 = vpop.f32.mrf.mxu0  ;;  %v1902_v18 = vpop.f32.mrf.mxu1 }
 0x23e   : > { %v8157_v19 = vsel %vm227_vm2, %v1997_v21, %v2000_v13  ;;  %v1934_v28 = vadd.f32 %v1887_v15, %v1738_v12 }
 0x23f   : > { %2011 = vst [vmem:[#allocation2 + $0x6] sm:$0xff] %v8157_v19 }
 0x240   : > { %v1942_v10 = vmax.f32 %v1934_v28, 0.0 }
 0x242   : > { %v1977_v30 = vmul.f32 %v1961_v37, %v1942_v10  ;;  %v1913_v33 = vpop.f32.mrf.mxu2  ;;  %v1926_v32 = vpop.f32.mrf.mxu3 }
 0x243   : > { %v1936_v60 = vadd.f32 %v1913_v33, %v1740_v62  ;;  %v1937_v26 = vadd.f32 %v1926_v32, %v1741_v20 }
 0x244   : > { %v1983_v63 = vpack.c.bf16 %v1978_v6, %v1977_v30  ;;  %v8165_v34 = vsel %vm227_vm2, %v1977_v30, %v2023_v31 }
 0x245   : > { %v1944_v39 = vmax.f32 %v1936_v60, 0.0  ;;  %v1945_v24 = vmax.f32 %v1937_v26, 0.0  ;;  %v1889_v16 = vpop.f32.mrf.mxu0 }
 0x246   : > { %v8167_v29 = vld [vmem:[#allocation2 + $0x4] sm:$0xff]  ;;  %v1992_v40 = vrot.slane %v1983_v63, 2 }
 0x247   : > { %2045 = vst [vmem:[#allocation1] ss:$4 sm:$0xff] %v8167_v29  ;;  %v1979_v5 = vmul.f32 %v1963_v22, %v1944_v39  ;;  %v1980_v47 = vmul.f32 %v1964_v38, %v1945_v24 }
 0x248   : > { %v2004_v17 = vsel %vm219_vm0, %v1983_v63, %v1992_v40 }
 0x249   : > { %v1984_v27 = vpack.c.bf16 %v1980_v47, %v1979_v5  ;;  %v2024_v43 = vrot.slane %v1980_v47, 4 }
 0x24a   : > { %v1915_v44 = vpop.f32.mrf.mxu2  ;;  %v1928_v46 = vpop.f32.mrf.mxu3 }
 0x24b   : > { %v1993_v42 = vrot.slane %v1984_v27, 4  ;;  %v1994_v48 = vrot.slane %v1984_v27, 6  ;;  %v8171_v49 = vsel %vm227_vm2, %v1979_v5, %v2024_v43 }
 0x24d   : > { %v2007_v61 = vsel %vm223_vm1, %v1993_v42, %v1994_v48 }
 0x24e   : > { %v8176_v7 = vsel %vm227_vm2, %v2004_v17, %v2007_v61  ;;  %v2055_v41 = vld.sshfl [vmem:[#allocation1 + $0x18] sm:$0xff pattern:$0x73625140]  ;;  %v2053_v51 = vld.sshfl [vmem:[#allocation1 + $0x10] sm:$0xff pattern:$0x73625140] }
 0x24f   : > { %2012 = vst [vmem:[#allocation2 + $0xe] sm:$0xff] %v8176_v7  ;;  %2075 = vrot.lane.b32.xlu1 %v2055_v41, %s7588_s28  ;;  %2073 = vrot.lane.b32.xlu0 %v2053_v51, %s7588_s28  ;;  %v2051_v52 = vld.sshfl [vmem:[#allocation1 + $0x8] sm:$0xff pattern:$0x73625140] }
 0x250   : > { %v2049_v55 = vld.sshfl [vmem:[#allocation1] sm:$0xff pattern:$0x73625140] }
 0x256   : > { %v2038_v53 = vld [vmem:[#allocation2 + $0xc] sm:$0xff]  ;;  %v2039_v54 = vld [vmem:[#allocation2 + $0x14] sm:$0x3] }
 0x257   : > { %2048 = vst [vmem:[#allocation1 + $0x20] ss:$4 sm:$0xff] %v2038_v53  ;;  %2071 = vrot.lane.b32.xlu1 %v2051_v52, %s7588_s28  ;;  %2069 = vrot.lane.b32.xlu0 %v2049_v55, %s7588_s28  ;;  %v2409_v62 = vld [vmem:[#allocation2 + $0x14] sm:$0x3] }
 0x258   : > { %2066 = vst [vmem:[#allocation1] ss:$4 sm:$0xff] %v2039_v54  ;;  %v2605_v5 = vld [vmem:[#allocation2 + $0x14] sm:$0x3] }
 0x25e   : > { %v2063_v25 = vld.sshfl [vmem:[#allocation1 + $0x38] sm:$0xff pattern:$0x73625140]  ;;  %v2057_v23 = vld.sshfl [vmem:[#allocation1 + $0x20] sm:$0xff pattern:$0x73625140] }
 0x25f   : > { %v2067_v36 = vld.sshfl [vmem:[#allocation1] sm:$0xff pattern:$0x73625140]  ;;  %2083 = vrot.lane.b32.xlu0 %v2063_v25, %s7588_s28  ;;  %2077 = vrot.lane.b32.xlu2 %v2057_v23, %s7588_s28  ;;  %v2061_v58 = vld.sshfl [vmem:[#allocation1 + $0x30] sm:$0xff pattern:$0x73625140] }
 0x260   : > { %2085 = vrot.lane.b32.xlu1 %v2067_v36, %s7588_s28  ;;  %2227 = vst [vmem:[#allocation1] ss:$4 sm:$0xff] %v8167_v29  ;;  %v2059_v35 = vld.sshfl [vmem:[#allocation1 + $0x28] sm:$0xff pattern:$0x73625140] }
 0x261   : > { %2229 = vst [vmem:[#allocation1 + $0x20] ss:$4 sm:$0xff] %v2038_v53  ;;  %v2949_v25 = vld [vmem:[#allocation2 + $0x16] sm:$0x3] }
 0x267   : > { %v2236_v0 = vld.sshfl [vmem:[#allocation1 + $0x18] sm:$0xff pattern:$0x73625140]  ;;  %v2234_v59 = vld.sshfl [vmem:[#allocation1 + $0x10] sm:$0xff pattern:$0x73625140]  ;;  %2081 = vrot.lane.b32.xlu2 %v2061_v58, %s7588_s28 }
 0x268   : > { %2255 = vrot.lane.b32.xlu1 %v2236_v0, %s7589_s29  ;;  %2253 = vrot.lane.b32.xlu0 %v2234_v59, %s7589_s29  ;;  %v2232_v12 = vld.sshfl [vmem:[#allocation1 + $0x8] sm:$0xff pattern:$0x73625140]  ;;  %v2230_v21 = vld.sshfl [vmem:[#allocation1] sm:$0xff pattern:$0x73625140] }
 0x269   : > { %2246 = vst [vmem:[#allocation1] ss:$4 sm:$0xff] %v2039_v54  ;;  %v2244_v13 = vld.sshfl [vmem:[#allocation1 + $0x38] sm:$0xff pattern:$0x73625140] }
 0x26a   : > { %v2238_v15 = vld.sshfl [vmem:[#allocation1 + $0x20] sm:$0xff pattern:$0x73625140]  ;;  %v2242_v18 = vld.sshfl [vmem:[#allocation1 + $0x30] sm:$0xff pattern:$0x73625140] }
 0x26b   : > { %v2240_v6 = vld.sshfl [vmem:[#allocation1 + $0x28] sm:$0xff pattern:$0x73625140] }
 0x26c   : > { %2416 = vst [vmem:[#allocation1 + $0x20] ss:$4 sm:$0xff] %v2038_v53 }
 0x26f   : > { %2079 = vrot.lane.b32.xlu2 %v2059_v35, %s7588_s28 }
 0x270   : > { %2251 = vrot.lane.b32.xlu1 %v2232_v12, %s7589_s29  ;;  %2249 = vrot.lane.b32.xlu0 %v2230_v21, %s7589_s29  ;;  %v2247_v28 = vld.sshfl [vmem:[#allocation1] sm:$0xff pattern:$0x73625140] }
 0x271   : > { %2413 = vst [vmem:[#allocation1] ss:$4 sm:$0xff] %v8167_v29 }
 0x273   : > { %v2431_v8 = vld.sshfl [vmem:[#allocation1 + $0x38] sm:$0xff pattern:$0x73625140]  ;;  %v2425_v9 = vld.sshfl [vmem:[#allocation1 + $0x20] sm:$0xff pattern:$0x73625140] }
 0x274   : > { %v2429_v37 = vld.sshfl [vmem:[#allocation1 + $0x30] sm:$0xff pattern:$0x73625140]  ;;  %v2427_v10 = vld.sshfl [vmem:[#allocation1 + $0x28] sm:$0xff pattern:$0x73625140] }
 0x275   : > { %2612 = vst [vmem:[#allocation1 + $0x20] ss:$4 sm:$0xff] %v2038_v53 }
 0x277   : > { %2257 = vrot.lane.b32.xlu2 %v2238_v15, %s7589_s29 }
 0x278   : > { %2265 = vrot.lane.b32.xlu1 %v2247_v28, %s7589_s29  ;;  %2263 = vrot.lane.b32.xlu0 %v2244_v13, %s7589_s29  ;;  %v2423_v20 = vld.sshfl [vmem:[#allocation1 + $0x18] sm:$0xff pattern:$0x73625140]  ;;  %v2421_v31 = vld.sshfl [vmem:[#allocation1 + $0x10] sm:$0xff pattern:$0x73625140] }
 0x279   : > { %v2419_v30 = vld.sshfl [vmem:[#allocation1 + $0x8] sm:$0xff pattern:$0x73625140]  ;;  %v2417_v33 = vld.sshfl [vmem:[#allocation1] sm:$0xff pattern:$0x73625140] }
 0x27a   : > { %2434 = vst [vmem:[#allocation1] ss:$4 sm:$0xff] %v2409_v62  ;;  %v3145_v28 = vld [vmem:[#allocation2 + $0x16] sm:$0x3] }
 0x27c   : > { %v8197_v32 = vld.sshfl [vmem:[#allocation1 + $0x38] sm:$0xff pattern:$0x73625140]  ;;  %v2621_v60 = vld.sshfl [vmem:[#allocation1 + $0x20] sm:$0xff pattern:$0x73625140] }
 0x27d   : > { %v8199_v26 = vld.sshfl [vmem:[#allocation1 + $0x30] sm:$0xff pattern:$0x73625140]  ;;  %v8201_v63 = vld.sshfl [vmem:[#allocation1 + $0x28] sm:$0xff pattern:$0x73625140] }
 0x27e   : > { %2807 = vst [vmem:[#allocation1 + $0x20] ss:$4 sm:$0xff] %v8176_v7 }
 0x27f   : > { %2261 = vrot.lane.b32.xlu2 %v2242_v18, %s7589_s29 }
 0x280   : > { %2443 = vrot.lane.b32.xlu1 %v2423_v20, %s7590_s30  ;;  %2441 = vrot.lane.b32.xlu0 %v2421_v31, %s7590_s30 }
 0x281   : > { %v2435_v22 = vld.sshfl [vmem:[#allocation1] sm:$0xff pattern:$0x73625140] }
 0x282   : > { %2609 = vst [vmem:[#allocation1] ss:$4 sm:$0xff] %v8167_v29 }
 0x285   : > { %v8208_v38 = vld.sshfl [vmem:[#allocation1 + $0x20] sm:$0xff pattern:$0x73625140]  ;;  %v8210_v39 = vld.sshfl [vmem:[#allocation1 + $0x28] sm:$0xff pattern:$0x73625140] }
 0x286   : > { %v8212_v24 = vld.sshfl [vmem:[#allocation1 + $0x30] sm:$0xff pattern:$0x73625140]  ;;  %v8214_v16 = vld.sshfl [vmem:[#allocation1 + $0x38] sm:$0xff pattern:$0x73625140] }
 0x287   : > { %2259 = vrot.lane.b32.xlu2 %v2240_v6, %s7589_s29  ;;  %2956 = vst [vmem:[#allocation1 + $0x20] ss:$4 sm:$0xff] %v8176_v7 }
 0x288   : > { %2439 = vrot.lane.b32.xlu1 %v2419_v30, %s7590_s30  ;;  %2437 = vrot.lane.b32.xlu0 %v2417_v33, %s7590_s30 }
 0x289   : > { %v2619_v47 = vld.sshfl [vmem:[#allocation1 + $0x18] sm:$0xff pattern:$0x73625140]  ;;  %v2617_v40 = vld.sshfl [vmem:[#allocation1 + $0x10] sm:$0xff pattern:$0x73625140] }
 0x28a   : > { %v2615_v29 = vld.sshfl [vmem:[#allocation1 + $0x8] sm:$0xff pattern:$0x73625140]  ;;  %v2613_v27 = vld.sshfl [vmem:[#allocation1] sm:$0xff pattern:$0x73625140] }
 0x28b   : > { %2630 = vst [vmem:[#allocation1] ss:$4 sm:$0xff] %v2605_v5  ;;  %v8304_v5 = vld [vmem:[%s9640_s1 + $0x14] sm:$0x3] }
 0x28e   : > { %v8220_v43 = vld.sshfl [vmem:[#allocation1 + $0x38] sm:$0xff pattern:$0x73625140]  ;;  %v8222_v44 = vld.sshfl [vmem:[#allocation1 + $0x20] sm:$0xff pattern:$0x73625140] }
 0x28f   : > { %2445 = vrot.lane.b32.xlu2 %v2425_v9, %s7590_s30  ;;  %v8225_v46 = vld.sshfl [vmem:[#allocation1 + $0x30] sm:$0xff pattern:$0x73625140]  ;;  %v8227_v42 = vld.sshfl [vmem:[#allocation1 + $0x28] sm:$0xff pattern:$0x73625140] }
 0x290   : > { %2453 = vrot.lane.b32.xlu1 %v2435_v22, %s7590_s30  ;;  %2451 = vrot.lane.b32.xlu0 %v2431_v8, %s7590_s30  ;;  %3152 = vst [vmem:[#allocation1 + $0x20] ss:$4 sm:$0xff] %v8176_v7  ;;  %v3340_v22 = vld [vmem:[#allocation2 + $0x16] sm:$0x3] }
 0x292   : > { %v2631_v48 = vld.sshfl [vmem:[#allocation1] sm:$0xff pattern:$0x73625140] }
 0x293   : > { %2804 = vst [vmem:[#allocation1] ss:$4 sm:$0xff] %v8157_v19 }
 0x297   : > { %2449 = vrot.lane.b32.xlu2 %v2429_v37, %s7590_s30  ;;  %v8234_v17 = vld.sshfl [vmem:[#allocation1 + $0x38] sm:$0xff pattern:$0x73625140]  ;;  %v8236_v61 = vld.sshfl [vmem:[#allocation1 + $0x20] sm:$0xff pattern:$0x73625140] }
 0x298   : > { %2639 = vrot.lane.b32.xlu1 %v2619_v47, %s7591_s4  ;;  %2637 = vrot.lane.b32.xlu0 %v2617_v40, %s7591_s4  ;;  %v8240_v41 = vld.sshfl [vmem:[#allocation1 + $0x30] sm:$0xff pattern:$0x73625140]  ;;  %v8242_v51 = vld.sshfl [vmem:[#allocation1 + $0x28] sm:$0xff pattern:$0x73625140] }
 0x299   : > { %3347 = vst [vmem:[#allocation1 + $0x20] ss:$4 sm:$0xff] %v8176_v7 }
 0x29a   : > { %v8245_v52 = vld.sshfl [vmem:[#allocation1] sm:$0xff pattern:$0x73625140]  ;;  %v8247_v53 = vld.sshfl [vmem:[#allocation1 + $0x8] sm:$0xff pattern:$0x73625140] }
 0x29b   : > { %v8249_v54 = vld.sshfl [vmem:[#allocation1 + $0x10] sm:$0xff pattern:$0x73625140]  ;;  %v8251_v55 = vld.sshfl [vmem:[#allocation1 + $0x18] sm:$0xff pattern:$0x73625140] }
 0x29c   : > { %2953 = vst [vmem:[#allocation1] ss:$4 sm:$0xff] %v8157_v19 }
 0x29f   : > { %2447 = vrot.lane.b32.xlu2 %v2427_v10, %s7590_s30 }
 0x2a0   : > { %2635 = vrot.lane.b32.xlu1 %v2615_v29, %s7591_s4  ;;  %2633 = vrot.lane.b32.xlu0 %v2613_v27, %s7591_s4  ;;  %v8257_v23 = vld.sshfl [vmem:[#allocation1 + $0x38] sm:$0xff pattern:$0x73625140]  ;;  %v8259_v36 = vld.sshfl [vmem:[#allocation1 + $0x20] sm:$0xff pattern:$0x73625140] }
 0x2a1   : > { %v8261_v58 = vld.sshfl [vmem:[#allocation1 + $0x30] sm:$0xff pattern:$0x73625140]  ;;  %v8263_v35 = vld.sshfl [vmem:[#allocation1 + $0x28] sm:$0xff pattern:$0x73625140] }
 0x2a2   : > { %3542 = vst [vmem:[#allocation1 + $0x20] ss:$4 sm:$0xff] %v8176_v7 }
 0x2a3   : > { %v2963_v0 = vld.sshfl [vmem:[#allocation1 + $0x18] sm:$0xff pattern:$0x73625140]  ;;  %v2961_v59 = vld.sshfl [vmem:[#allocation1 + $0x10] sm:$0xff pattern:$0x73625140] }
 0x2a4   : > { %v2959_v12 = vld.sshfl [vmem:[#allocation1 + $0x8] sm:$0xff pattern:$0x73625140]  ;;  %v2957_v21 = vld.sshfl [vmem:[#allocation1] sm:$0xff pattern:$0x73625140] }
 0x2a5   : > { %2974 = vst [vmem:[#allocation1] ss:$4 sm:$0xff] %v2949_v25 }
 0x2a7   : > { %2641 = vrot.lane.b32.xlu2 %v2621_v60, %s7591_s4 }
 0x2a8   : > { %2649 = vrot.lane.b32.xlu1 %v2631_v48, %s7591_s4  ;;  %2647 = vrot.lane.b32.xlu0 %v8197_v32, %s7591_s4 }
 0x2a9   : > { %v8271_v15 = vld.sshfl [vmem:[#allocation1 + $0x38] sm:$0xff pattern:$0x73625140]  ;;  %v8273_v18 = vld.sshfl [vmem:[#allocation1 + $0x20] sm:$0xff pattern:$0x73625140] }
 0x2aa   : > { %v8275_v6 = vld.sshfl [vmem:[#allocation1 + $0x30] sm:$0xff pattern:$0x73625140]  ;;  %v8280_v7 = vld.sshfl [vmem:[#allocation1 + $0x28] sm:$0xff pattern:$0x73625140] }
 0x2ab   : > { %3742 = vst [vmem:[#allocation1 + $0x30] ss:$2 sm:$0xff] %v8142_v11 }
 0x2ac   : > { %v2975_v13 = vld.sshfl [vmem:[#allocation1] sm:$0xff pattern:$0x73625140]  ;;  %3740 = vst [vmem:[#allocation1 + $0x20] ss:$2 sm:$0xff] %v8136_v57 }
 0x2ad   : > { %3149 = vst [vmem:[#allocation1] ss:$4 sm:$0xff] %v8157_v19 }
 0x2af   : > { %2645 = vrot.lane.b32.xlu2 %v8199_v26, %s7591_s4 }
 0x2b0   : > { %2983 = vrot.lane.b32.xlu1 %v2963_v0, %s7592_s5  ;;  %2981 = vrot.lane.b32.xlu0 %v2961_v59, %s7592_s5 }
 0x2b4   : > { %v3159_v8 = vld.sshfl [vmem:[#allocation1 + $0x18] sm:$0xff pattern:$0x73625140]  ;;  %v3157_v9 = vld.sshfl [vmem:[#allocation1 + $0x10] sm:$0xff pattern:$0x73625140] }
 0x2b5   : > { %v3155_v37 = vld.sshfl [vmem:[#allocation1 + $0x8] sm:$0xff pattern:$0x73625140]  ;;  %v3153_v10 = vld.sshfl [vmem:[#allocation1] sm:$0xff pattern:$0x73625140] }
 0x2b6   : > { %3170 = vst [vmem:[#allocation1] ss:$4 sm:$0xff] %v3145_v28 }
 0x2b7   : > { %2643 = vrot.lane.b32.xlu2 %v8201_v63, %s7591_s4 }
 0x2b8   : > { %2979 = vrot.lane.b32.xlu1 %v2959_v12, %s7592_s5  ;;  %2977 = vrot.lane.b32.xlu0 %v2957_v21, %s7592_s5 }
 0x2b9   : > { %v2078_v62 = vpop.permute.xlu2 %2077 }
 0x2bd   : > { %v8289_v20 = vld.sshfl [vmem:[#allocation1] sm:$0xff pattern:$0x73625140] }
 0x2be   : > { %3344 = vst [vmem:[#allocation1] ss:$4 sm:$0xff] %v8157_v19 }
 0x2bf   : > { %2985 = vrot.lane.b32.xlu2 %v8222_v44, %s7592_s5 }
 0x2c0   : > { %2993 = vrot.lane.b32.xlu1 %v2975_v13, %s7592_s5  ;;  %2991 = vrot.lane.b32.xlu0 %v8220_v43, %s7592_s5 }
 0x2c1   : > { %v2076_v31 = vpop.permute.xlu1 %2075  ;;  %v2074_v30 = vpop.permute.xlu0 %2073 }
 0x2c2   : > { %v2091_v33 = vsel %vm2087_vm12, %v2076_v31, %v2078_v62  ;;  %v2090_v32 = vsel %vm2087_vm12, %v2074_v30, %v2076_v31  ;;  %v2082_v60 = vpop.permute.xlu2 %2081 }
 0x2c3   : > { %v2106_v26 = vsel %vm219_vm0, %v2090_v32, 0  ;;  %v2109_v63 = vsel %vm219_vm0, %v2091_v33, 0 }
 0x2c4   : > { %2156 = vmatpush.bf16.msra.mxu2 %v2106_v26  ;;  %2169 = vmatpush.bf16.msra.mxu3 %v2109_v63 }
 0x2c5   : > { %v8306_v47 = vld.sshfl [vmem:[#allocation1 + $0x18] sm:$0xff pattern:$0x73625140]  ;;  %v8308_v40 = vld.sshfl [vmem:[#allocation1 + $0x10] sm:$0xff pattern:$0x73625140] }
 0x2c6   : > { %v8310_v29 = vld.sshfl [vmem:[#allocation1 + $0x8] sm:$0xff pattern:$0x73625140]  ;;  %v8312_v27 = vld.sshfl [vmem:[#allocation1] sm:$0xff pattern:$0x73625140] }
 0x2c7   : > { %7302 = vmatmul.msk.bf16.vlgmr.msra.gmra.mxu2 %vm302_vm4, %v8304_v5  ;;  %7303 = vmatmul.msk.bf16.vlgmr.msra.gmra.mxu3 %vm302_vm4, %v8304_v5  ;;  %3365 = vst [vmem:[#allocation1] ss:$4 sm:$0xff] %v3340_v22 }
 0x2c8   : > { %3179 = vrot.lane.b32.xlu1 %v3159_v8, %s7589_s29  ;;  %3177 = vrot.lane.b32.xlu0 %v3157_v9, %s7589_s29 }
 0x2c9   : > { %2989 = vrot.lane.b32.xlu2 %v8225_v46, %s7592_s5  ;;  %v2072_v43 = vpop.permute.xlu1 %2071  ;;  %v2070_v44 = vpop.permute.xlu0 %2069 }
 0x2ca   : > { %v2089_v48 = vsel %vm2087_vm12, %v2072_v43, %v2074_v30  ;;  %v2088_v25 = vsel %vm2087_vm12, %v2070_v44, %v2072_v43  ;;  %v2080_v0 = vpop.permute.xlu2 %2079 }
 0x2cb   : > { %v2100_v59 = vsel %vm219_vm0, %v2088_v25, 0  ;;  %v2092_v12 = vsel %vm2087_vm12, %v2078_v62, %v2080_v0  ;;  %v2093_v21 = vsel %vm2087_vm12, %v2080_v0, %v2082_v60  ;;  %v2103_v13 = vsel %vm219_vm0, %v2089_v48, 0 }
 0x2cc   : > { %2130 = vmatpush.bf16.msra.mxu0 %v2100_v59  ;;  %2143 = vmatpush.bf16.msra.mxu1 %v2103_v13  ;;  %v2112_v28 = vsel %vm219_vm0, %v2092_v12, 0  ;;  %v2115_v46 = vsel %vm219_vm0, %v2093_v21, 0 }
 0x2ce   : > { %v8330_v8 = vld.sshfl [vmem:[#allocation1] sm:$0xff pattern:$0x73625140] }
 0x2cf   : > { %7300 = vmatmul.msk.bf16.vlgmr.msra.gmra.mxu0 %vm302_vm4, %v8304_v5  ;;  %7301 = vmatmul.msk.bf16.vlgmr.msra.gmra.mxu1 %vm302_vm4, %v8304_v5  ;;  %3539 = vst [vmem:[#allocation1] ss:$4 sm:$0xff] %v8157_v19  ;;  %v3535_v19 = vld [vmem:[#allocation2 + $0x16] sm:$0x3] }
 0x2d0   : > { %2182 = vmatpush.bf16.msrb.mxu0 %v2112_v28  ;;  %2195 = vmatpush.bf16.msrb.mxu1 %v2115_v46 }
 0x2d1   : > { %3175 = vrot.lane.b32.xlu1 %v3155_v37, %s7589_s29  ;;  %3173 = vrot.lane.b32.xlu0 %v3153_v10, %s7589_s29  ;;  %v2084_v9 = vpop.permute.xlu0 %2083 }
 0x2d2   : > { %2987 = vrot.lane.b32.xlu2 %v8227_v42, %s7592_s5  ;;  %v2086_v62 = vpop.permute.xlu1 %2085  ;;  %v2094_v31 = vsel %vm2087_vm12, %v2082_v60, %v2084_v9  ;;  %v2258_v30 = vpop.permute.xlu2 %2257 }
 0x2d3   : > { %v2095_v33 = vsel %vm2087_vm12, %v2084_v9, %v2086_v62  ;;  %v2118_v32 = vsel %vm219_vm0, %v2094_v31, 0 }
 0x2d4   : > { %2208 = vmatpush.bf16.msrb.mxu2 %v2118_v32  ;;  %v2121_v26 = vsel %vm219_vm0, %v2095_v33, 0 }
 0x2d5   : > { %2221 = vmatpush.bf16.msrb.mxu3 %v2121_v26 }
 0x2d6   : > { %v8345_v37 = vld.sshfl [vmem:[#allocation1 + $0x18] sm:$0xff pattern:$0x73625140]  ;;  %v8347_v10 = vld.sshfl [vmem:[#allocation1 + $0x10] sm:$0xff pattern:$0x73625140] }
 0x2d7   : > { %7306 = vmatmul.msk.bf16.vlgmr.msrb.gmra.mxu2 %vm302_vm4, %v8304_v5  ;;  %v8351_v42 = vld.sshfl [vmem:[#allocation1 + $0x8] sm:$0xff pattern:$0x73625140]  ;;  %v8353_v60 = vld.sshfl [vmem:[#allocation1] sm:$0xff pattern:$0x73625140] }
 0x2d8   : > { %7307 = vmatmul.msk.bf16.vlgmr.msrb.gmra.mxu3 %vm302_vm4, %v8304_v5  ;;  %3560 = vst [vmem:[#allocation1] ss:$4 sm:$0xff] %v3535_v19 }
 0x2d9   : > { %3189 = vrot.lane.b32.xlu1 %v8289_v20, %s7589_s29  ;;  %3187 = vrot.lane.b32.xlu0 %v8234_v17, %s7589_s29  ;;  %3738 = vst [vmem:[#allocation1 + $0x10] ss:$2 sm:$0xff] %v7742_v56 }
 0x2da   : > { %3181 = vrot.lane.b32.xlu2 %v8236_v61, %s7589_s29  ;;  %v2256_v63 = vpop.permute.xlu1 %2255  ;;  %v2254_v22 = vpop.permute.xlu0 %2253 }
 0x2db   : > { %v2271_v43 = vsel %vm2267_vm13, %v2256_v63, %v2258_v30  ;;  %v2270_v44 = vsel %vm2267_vm13, %v2254_v22, %v2256_v63  ;;  %v2262_v20 = vpop.permute.xlu2 %2261 }
 0x2dc   : > { %v2286_v48 = vsel %vm219_vm0, %v2270_v44, 0  ;;  %v2289_v25 = vsel %vm219_vm0, %v2271_v43, 0 }
 0x2dd   : > { %2336 = vmatpush.bf16.msra.mxu2 %v2286_v48  ;;  %2349 = vmatpush.bf16.msra.mxu3 %v2289_v25 }
 0x2df   : > { %7304 = vmatmul.msk.bf16.vlgmr.msrb.gmra.mxu0 %vm302_vm4, %v8304_v5  ;;  %7305 = vmatmul.msk.bf16.vlgmr.msrb.gmra.mxu1 %vm302_vm4, %v8304_v5  ;;  %v8389_v46 = vld.sshfl [vmem:[#allocation1] sm:$0xff pattern:$0x73625140] }
 0x2e0   : > { %3736 = vst [vmem:[#allocation1] ss:$2 sm:$0xff] %v7770_v14 }
 0x2e1   : > { %3374 = vrot.lane.b32.xlu1 %v8306_v47, %s7588_s28  ;;  %3372 = vrot.lane.b32.xlu0 %v8308_v40, %s7588_s28  ;;  %v7298_v40 = vld [vmem:[%s9640_s1 + $0x12] sm:$0x3] }
 0x2e2   : > { %3185 = vrot.lane.b32.xlu2 %v8240_v41, %s7589_s29  ;;  %v2252_v17 = vpop.permute.xlu1 %2251  ;;  %v2250_v61 = vpop.permute.xlu0 %2249 }
 0x2e3   : > { %v2269_v0 = vsel %vm2267_vm13, %v2252_v17, %v2254_v22  ;;  %v2268_v59 = vsel %vm2267_vm13, %v2250_v61, %v2252_v17  ;;  %v2260_v12 = vpop.permute.xlu2 %2259 }
 0x2e4   : > { %v2280_v21 = vsel %vm219_vm0, %v2268_v59, 0  ;;  %v2272_v5 = vsel %vm2267_vm13, %v2258_v30, %v2260_v12  ;;  %v2273_v13 = vsel %vm2267_vm13, %v2260_v12, %v2262_v20  ;;  %v2283_v47 = vsel %vm219_vm0, %v2269_v0, 0 }
 0x2e5   : > { %2310 = vmatpush.bf16.msra.mxu0 %v2280_v21  ;;  %2323 = vmatpush.bf16.msra.mxu1 %v2283_v47  ;;  %v2292_v41 = vsel %vm219_vm0, %v2272_v5, 0  ;;  %v2295_v28 = vsel %vm219_vm0, %v2273_v13, 0  ;;  %v7316_v5 = vld [vmem:[%s9640_s1 + $0x16] sm:$0x3] }
 0x2e7   : > { %7310 = vmatmul.msk.bf16.vlgmr.msra.gmra.mxu2 %vm302_vm4, %v7298_v40 }
 0x2e8   : > { %7311 = vmatmul.msk.bf16.vlgmr.msra.gmra.mxu3 %vm302_vm4, %v7298_v40 }
 0x2e9   : > { %2362 = vmatpush.bf16.msrb.mxu0 %v2292_v41  ;;  %2375 = vmatpush.bf16.msrb.mxu1 %v2295_v28 }
 0x2ea   : > { %3370 = vrot.lane.b32.xlu1 %v8310_v29, %s7588_s28  ;;  %3368 = vrot.lane.b32.xlu0 %v8312_v27, %s7588_s28  ;;  %v2266_v9 = vpop.permute.xlu1 %2265  ;;  %v2264_v62 = vpop.permute.xlu0 %2263 }
 0x2eb   : > { %3183 = vrot.lane.b32.xlu2 %v8242_v51, %s7589_s29  ;;  %v2274_v31 = vsel %vm2267_vm13, %v2262_v20, %v2264_v62  ;;  %v2275_v30 = vsel %vm2267_vm13, %v2264_v62, %v2266_v9  ;;  %v2446_v33 = vpop.permute.xlu2 %2445 }
 0x2ec   : > { %v2298_v32 = vsel %vm219_vm0, %v2274_v31, 0  ;;  %v2301_v26 = vsel %vm219_vm0, %v2275_v30, 0 }
 0x2ed   : > { %2388 = vmatpush.bf16.msrb.mxu2 %v2298_v32  ;;  %2401 = vmatpush.bf16.msrb.mxu3 %v2301_v26 }
 0x2ef   : > { %7308 = vmatmul.msk.bf16.vlgmr.msra.gmra.mxu0 %vm302_vm4, %v7298_v40  ;;  %7309 = vmatmul.msk.bf16.vlgmr.msra.gmra.mxu1 %vm302_vm4, %v7298_v40 }
 0x2f2   : > { %3384 = vrot.lane.b32.xlu1 %v8330_v8, %s7588_s28  ;;  %3382 = vrot.lane.b32.xlu0 %v8257_v23, %s7588_s28  ;;  %v2444_v51 = vpop.permute.xlu1 %2443  ;;  %v2442_v29 = vpop.permute.xlu0 %2441 }
 0x2f3   : > { %3376 = vrot.lane.b32.xlu2 %v8259_v36, %s7588_s28  ;;  %v2459_v27 = vsel %vm2455_vm14, %v2444_v51, %v2446_v33  ;;  %v2458_v19 = vsel %vm2455_vm14, %v2442_v29, %v2444_v51  ;;  %v2450_v63 = vpop.permute.xlu2 %2449 }
 0x2f4   : > { %v2474_v22 = vsel %vm219_vm0, %v2458_v19, 0  ;;  %v2477_v43 = vsel %vm219_vm0, %v2459_v27, 0 }
 0x2f5   : > { %2524 = vmatpush.bf16.msra.mxu2 %v2474_v22  ;;  %2537 = vmatpush.bf16.msra.mxu3 %v2477_v43  ;;  %v7325_v43 = vld [vmem:[%s9640_s1 + $0x18] sm:$0x3] }
 0x2f7   : > { %7314 = vmatmul.msk.bf16.vlgmr.msrb.gmra.mxu2 %vm302_vm4, %v7298_v40 }
 0x2f8   : > { %7315 = vmatmul.msk.bf16.vlgmr.msrb.gmra.mxu3 %vm302_vm4, %v7298_v40 }
 0x2fa   : > { %3569 = vrot.lane.b32.xlu1 %v8345_v37, %s7590_s30  ;;  %3567 = vrot.lane.b32.xlu0 %v8347_v10, %s7590_s30  ;;  %v2440_v23 = vpop.permute.xlu1 %2439  ;;  %v2438_v36 = vpop.permute.xlu0 %2437 }
 0x2fb   : > { %3380 = vrot.lane.b32.xlu2 %v8261_v58, %s7588_s28  ;;  %v2457_v8 = vsel %vm2455_vm14, %v2440_v23, %v2442_v29  ;;  %v2456_v44 = vsel %vm2455_vm14, %v2438_v36, %v2440_v23  ;;  %v2448_v20 = vpop.permute.xlu2 %2447  ;;  %v2823_v23 = vsel %vm219_vm0, %v8249_v54, 0  ;;  %v2825_v36 = vsel %vm219_vm0, %v8251_v55, 0 }
 0x2fc   : > { %v2468_v48 = vsel %vm219_vm0, %v2456_v44, 0  ;;  %v2460_v25 = vsel %vm2455_vm14, %v2446_v33, %v2448_v20  ;;  %v2471_v37 = vsel %vm219_vm0, %v2457_v8, 0  ;;  %v2461_v17 = vsel %vm2455_vm14, %v2448_v20, %v2450_v63 }
 0x2fd   : > { %2498 = vmatpush.bf16.msra.mxu0 %v2468_v48  ;;  %2511 = vmatpush.bf16.msra.mxu1 %v2471_v37  ;;  %v2480_v58 = vsel %vm219_vm0, %v2460_v25, 0  ;;  %v2483_v10 = vsel %vm219_vm0, %v2461_v17, 0  ;;  %v2819_v8 = vsel %vm219_vm0, %v8245_v52, 0  ;;  %v2821_v44 = vsel %vm219_vm0, %v8247_v53, 0 }
 0x2fe   : > { %v2831_v54 = vsel %vm219_vm0, %v8212_v24, 0  ;;  %v2833_v55 = vsel %vm219_vm0, %v8214_v16, 0  ;;  %v2827_v52 = vsel %vm219_vm0, %v8208_v38, 0  ;;  %v2829_v53 = vsel %vm219_vm0, %v8210_v39, 0  ;;  %v7334_v16 = vld [vmem:[%s9640_s1 + $0x1a] sm:$0x3] }
 0x2ff   : > { %7312 = vmatmul.msk.bf16.vlgmr.msrb.gmra.mxu0 %vm302_vm4, %v7298_v40  ;;  %7313 = vmatmul.msk.bf16.vlgmr.msrb.gmra.mxu1 %vm302_vm4, %v7298_v40 }
 0x301   : > { %2550 = vmatpush.bf16.msrb.mxu0 %v2480_v58  ;;  %2563 = vmatpush.bf16.msrb.mxu1 %v2483_v10 }
 0x302   : > { %3565 = vrot.lane.b32.xlu1 %v8351_v42, %s7590_s30  ;;  %3563 = vrot.lane.b32.xlu0 %v8353_v60, %s7590_s30  ;;  %v2454_v61 = vpop.permute.xlu1 %2453  ;;  %v2452_v0 = vpop.permute.xlu0 %2451 }
 0x303   : > { %3378 = vrot.lane.b32.xlu2 %v8263_v35, %s7588_s28  ;;  %v2462_v59 = vsel %vm2455_vm14, %v2450_v63, %v2452_v0  ;;  %v2463_v12 = vsel %vm2455_vm14, %v2452_v0, %v2454_v61  ;;  %v2642_v13 = vpop.permute.xlu2 %2641  ;;  %s7594_s28 = smov 124  }
 0x304   : > { %v2486_v21 = vsel %vm219_vm0, %v2462_v59, 0  ;;  %v2489_v42 = vsel %vm219_vm0, %v2463_v12, 0 }
 0x305   : > { %2576 = vmatpush.bf16.msrb.mxu2 %v2486_v21  ;;  %2589 = vmatpush.bf16.msrb.mxu3 %v2489_v42 }
 0x307   : > { %7319 = vmatmul.msk.bf16.vlgmr.msra.gmra.mxu2 %vm302_vm4, %v7316_v5 }
 0x308   : > { %7320 = vmatmul.msk.bf16.vlgmr.msra.gmra.mxu3 %vm302_vm4, %v7316_v5 }
 0x30a   : > { %3579 = vrot.lane.b32.xlu1 %v8389_v46, %s7590_s30  ;;  %3577 = vrot.lane.b32.xlu0 %v8271_v15, %s7590_s30  ;;  %v2640_v35 = vpop.permute.xlu1 %2639  ;;  %v2638_v60 = vpop.permute.xlu0 %2637 }
 0x30b   : > { %3571 = vrot.lane.b32.xlu2 %v8273_v18, %s7590_s30  ;;  %v2655_v47 = vsel %vm2651_vm15, %v2640_v35, %v2642_v13  ;;  %v2654_v40 = vsel %vm2651_vm15, %v2638_v60, %v2640_v35  ;;  %v2646_v46 = vpop.permute.xlu2 %2645 }
 0x30c   : > { %v2670_v41 = vsel %vm219_vm0, %v2654_v40, 0  ;;  %v2673_v28 = vsel %vm219_vm0, %v2655_v47, 0 }
 0x30d   : > { %2720 = vmatpush.bf16.msra.mxu2 %v2670_v41  ;;  %2733 = vmatpush.bf16.msra.mxu3 %v2673_v28 }
 0x30f   : > { %7317 = vmatmul.msk.bf16.vlgmr.msra.gmra.mxu0 %vm302_vm4, %v7316_v5  ;;  %7318 = vmatmul.msk.bf16.vlgmr.msra.gmra.mxu1 %vm302_vm4, %v7316_v5 }
 0x312   : > { %v2636_v15 = vpop.permute.xlu1 %2635  ;;  %v2634_v18 = vpop.permute.xlu0 %2633 }
 0x313   : > { %3575 = vrot.lane.b32.xlu2 %v8275_v6, %s7590_s30  ;;  %v2653_v9 = vsel %vm2651_vm15, %v2636_v15, %v2638_v60  ;;  %v2652_v62 = vsel %vm2651_vm15, %v2634_v18, %v2636_v15  ;;  %v2644_v33 = vpop.permute.xlu2 %2643 }
 0x314   : > { %v2664_v31 = vsel %vm219_vm0, %v2652_v62, 0  ;;  %v2667_v30 = vsel %vm219_vm0, %v2653_v9, 0  ;;  %v2656_v29 = vsel %vm2651_vm15, %v2642_v13, %v2644_v33  ;;  %v2657_v27 = vsel %vm2651_vm15, %v2644_v33, %v2646_v46 }
 0x315   : > { %2694 = vmatpush.bf16.msra.mxu0 %v2664_v31  ;;  %2707 = vmatpush.bf16.msra.mxu1 %v2667_v30  ;;  %v2676_v22 = vsel %vm219_vm0, %v2656_v29, 0 }
 0x317   : > { %7323 = vmatmul.msk.bf16.vlgmr.msrb.gmra.mxu2 %vm302_vm4, %v7316_v5 }
 0x318   : > { %7324 = vmatmul.msk.bf16.vlgmr.msrb.gmra.mxu3 %vm302_vm4, %v7316_v5 }
 0x31a   : > { %v2650_v6 = vpop.permute.xlu1 %2649  ;;  %v2648_v32 = vpop.permute.xlu0 %2647 }
 0x31b   : > { %3573 = vrot.lane.b32.xlu2 %v8280_v7, %s7590_s30  ;;  %v2658_v26 = vsel %vm2651_vm15, %v2646_v46, %v2648_v32  ;;  %v2659_v51 = vsel %vm2651_vm15, %v2648_v32, %v2650_v6  ;;  %v2679_v7 = vsel %vm219_vm0, %v2657_v27, 0  ;;  %v2986_v24 = vpop.permute.xlu2 %2985 }
 0x31c   : > { %v2682_v19 = vsel %vm219_vm0, %v2658_v26, 0  ;;  %v2685_v63 = vsel %vm219_vm0, %v2659_v51, 0 }
 0x31d   : > { %2772 = vmatpush.bf16.msrb.mxu2 %v2682_v19  ;;  %2785 = vmatpush.bf16.msrb.mxu3 %v2685_v63 }
 0x31f   : > { %7321 = vmatmul.msk.bf16.vlgmr.msrb.gmra.mxu0 %vm302_vm4, %v7316_v5  ;;  %7322 = vmatmul.msk.bf16.vlgmr.msrb.gmra.mxu1 %vm302_vm4, %v7316_v5 }
 0x320   : > { %2746 = vmatpush.bf16.msrb.mxu0 %v2676_v22  ;;  %2759 = vmatpush.bf16.msrb.mxu1 %v2679_v7 }
 0x322   : > { %v2982_v20 = vpop.permute.xlu0 %2981  ;;  %v2984_v48 = vpop.permute.xlu1 %2983 }
 0x323   : > { %v2998_v25 = vsel %vm2995_vm3, %v2982_v20, %v2984_v48  ;;  %v2999_v37 = vsel %vm2995_vm3, %v2984_v48, %v2986_v24  ;;  %v2990_v42 = vpop.permute.xlu2 %2989 }
 0x324   : > { %v3014_v17 = vsel %vm219_vm0, %v2998_v25, 0  ;;  %v3017_v38 = vsel %vm219_vm0, %v2999_v37, 0 }
 0x327   : > { %7328 = vmatmul.msk.bf16.vlgmr.msra.gmra.mxu2 %vm302_vm4, %v7325_v43 }
 0x328   : > { %7329 = vmatmul.msk.bf16.vlgmr.msra.gmra.mxu3 %vm302_vm4, %v7325_v43  ;;  %2868 = vmatpush.bf16.msra.mxu2 %v2823_v23  ;;  %v7343_v23 = vld [vmem:[%s9640_s1 + $0x1c] sm:$0x3] }
 0x329   : > { %2881 = vmatpush.bf16.msra.mxu3 %v2825_v36 }
 0x32a   : > { %v2978_v58 = vpop.permute.xlu0 %2977  ;;  %v2980_v39 = vpop.permute.xlu1 %2979 }
 0x32b   : > { %v2997_v61 = vsel %vm2995_vm3, %v2980_v39, %v2982_v20  ;;  %v2996_v0 = vsel %vm2995_vm3, %v2978_v58, %v2980_v39 }
 0x32c   : > { %v3011_v5 = vsel %vm219_vm0, %v2997_v61, 0  ;;  %v3008_v13 = vsel %vm219_vm0, %v2996_v0, 0  ;;  %v2988_v62 = vpop.permute.xlu2 %2987 }
 0x32d   : > { %v3000_v30 = vsel %vm2995_vm3, %v2986_v24, %v2988_v62  ;;  %v3001_v33 = vsel %vm2995_vm3, %v2988_v62, %v2990_v42 }
 0x32e   : > { %v3020_v27 = vsel %vm219_vm0, %v3000_v30, 0  ;;  %v3023_v19 = vsel %vm219_vm0, %v3001_v33, 0 }
 0x32f   : > { %7326 = vmatmul.msk.bf16.vlgmr.msra.gmra.mxu0 %vm302_vm4, %v7325_v43  ;;  %7327 = vmatmul.msk.bf16.vlgmr.msra.gmra.mxu1 %vm302_vm4, %v7325_v43 }
 0x330   : > { %2842 = vmatpush.bf16.msra.mxu0 %v2819_v8  ;;  %2855 = vmatpush.bf16.msra.mxu1 %v2821_v44 }
 0x332   : > { %v2992_v35 = vpop.permute.xlu0 %2991  ;;  %v2994_v60 = vpop.permute.xlu1 %2993 }
 0x333   : > { %v3002_v40 = vsel %vm2995_vm3, %v2990_v42, %v2992_v35  ;;  %v3003_v46 = vsel %vm2995_vm3, %v2992_v35, %v2994_v60 }
 0x334   : > { %v3026_v18 = vsel %vm219_vm0, %v3002_v40, 0  ;;  %v3029_v9 = vsel %vm219_vm0, %v3003_v46, 0  ;;  %v3182_v22 = vpop.permute.xlu2 %3181 }
 0x337   : > { %7332 = vmatmul.msk.bf16.vlgmr.msrb.gmra.mxu2 %vm302_vm4, %v7325_v43 }
 0x338   : > { %7333 = vmatmul.msk.bf16.vlgmr.msrb.gmra.mxu3 %vm302_vm4, %v7325_v43  ;;  %2920 = vmatpush.bf16.msrb.mxu2 %v2831_v54 }
 0x339   : > { %2933 = vmatpush.bf16.msrb.mxu3 %v2833_v55 }
 0x33a   : > { %v3178_v6 = vpop.permute.xlu0 %3177  ;;  %v3180_v29 = vpop.permute.xlu1 %3179 }
 0x33b   : > { %v3193_v7 = vsel %vm2267_vm13, %v3178_v6, %v3180_v29  ;;  %v3194_v36 = vsel %vm2267_vm13, %v3180_v29, %v3182_v22 }
 0x33c   : > { %v3209_v54 = vsel %vm219_vm0, %v3193_v7, 0  ;;  %v3212_v20 = vsel %vm219_vm0, %v3194_v36, 0  ;;  %v3186_v61 = vpop.permute.xlu2 %3185 }
 0x33f   : > { %7330 = vmatmul.msk.bf16.vlgmr.msrb.gmra.mxu0 %vm302_vm4, %v7325_v43  ;;  %7331 = vmatmul.msk.bf16.vlgmr.msrb.gmra.mxu1 %vm302_vm4, %v7325_v43 }
 0x340   : > { %2894 = vmatpush.bf16.msrb.mxu0 %v2827_v52  ;;  %2907 = vmatpush.bf16.msrb.mxu1 %v2829_v53 }
 0x343   : > { %v3174_v55 = vpop.permute.xlu0 %3173  ;;  %v3176_v48 = vpop.permute.xlu1 %3175 }
 0x344   : > { %v3192_v24 = vsel %vm2267_vm13, %v3176_v48, %v3178_v6  ;;  %v3191_v25 = vsel %vm2267_vm13, %v3174_v55, %v3176_v48 }
 0x345   : > { %v3206_v0 = vsel %vm219_vm0, %v3192_v24, 0  ;;  %v3203_v42 = vsel %vm219_vm0, %v3191_v25, 0 }
 0x347   : > { %7337 = vmatmul.msk.bf16.vlgmr.msra.gmra.mxu2 %vm302_vm4, %v7334_v16 }
 0x348   : > { %7338 = vmatmul.msk.bf16.vlgmr.msra.gmra.mxu3 %vm302_vm4, %v7334_v16  ;;  %3064 = vmatpush.bf16.msra.mxu2 %v3014_v17 }
 0x349   : > { %3077 = vmatpush.bf16.msra.mxu3 %v3017_v38 }
 0x34a   : > { %v2158_v10 = vpop.f32.mrf.mxu2  ;;  %v2171_v59 = vpop.f32.mrf.mxu3 }
 0x34c   : > { %v2132_v12 = vpop.f32.mrf.mxu0  ;;  %v2145_v21 = vpop.f32.mrf.mxu1 }
 0x34f   : > { %7335 = vmatmul.msk.bf16.vlgmr.msra.gmra.mxu0 %vm302_vm4, %v7334_v16  ;;  %7336 = vmatmul.msk.bf16.vlgmr.msra.gmra.mxu1 %vm302_vm4, %v7334_v16 }
 0x350   : > { %3038 = vmatpush.bf16.msra.mxu0 %v3008_v13  ;;  %3051 = vmatpush.bf16.msra.mxu1 %v3011_v5 }
 0x352   : > { %v2160_v47 = vpop.f32.mrf.mxu2  ;;  %v2173_v41 = vpop.f32.mrf.mxu3 }
 0x353   : > { %v3184_v41 = vpop.permute.xlu2 %3183 }
 0x354   : > { %v2134_v28 = vpop.f32.mrf.mxu0  ;;  %v2147_v15 = vpop.f32.mrf.mxu1 }
 0x355   : > { %v3195_v15 = vsel %vm2267_vm13, %v3182_v22, %v3184_v41 }
 0x357   : > { %7341 = vmatmul.msk.bf16.vlgmr.msrb.gmra.mxu2 %vm302_vm4, %v7334_v16 }
 0x358   : > { %7342 = vmatmul.msk.bf16.vlgmr.msrb.gmra.mxu3 %vm302_vm4, %v7334_v16  ;;  %3116 = vmatpush.bf16.msrb.mxu2 %v3026_v18  ;;  %v3196_v18 = vsel %vm2267_vm13, %v3184_v41, %v3186_v61 }
 0x359   : > { %3129 = vmatpush.bf16.msrb.mxu3 %v3029_v9 }
 0x35a   : > { %v8529_v31 = vpop.f32.mrf.mxu2 }
 0x35b   : > { %v8533_v32 = vpop.f32.mrf.mxu3  ;;  %v3377_v22 = vpop.permute.xlu2 %3376 }
 0x35c   : > { %v8535_v26 = vpop.f32.mrf.mxu0  ;;  %v8537_v51 = vpop.f32.mrf.mxu1 }
 0x35f   : > { %7339 = vmatmul.msk.bf16.vlgmr.msrb.gmra.mxu0 %vm302_vm4, %v7334_v16  ;;  %7340 = vmatmul.msk.bf16.vlgmr.msrb.gmra.mxu1 %vm302_vm4, %v7334_v16 }
 0x360   : > { %3090 = vmatpush.bf16.msrb.mxu0 %v3020_v27  ;;  %3103 = vmatpush.bf16.msrb.mxu1 %v3023_v19 }
 0x362   : > { %v2212_v63 = vpop.f32.mrf.mxu2 }
 0x363   : > { %v2225_v43 = vpop.f32.mrf.mxu3  ;;  %v3218_v63 = vsel %vm219_vm0, %v3196_v18, 0 }
 0x364   : > { %v2186_v8 = vpop.f32.mrf.mxu0  ;;  %v2199_v44 = vpop.f32.mrf.mxu1 }
 0x367   : > { %7346 = vmatmul.msk.bf16.vlgmr.msra.gmra.mxu2 %vm302_vm4, %v7343_v23 }
 0x368   : > { %7347 = vmatmul.msk.bf16.vlgmr.msra.gmra.mxu3 %vm302_vm4, %v7343_v23  ;;  %3259 = vmatpush.bf16.msra.mxu2 %v3209_v54 }
 0x369   : > { %3272 = vmatpush.bf16.msra.mxu3 %v3212_v20 }
 0x36a   : > { %v2338_v52 = vpop.f32.mrf.mxu2 }
 0x36b   : > { %v8552_v53 = vadd.f32 %v2338_v52, %v2158_v10  ;;  %v2351_v16 = vpop.f32.mrf.mxu3  ;;  %v3188_v10 = vpop.permute.xlu0 %3187 }
 0x36c   : > { %v8556_v37 = vadd.f32 %v2351_v16, %v2171_v59  ;;  %v2312_v17 = vpop.f32.mrf.mxu0  ;;  %v2325_v58 = vpop.f32.mrf.mxu1  ;;  %v3197_v13 = vsel %vm2267_vm13, %v3186_v61, %v3188_v10 }
 0x36d   : > { %v8558_v38 = vadd.f32 %v2312_v17, %v2132_v12  ;;  %v8560_v39 = vadd.f32 %v2325_v58, %v2145_v21  ;;  %v3190_v59 = vpop.permute.xlu1 %3189  ;;  %v3221_v47 = vsel %vm219_vm0, %v3197_v13, 0 }
 0x36e   : > { %v3198_v21 = vsel %vm2267_vm13, %v3188_v10, %v3190_v59 }
 0x36f   : > { %7344 = vmatmul.msk.bf16.vlgmr.msra.gmra.mxu0 %vm302_vm4, %v7343_v23  ;;  %7345 = vmatmul.msk.bf16.vlgmr.msra.gmra.mxu1 %vm302_vm4, %v7343_v23  ;;  %v3224_v40 = vsel %vm219_vm0, %v3198_v21, 0 }
 0x370   : > { %3233 = vmatpush.bf16.msra.mxu0 %v3203_v42  ;;  %3246 = vmatpush.bf16.msra.mxu1 %v3206_v0  ;;  %v3381_v42 = vpop.permute.xlu2 %3380 }
 0x372   : > { %v2340_v5 = vpop.f32.mrf.mxu2 }
 0x373   : > { %v2353_v12 = vpop.f32.mrf.mxu3  ;;  %v3373_v9 = vpop.permute.xlu0 %3372 }
 0x374   : > { %v2314_v35 = vpop.f32.mrf.mxu0  ;;  %v2327_v60 = vpop.f32.mrf.mxu1 }
 0x375   : > { %v3375_v29 = vpop.permute.xlu1 %3374 }
 0x376   : > { %v3388_v7 = vsel %vm2087_vm12, %v3373_v9, %v3375_v29 }
 0x377   : > { %7350 = vmatmul.msk.bf16.vlgmr.msrb.gmra.mxu2 %vm302_vm4, %v7343_v23  ;;  %v3404_v44 = vsel %vm219_vm0, %v3388_v7, 0 }
 0x378   : > { %7351 = vmatmul.msk.bf16.vlgmr.msrb.gmra.mxu3 %vm302_vm4, %v7343_v23  ;;  %3311 = vmatpush.bf16.msrb.mxu2 %v3221_v47  ;;  %v3379_v47 = vpop.permute.xlu2 %3378 }
 0x379   : > { %3324 = vmatpush.bf16.msrb.mxu3 %v3224_v40 }
 0x37a   : > { %v2390_v28 = vpop.f32.mrf.mxu2 }
 0x37b   : > { %v8573_v46 = vadd.f32 %v2390_v28, %v8529_v31  ;;  %v2403_v62 = vpop.f32.mrf.mxu3  ;;  %v3215_v31 = vsel %vm219_vm0, %v3195_v15, 0  ;;  %v3369_v54 = vpop.permute.xlu0 %3368  ;;  %v3390_v28 = vsel %vm2087_vm12, %v3377_v22, %v3379_v47  ;;  %v3391_v15 = vsel %vm2087_vm12, %v3379_v47, %v3381_v42 }
 0x37c   : > { %v8578_v30 = vadd.f32 %v2403_v62, %v8533_v32  ;;  %v2364_v33 = vpop.f32.mrf.mxu0  ;;  %v2377_v6 = vpop.f32.mrf.mxu1 }
 0x37d   : > { %v8581_v27 = vadd.f32 %v2364_v33, %v8535_v26  ;;  %v8584_v19 = vadd.f32 %v2377_v6, %v8537_v51  ;;  %v7352_v26 = vld [vmem:[%s9640_s1 + $0x1e] sm:$0x3]  ;;  %v3389_v51 = vsel %vm2087_vm12, %v3375_v29, %v3377_v22  ;;  %v3371_v55 = vpop.permute.xlu1 %3370 }
 0x37e   : > { %v3387_v52 = vsel %vm2087_vm12, %v3371_v55, %v3373_v9  ;;  %v3386_v24 = vsel %vm2087_vm12, %v3369_v54, %v3371_v55 }
 0x37f   : > { %7348 = vmatmul.msk.bf16.vlgmr.msrb.gmra.mxu0 %vm302_vm4, %v7343_v23  ;;  %7349 = vmatmul.msk.bf16.vlgmr.msrb.gmra.mxu1 %vm302_vm4, %v7343_v23  ;;  %v3407_v23 = vsel %vm219_vm0, %v3389_v51, 0  ;;  %v3398_v10 = vsel %vm219_vm0, %v3386_v24, 0 }
 0x380   : > { %3285 = vmatpush.bf16.msrb.mxu0 %v3215_v31  ;;  %3298 = vmatpush.bf16.msrb.mxu1 %v3218_v63  ;;  %v3572_v22 = vpop.permute.xlu2 %3571 }
 0x382   : > { %v2392_v32 = vpop.f32.mrf.mxu2 }
 0x383   : > { %v2405_v43 = vpop.f32.mrf.mxu3  ;;  %v3413_v32 = vsel %vm219_vm0, %v3391_v15, 0 }
 0x384   : > { %v2366_v36 = vpop.f32.mrf.mxu0  ;;  %v2379_v8 = vpop.f32.mrf.mxu1 }
 0x385   : > { %v3385_v59 = vpop.permute.xlu1 %3384 }
 0x387   : > { %7355 = vmatmul.msk.bf16.vlgmr.msra.gmra.mxu2 %vm302_vm4, %v7352_v26 }
 0x388   : > { %7356 = vmatmul.msk.bf16.vlgmr.msra.gmra.mxu3 %vm302_vm4, %v7352_v26  ;;  %3454 = vmatpush.bf16.msra.mxu2 %v3404_v44 }
 0x389   : > { %3467 = vmatpush.bf16.msra.mxu3 %v3407_v23 }
 0x38a   : > { %v2526_v20 = vpop.f32.mrf.mxu2 }
 0x38b   : > { %v8600_v48 = vadd.f32 %v2526_v20, %v8552_v53  ;;  %v2539_v25 = vpop.f32.mrf.mxu3  ;;  %v3401_v53 = vsel %vm219_vm0, %v3387_v52, 0 }
 0x38c   : > { %v8605_v16 = vadd.f32 %v2539_v25, %v8556_v37  ;;  %v2500_v17 = vpop.f32.mrf.mxu0  ;;  %v2513_v58 = vpop.f32.mrf.mxu1 }
 0x38d   : > { %v8608_v61 = vadd.f32 %v2500_v17, %v8558_v38  ;;  %v8611_v0 = vadd.f32 %v2513_v58, %v8560_v39  ;;  %v3383_v37 = vpop.permute.xlu0 %3382  ;;  %v3570_v29 = vpop.permute.xlu1 %3569 }
 0x38e   : > { %v3392_v38 = vsel %vm2087_vm12, %v3381_v42, %v3383_v37  ;;  %v3393_v39 = vsel %vm2087_vm12, %v3383_v37, %v3385_v59 }
 0x38f   : > { %7353 = vmatmul.msk.bf16.vlgmr.msra.gmra.mxu0 %vm302_vm4, %v7352_v26  ;;  %7354 = vmatmul.msk.bf16.vlgmr.msra.gmra.mxu1 %vm302_vm4, %v7352_v26  ;;  %v3416_v35 = vsel %vm219_vm0, %v3392_v38, 0  ;;  %v3419_v60 = vsel %vm219_vm0, %v3393_v39, 0 }
 0x390   : > { %3428 = vmatpush.bf16.msra.mxu0 %v3398_v10  ;;  %3441 = vmatpush.bf16.msra.mxu1 %v3401_v53  ;;  %v3576_v10 = vpop.permute.xlu2 %3575 }
 0x392   : > { %v2528_v5 = vpop.f32.mrf.mxu2 }
 0x393   : > { %v2541_v13 = vpop.f32.mrf.mxu3 }
 0x394   : > { %v2502_v12 = vpop.f32.mrf.mxu0  ;;  %v2515_v21 = vpop.f32.mrf.mxu1 }
 0x395   : > { %v3568_v18 = vpop.permute.xlu0 %3567  ;;  %v3566_v54 = vpop.permute.xlu1 %3565 }
 0x396   : > { %v3583_v7 = vsel %vm2455_vm14, %v3568_v18, %v3570_v29  ;;  %v3582_v20 = vsel %vm2455_vm14, %v3566_v54, %v3568_v18 }
 0x397   : > { %7359 = vmatmul.msk.bf16.vlgmr.msrb.gmra.mxu2 %vm302_vm4, %v7352_v26  ;;  %v3599_v8 = vsel %vm219_vm0, %v3583_v7, 0  ;;  %v3596_v37 = vsel %vm219_vm0, %v3582_v20, 0 }
 0x398   : > { %7360 = vmatmul.msk.bf16.vlgmr.msrb.gmra.mxu3 %vm302_vm4, %v7352_v26  ;;  %3506 = vmatpush.bf16.msrb.mxu2 %v3416_v35  ;;  %v3574_v35 = vpop.permute.xlu2 %3573 }
 0x399   : > { %3519 = vmatpush.bf16.msrb.mxu3 %v3419_v60 }
 0x39a   : > { %v2578_v40 = vpop.f32.mrf.mxu2 }
 0x39b   : > { %v8624_v41 = vadd.f32 %v2578_v40, %v8573_v46  ;;  %v2591_v9 = vpop.f32.mrf.mxu3  ;;  %v3410_v46 = vsel %vm219_vm0, %v3390_v28, 0  ;;  %v3585_v40 = vsel %vm2455_vm14, %v3572_v22, %v3574_v35  ;;  %v3586_v28 = vsel %vm2455_vm14, %v3574_v35, %v3576_v10 }
 0x39c   : > { %v8629_v62 = vadd.f32 %v2591_v9, %v8578_v30  ;;  %v2552_v33 = vpop.f32.mrf.mxu0  ;;  %v2565_v6 = vpop.f32.mrf.mxu1 }
 0x39d   : > { %v8632_v31 = vadd.f32 %v2552_v33, %v8581_v27  ;;  %v8635_v63 = vadd.f32 %v2565_v6, %v8584_v19  ;;  %v7361_v27 = vld [vmem:[%s9640_s1 + $0x20] sm:$0x3]  ;;  %v3584_v19 = vsel %vm2455_vm14, %v3570_v29, %v3572_v22  ;;  %v3564_v44 = vpop.permute.xlu0 %3563  ;;  %v3580_v5 = vpop.permute.xlu1 %3579 }
 0x39e   : > { %v3581_v52 = vsel %vm2455_vm14, %v3564_v44, %v3566_v54 }
 0x39f   : > { %7357 = vmatmul.msk.bf16.vlgmr.msrb.gmra.mxu0 %vm302_vm4, %v7352_v26  ;;  %7358 = vmatmul.msk.bf16.vlgmr.msrb.gmra.mxu1 %vm302_vm4, %v7352_v26  ;;  %v3602_v26 = vsel %vm219_vm0, %v3584_v19, 0  ;;  %v3593_v59 = vsel %vm219_vm0, %v3581_v52, 0 }
 0x3a0   : > { %3480 = vmatpush.bf16.msrb.mxu0 %v3410_v46  ;;  %3493 = vmatpush.bf16.msrb.mxu1 %v3413_v32  ;;  %v3605_v46 = vsel %vm219_vm0, %v3585_v40, 0  ;;  %v3608_v32 = vsel %vm219_vm0, %v3586_v28, 0 }
 0x3a2   : > { %v2580_v30 = vpop.f32.mrf.mxu2 }
 0x3a3   : > { %v2593_v43 = vpop.f32.mrf.mxu3 }
 0x3a4   : > { %v2554_v51 = vpop.f32.mrf.mxu0  ;;  %v2567_v36 = vpop.f32.mrf.mxu1 }
 0x3a7   : > { %7364 = vmatmul.msk.bf16.vlgmr.msra.gmra.mxu2 %vm302_vm4, %v7361_v27 }
 0x3a8   : > { %7365 = vmatmul.msk.bf16.vlgmr.msra.gmra.mxu3 %vm302_vm4, %v7361_v27  ;;  %3649 = vmatpush.bf16.msra.mxu2 %v3599_v8 }
 0x3a9   : > { %3662 = vmatpush.bf16.msra.mxu3 %v3602_v26 }
 0x3aa   : > { %v2722_v23 = vpop.f32.mrf.mxu2 }
 0x3ab   : > { %v2793_v55 = vadd.f32 %v2722_v23, %v8600_v48  ;;  %v2735_v24 = vpop.f32.mrf.mxu3  ;;  %v3578_v48 = vpop.permute.xlu0 %3577 }
 0x3ac   : > { %v2794_v25 = vadd.f32 %v2735_v24, %v8605_v16  ;;  %v2696_v17 = vpop.f32.mrf.mxu0  ;;  %v2709_v58 = vpop.f32.mrf.mxu1  ;;  %v3587_v38 = vsel %vm2455_vm14, %v3576_v10, %v3578_v48 }
 0x3ad   : > { %v2791_v42 = vadd.f32 %v2696_v17, %v8608_v61  ;;  %v2792_v53 = vadd.f32 %v2709_v58, %v8611_v0  ;;  %v3588_v61 = vsel %vm2455_vm14, %v3578_v48, %v3580_v5  ;;  %v3611_v12 = vsel %vm219_vm0, %v3587_v38, 0 }
 0x3ae   : > { %v3614_v21 = vsel %vm219_vm0, %v3588_v61, 0 }
 0x3af   : > { %7362 = vmatmul.msk.bf16.vlgmr.msra.gmra.mxu0 %vm302_vm4, %v7361_v27  ;;  %7363 = vmatmul.msk.bf16.vlgmr.msra.gmra.mxu1 %vm302_vm4, %v7361_v27 }
 0x3b0   : > { %3623 = vmatpush.bf16.msra.mxu0 %v3593_v59  ;;  %3636 = vmatpush.bf16.msra.mxu1 %v3596_v37 }
 0x3b2   : > { %v2724_v16 = vpop.f32.mrf.mxu2 }
 0x3b3   : > { %v2737_v13 = vpop.f32.mrf.mxu3 }
 0x3b4   : > { %v2698_v0 = vpop.f32.mrf.mxu0  ;;  %v2711_v39 = vpop.f32.mrf.mxu1 }
 0x3b7   : > { %7368 = vmatmul.msk.bf16.vlgmr.msrb.gmra.mxu2 %vm302_vm4, %v7361_v27 }
 0x3b8   : > { %7369 = vmatmul.msk.bf16.vlgmr.msrb.gmra.mxu3 %vm302_vm4, %v7361_v27  ;;  %3701 = vmatpush.bf16.msrb.mxu2 %v3611_v12 }
 0x3b9   : > { %3714 = vmatpush.bf16.msrb.mxu3 %v3614_v21 }
 0x3ba   : > { %v2774_v60 = vpop.f32.mrf.mxu2 }
 0x3bb   : > { %v2797_v47 = vadd.f32 %v2774_v60, %v8624_v41  ;;  %v2787_v15 = vpop.f32.mrf.mxu3 }
 0x3bc   : > { %v2798_v18 = vadd.f32 %v2787_v15, %v8629_v62  ;;  %v2748_v9 = vpop.f32.mrf.mxu0  ;;  %v2761_v33 = vpop.f32.mrf.mxu1  ;;  %v7370_v62 = vld [vmem:[%s9640_s1 + $0x22] sm:$0x3] }
 0x3bd   : > { %v2795_v6 = vadd.f32 %v2748_v9, %v8632_v31  ;;  %v2796_v29 = vadd.f32 %v2761_v33, %v8635_v63 }
 0x3bf   : > { %7366 = vmatmul.msk.bf16.vlgmr.msrb.gmra.mxu0 %vm302_vm4, %v7361_v27  ;;  %7367 = vmatmul.msk.bf16.vlgmr.msrb.gmra.mxu1 %vm302_vm4, %v7361_v27 }
 0x3c0   : > { %3675 = vmatpush.bf16.msrb.mxu0 %v3605_v46  ;;  %3688 = vmatpush.bf16.msrb.mxu1 %v3608_v32 }
 0x3c2   : > { %v2776_v41 = vpop.f32.mrf.mxu2 }
 0x3c3   : > { %v2789_v30 = vpop.f32.mrf.mxu3 }
 0x3c4   : > { %v2750_v22 = vpop.f32.mrf.mxu0  ;;  %v2763_v31 = vpop.f32.mrf.mxu1 }
 0x3c7   : > { %7373 = vmatmul.msk.bf16.vlgmr.msra.gmra.mxu2 %vm302_vm4, %v7370_v62 }
 0x3c8   : > { %7374 = vmatmul.msk.bf16.vlgmr.msra.gmra.mxu3 %vm302_vm4, %v7370_v62 }
 0x3ca   : > { %v2870_v63 = vpop.f32.mrf.mxu2 }
 0x3cb   : > { %v2941_v7 = vadd.f32 %v2870_v63, %v2793_v55  ;;  %v2883_v43 = vpop.f32.mrf.mxu3 }
 0x3cc   : > { %v2942_v19 = vadd.f32 %v2883_v43, %v2794_v25  ;;  %v2844_v51 = vpop.f32.mrf.mxu0  ;;  %v2857_v27 = vpop.f32.mrf.mxu1 }
 0x3cd   : > { %v2939_v36 = vadd.f32 %v2844_v51, %v2791_v42  ;;  %v2940_v8 = vadd.f32 %v2857_v27, %v2792_v53 }
 0x3cf   : > { %7371 = vmatmul.msk.bf16.vlgmr.msra.gmra.mxu0 %vm302_vm4, %v7370_v62  ;;  %7372 = vmatmul.msk.bf16.vlgmr.msra.gmra.mxu1 %vm302_vm4, %v7370_v62 }
 0x3d2   : > { %v2872_v44 = vpop.f32.mrf.mxu2 }
 0x3d3   : > { %v2885_v26 = vpop.f32.mrf.mxu3 }
 0x3d4   : > { %v2846_v54 = vpop.f32.mrf.mxu0  ;;  %v2859_v23 = vpop.f32.mrf.mxu1 }
 0x3d7   : > { %7377 = vmatmul.msk.bf16.vlgmr.msrb.gmra.mxu2 %vm302_vm4, %v7370_v62 }
 0x3d8   : > { %7378 = vmatmul.msk.bf16.vlgmr.msrb.gmra.mxu3 %vm302_vm4, %v7370_v62 }
 0x3da   : > { %v2922_v20 = vpop.f32.mrf.mxu2 }
 0x3db   : > { %v2945_v55 = vadd.f32 %v2922_v20, %v2797_v47  ;;  %v2935_v52 = vpop.f32.mrf.mxu3 }
 0x3dc   : > { %v2946_v24 = vadd.f32 %v2935_v52, %v2798_v18  ;;  %v2896_v25 = vpop.f32.mrf.mxu0  ;;  %v2909_v17 = vpop.f32.mrf.mxu1 }
 0x3dd   : > { %v2943_v58 = vadd.f32 %v2896_v25, %v2795_v6  ;;  %v2944_v42 = vadd.f32 %v2909_v17, %v2796_v29 }
 0x3df   : > { %7375 = vmatmul.msk.bf16.vlgmr.msrb.gmra.mxu0 %vm302_vm4, %v7370_v62  ;;  %7376 = vmatmul.msk.bf16.vlgmr.msrb.gmra.mxu1 %vm302_vm4, %v7370_v62 }
 0x3e2   : > { %v2924_v53 = vpop.f32.mrf.mxu2 }
 0x3e3   : > { %v2937_v10 = vpop.f32.mrf.mxu3 }
 0x3e4   : > { %v2898_v37 = vpop.f32.mrf.mxu0  ;;  %v2911_v59 = vpop.f32.mrf.mxu1 }
 0x3ea   : > { %v3066_v48 = vpop.f32.mrf.mxu2 }
 0x3eb   : > { %v3137_v5 = vadd.f32 %v3066_v48, %v2941_v7  ;;  %v3079_v16 = vpop.f32.mrf.mxu3 }
 0x3ec   : > { %v3138_v38 = vadd.f32 %v3079_v16, %v2942_v19  ;;  %v3040_v13 = vpop.f32.mrf.mxu0  ;;  %v3053_v61 = vpop.f32.mrf.mxu1 }
 0x3ed   : > { %v3135_v0 = vadd.f32 %v3040_v13, %v2939_v36  ;;  %v3136_v39 = vadd.f32 %v3053_v61, %v2940_v8 }
 0x3f2   : > { %v3068_v12 = vpop.f32.mrf.mxu2 }
 0x3f3   : > { %v3081_v21 = vpop.f32.mrf.mxu3 }
 0x3f4   : > { %v3042_v35 = vpop.f32.mrf.mxu0  ;;  %v3055_v60 = vpop.f32.mrf.mxu1 }
 0x3fa   : > { %v3118_v47 = vpop.f32.mrf.mxu2 }
 0x3fb   : > { %v8687_v40 = vadd.f32 %v3118_v47, %v2945_v55  ;;  %v3131_v28 = vpop.f32.mrf.mxu3 }
 0x3fc   : > { %v8689_v15 = vadd.f32 %v3131_v28, %v2946_v24  ;;  %v3092_v18 = vpop.f32.mrf.mxu0  ;;  %v3105_v9 = vpop.f32.mrf.mxu1 }
 0x3fd   : > { %v8691_v33 = vadd.f32 %v3092_v18, %v2943_v58  ;;  %v8693_v6 = vadd.f32 %v3105_v9, %v2944_v42 }
 0x402   : > { %v3120_v29 = vpop.f32.mrf.mxu2 }
 0x403   : > { %v3133_v46 = vpop.f32.mrf.mxu3 }
 0x404   : > { %v3094_v32 = vpop.f32.mrf.mxu0  ;;  %v3107_v41 = vpop.f32.mrf.mxu1 }
 0x405   : > { %v3745_v32 = vld.sshfl [vmem:[#allocation1 + $0x10] sm:$0xff pattern:$0x75316420] }
 0x40a   : > { %v3261_v30 = vpop.f32.mrf.mxu2 }
 0x40b   : > { %v3274_v62 = vpop.f32.mrf.mxu3  ;;  %v3332_v12 = vadd.f32 %v3261_v30, %v3137_v5  ;;  %v3744_v30 = vld.sshfl [vmem:[#allocation1 + $0x8] sm:$0xff pattern:$0x75316420] }
 0x40c   : > { %v3235_v22 = vpop.f32.mrf.mxu0  ;;  %v3248_v31 = vpop.f32.mrf.mxu1  ;;  %v3333_v21 = vadd.f32 %v3274_v62, %v3138_v38 }
 0x40d   : > { %v3330_v60 = vadd.f32 %v3235_v22, %v3135_v0  ;;  %v3331_v47 = vadd.f32 %v3248_v31, %v3136_v39 }
 0x412   : > { %v3263_v63 = vpop.f32.mrf.mxu2 }
 0x413   : > { %v3276_v7 = vpop.f32.mrf.mxu3 }
 0x414   : > { %v3237_v43 = vpop.f32.mrf.mxu0  ;;  %v3250_v19 = vpop.f32.mrf.mxu1 }
 0x41a   : > { %v8695_v51 = vpop.f32.mrf.mxu2 }
 0x41b   : > { %v8697_v27 = vpop.f32.mrf.mxu3 }
 0x41c   : > { %v8699_v36 = vpop.f32.mrf.mxu0  ;;  %v8701_v8 = vpop.f32.mrf.mxu1 }
 0x422   : > { %v3315_v44 = vpop.f32.mrf.mxu2 }
 0x423   : > { %v3328_v26 = vpop.f32.mrf.mxu3  ;;  %v3746_v44 = vld.sshfl [vmem:[#allocation1 + $0x18] sm:$0xff pattern:$0x75316420] }
 0x424   : > { %v3289_v54 = vpop.f32.mrf.mxu0  ;;  %v3302_v23 = vpop.f32.mrf.mxu1 }
 0x425   : > { %v3743_v54 = vld.sshfl [vmem:[#allocation1] sm:$0xff pattern:$0x75316420] }
 0x42a   : > { %v3456_v20 = vpop.f32.mrf.mxu2 }
 0x42b   : > { %v3469_v55 = vpop.f32.mrf.mxu3  ;;  %v3527_v35 = vadd.f32 %v3456_v20, %v3332_v12 }
 0x42c   : > { %v3430_v52 = vpop.f32.mrf.mxu0  ;;  %v3443_v24 = vpop.f32.mrf.mxu1  ;;  %v3528_v18 = vadd.f32 %v3469_v55, %v3333_v21 }
 0x42d   : > { %v3525_v29 = vadd.f32 %v3430_v52, %v3330_v60  ;;  %v3526_v46 = vadd.f32 %v3443_v24, %v3331_v47  ;;  %v2034_v24 = vadd.f32 %v8151_v45, %v7635_v2  ;;  %v3336_v2 = vadd.f32 %v8695_v51, %v8687_v40 }
 0x432   : > { %v3458_v25 = vpop.f32.mrf.mxu2 }
 0x433   : > { %v3471_v17 = vpop.f32.mrf.mxu3 }
 0x434   : > { %v3432_v58 = vpop.f32.mrf.mxu0  ;;  %v3445_v42 = vpop.f32.mrf.mxu1 }
 0x435   : > { %v2033_v42 = vadd.f32 %v8148_v50, %v7633_v1  ;;  %v3337_v50 = vadd.f32 %v8697_v27, %v8689_v15  ;;  %v3749_v15 = vld.sshfl [vmem:[#allocation1 + $0x30] sm:$0xff pattern:$0x75316420] }
 0x43a   : > { %v3508_v53 = vpop.f32.mrf.mxu2 }
 0x43b   : > { %v3521_v10 = vpop.f32.mrf.mxu3 }
 0x43c   : > { %v8703_v37 = vpop.f32.mrf.mxu0  ;;  %v8705_v59 = vpop.f32.mrf.mxu1  ;;  %v3532_v51 = vadd.f32 %v3521_v10, %v3337_v50 }
 0x442   : > { %v3510_v48 = vpop.f32.mrf.mxu2 }
 0x443   : > { %v3523_v16 = vpop.f32.mrf.mxu3 }
 0x444   : > { %v3484_v13 = vpop.f32.mrf.mxu0  ;;  %v3497_v61 = vpop.f32.mrf.mxu1 }
 0x44a   : > { %v3651_v28 = vpop.f32.mrf.mxu2 }
 0x44b   : > { %v3722_v9 = vadd.f32 %v3651_v28, %v3527_v35  ;;  %v3664_v41 = vpop.f32.mrf.mxu3  ;;  %v3531_v28 = vadd.f32 %v3508_v53, %v3336_v2 }
 0x44c   : > { %v3723_v7 = vadd.f32 %v3664_v41, %v3528_v18  ;;  %v3625_v43 = vpop.f32.mrf.mxu0  ;;  %v3638_v19 = vpop.f32.mrf.mxu1 }
 0x44d   : > { %v3730_v63 = vmax.f32 %v3722_v9, 0.0  ;;  %v3720_v26 = vadd.f32 %v3625_v43, %v3525_v29  ;;  %v3721_v23 = vadd.f32 %v3638_v19, %v3526_v46  ;;  %v3334_v9 = vadd.f32 %v8699_v36, %v8691_v33  ;;  %v3750_v19 = vld.sshfl [vmem:[#allocation1 + $0x38] sm:$0xff pattern:$0x75316420] }
 0x44e   : > { %v3731_v38 = vmax.f32 %v3723_v7, 0.0  ;;  %v3335_v29 = vadd.f32 %v8701_v8, %v8693_v6  ;;  %v3747_v36 = vld.sshfl [vmem:[#allocation1 + $0x20] sm:$0xff pattern:$0x75316420] }
 0x44f   : > { %v3761_v5 = vmul.f32 %v3745_v32, %v3730_v63  ;;  %v3728_v0 = vmax.f32 %v3720_v26, 0.0  ;;  %v3729_v39 = vmax.f32 %v3721_v23, 0.0  ;;  %v3529_v32 = vadd.f32 %v8703_v37, %v3334_v9  ;;  %v3748_v26 = vld.sshfl [vmem:[#allocation1 + $0x28] sm:$0xff pattern:$0x75316420] }
 0x450   : > { %v3762_v62 = vmul.f32 %v3746_v44, %v3731_v38  ;;  %v3530_v41 = vadd.f32 %v8705_v59, %v3335_v29 }
 0x451   : > { %v3759_v22 = vmul.f32 %v3743_v54, %v3728_v0  ;;  %v3760_v31 = vmul.f32 %v3744_v30, %v3729_v39  ;;  %v2036_v39 = vadd.f32 %v8171_v49, %v7639_v4 }
 0x452   : > { %v3653_v20 = vpop.f32.mrf.mxu2  ;;  %v3768_v55 = vpack.c.bf16 %v3762_v62, %v3761_v5  ;;  %v3808_v52 = vrot.slane %v3762_v62, 4 }
 0x453   : > { %v3767_v25 = vpack.c.bf16 %v3760_v31, %v3759_v22  ;;  %v3807_v17 = vrot.slane %v3760_v31, 4  ;;  %v3666_v58 = vpop.f32.mrf.mxu3  ;;  %v2035_v20 = vadd.f32 %v8165_v34, %v7637_v3 }
 0x454   : > { %v3776_v48 = vrot.slane %v3768_v55, 4  ;;  %v3777_v16 = vrot.slane %v3768_v55, 6  ;;  %v3812_v13 = vsel %vm227_vm2, %v3761_v5, %v3808_v52  ;;  %v3627_v61 = vpop.f32.mrf.mxu0  ;;  %v3640_v12 = vpop.f32.mrf.mxu1 }
 0x455   : > { %v8712_v21 = vadd.f32 %v3812_v13, %v2034_v24  ;;  %v3775_v35 = vrot.slane %v3767_v25, 2  ;;  %v3811_v60 = vsel %vm227_vm2, %v3759_v22, %v3807_v17 }
 0x456   : > { %v8717_v45 = vadd.f32 %v3811_v60, %v2033_v42  ;;  %v3786_v47 = vsel %vm223_vm1, %v3776_v48, %v3777_v16 }
 0x457   : > { %v3783_v1 = vsel %vm219_vm0, %v3767_v25, %v3775_v35 }
 0x458   : > { %v8724_v18 = vsel %vm227_vm2, %v3783_v1, %v3786_v47 }
 0x459   : > { %3797 = vst [vmem:[#allocation2 + $0x6] sm:$0xff] %v8724_v18 }
 0x45a   : > { %v3703_v40 = vpop.f32.mrf.mxu2 }
 0x45b   : > { %v3726_v46 = vadd.f32 %v3703_v40, %v3531_v28  ;;  %v3716_v27 = vpop.f32.mrf.mxu3 }
 0x45c   : > { %v3727_v63 = vadd.f32 %v3716_v27, %v3532_v51  ;;  %v3677_v7 = vpop.f32.mrf.mxu0  ;;  %v3690_v43 = vpop.f32.mrf.mxu1 }
 0x45d   : > { %v3734_v53 = vmax.f32 %v3726_v46, 0.0  ;;  %v3724_v33 = vadd.f32 %v3677_v7, %v3529_v32  ;;  %v3725_v44 = vadd.f32 %v3690_v43, %v3530_v41 }
 0x45e   : > { %v3735_v8 = vmax.f32 %v3727_v63, 0.0 }
 0x45f   : > { %v3765_v6 = vmul.f32 %v3749_v15, %v3734_v53  ;;  %v3732_v54 = vmax.f32 %v3724_v33, 0.0  ;;  %v3733_v10 = vmax.f32 %v3725_v44, 0.0 }
 0x460   : > { %v8733_v23 = vld [vmem:[#allocation2 + $0x4] sm:$0xff]  ;;  %v3766_v37 = vmul.f32 %v3750_v19, %v3735_v8 }
 0x461   : > { %3833 = vst [vmem:[#allocation1] ss:$4 sm:$0xff] %v8733_v23  ;;  %v3763_v59 = vmul.f32 %v3747_v36, %v3732_v54  ;;  %v3764_v5 = vmul.f32 %v3748_v26, %v3733_v10  ;;  %v3823_v60 = vld [vmem:[#allocation2 + $0x2] sm:$0xff] }
 0x462   : > { %v3705_v38 = vpop.f32.mrf.mxu2  ;;  %v3770_v30 = vpack.c.bf16 %v3766_v37, %v3765_v6  ;;  %v3810_v0 = vrot.slane %v3766_v37, 4 }
 0x463   : > { %v3769_v62 = vpack.c.bf16 %v3764_v5, %v3763_v59  ;;  %v3809_v22 = vrot.slane %v3764_v5, 4  ;;  %v3718_v31 = vpop.f32.mrf.mxu3 }
 0x464   : > { %v3779_v55 = vrot.slane %v3770_v30, 4  ;;  %v3780_v52 = vrot.slane %v3770_v30, 6  ;;  %v3814_v24 = vsel %vm227_vm2, %v3765_v6, %v3810_v0  ;;  %v3679_v25 = vpop.f32.mrf.mxu0  ;;  %v3692_v17 = vpop.f32.mrf.mxu1 }
 0x465   : > { %v8741_v58 = vadd.f32 %v3814_v24, %v2036_v39  ;;  %v3778_v42 = vrot.slane %v3769_v62, 2  ;;  %v3813_v48 = vsel %vm227_vm2, %v3763_v59, %v3809_v22 }
 0x466   : > { %v8744_v16 = vadd.f32 %v3813_v48, %v2035_v20  ;;  %v3793_v4 = vsel %vm223_vm1, %v3779_v55, %v3780_v52 }
 0x467   : > { %v3790_v49 = vsel %vm219_vm0, %v3769_v62, %v3778_v42 }
 0x468   : > { %v8749_v13 = vsel %vm227_vm2, %v3790_v49, %v3793_v4  ;;  %v3837_v3 = vld.sshfl [vmem:[#allocation1] sm:$0xff pattern:$0x73625140]  ;;  %v3838_v34 = vld.sshfl [vmem:[#allocation1 + $0x8] sm:$0xff pattern:$0x73625140] }
 0x469   : > { %3798 = vst [vmem:[#allocation2 + $0xe] sm:$0xff] %v8749_v13  ;;  %v3839_v61 = vld.sshfl [vmem:[#allocation1 + $0x10] sm:$0xff pattern:$0x73625140]  ;;  %v3848_v12 = vsel %vm219_vm0, %v3837_v3, 0  ;;  %v3850_v35 = vsel %vm219_vm0, %v3838_v34, 0 }
 0x46a   : > { %v3840_v2 = vld.sshfl [vmem:[#allocation1 + $0x18] sm:$0xff pattern:$0x73625140]  ;;  %3871 = vmatpush.bf16.msra.mxu0 %v3848_v12  ;;  %3884 = vmatpush.bf16.msra.mxu1 %v3850_v35  ;;  %v3852_v47 = vsel %vm219_vm0, %v3839_v61, 0 }
 0x46b   : > { %3969 = vst [vmem:[#allocation1] ss:$4 sm:$0xff] %v3823_v60  ;;  %3897 = vmatpush.bf16.msra.mxu2 %v3852_v47  ;;  %v3854_v1 = vsel %vm219_vm0, %v3840_v2, 0  ;;  %v4692_v47 = vld [vmem:[#allocation2 + $0x16] sm:$0x3] }
 0x46c   : > { %3910 = vmatpush.bf16.msra.mxu3 %v3854_v1 }
 0x470   : > { %v3829_v50 = vld [vmem:[#allocation2 + $0xc] sm:$0xff]  ;;  %v4153_v10 = vld [vmem:[#allocation2 + $0x14] sm:$0x3] }
 0x471   : > { %v3825_v28 = vld [vmem:[#allocation2 + $0x12] sm:$0x3]  ;;  %3836 = vst [vmem:[#allocation1 + $0x20] ss:$4 sm:$0xff] %v3829_v50  ;;  %v3824_v46 = vld [vmem:[#allocation2 + $0xa] sm:$0xff] }
 0x472   : > { %v3973_v9 = vld.sshfl [vmem:[#allocation1] sm:$0xff pattern:$0x73625140]  ;;  %v3975_v29 = vld.sshfl [vmem:[#allocation1 + $0x8] sm:$0xff pattern:$0x73625140] }
 0x473   : > { %v3977_v40 = vld.sshfl [vmem:[#allocation1 + $0x10] sm:$0xff pattern:$0x73625140]  ;;  %v3979_v51 = vld.sshfl [vmem:[#allocation1 + $0x18] sm:$0xff pattern:$0x73625140] }
 0x474   : > { %3990 = vst [vmem:[#allocation1] ss:$4 sm:$0xff] %v3825_v28  ;;  %3999 = vrot.lane.b32.xlu1 %v3979_v51, %s7593_s27  ;;  %3997 = vrot.lane.b32.xlu0 %v3977_v40, %s7593_s27  ;;  %v4349_v22 = vld [vmem:[#allocation2 + $0x14] sm:$0x3] }
 0x478   : > { %v3841_v32 = vld.sshfl [vmem:[#allocation1 + $0x20] sm:$0xff pattern:$0x73625140]  ;;  %v3842_v41 = vld.sshfl [vmem:[#allocation1 + $0x28] sm:$0xff pattern:$0x73625140] }
 0x479   : > { %v3843_v15 = vld.sshfl [vmem:[#allocation1 + $0x30] sm:$0xff pattern:$0x73625140]  ;;  %v3844_v27 = vld.sshfl [vmem:[#allocation1 + $0x38] sm:$0xff pattern:$0x73625140] }
 0x47a   : > { %3972 = vst [vmem:[#allocation1 + $0x20] ss:$4 sm:$0xff] %v3824_v46  ;;  %v3856_v53 = vsel %vm219_vm0, %v3841_v32, 0  ;;  %v3858_v63 = vsel %vm219_vm0, %v3842_v41, 0  ;;  %v3860_v7 = vsel %vm219_vm0, %v3843_v15, 0  ;;  %v3862_v43 = vsel %vm219_vm0, %v3844_v27, 0 }
 0x47b   : > { %v3991_v19 = vld.sshfl [vmem:[#allocation1] sm:$0xff pattern:$0x73625140]  ;;  %3923 = vmatpush.bf16.msrb.mxu0 %v3856_v53  ;;  %3936 = vmatpush.bf16.msrb.mxu1 %v3858_v63 }
 0x47c   : > { %4157 = vst [vmem:[#allocation1] ss:$4 sm:$0xff] %v8733_v23  ;;  %3995 = vrot.lane.b32.xlu1 %v3975_v29, %s7593_s27  ;;  %3993 = vrot.lane.b32.xlu0 %v3973_v9, %s7593_s27  ;;  %v5081_v29 = vld [vmem:[#allocation2 + $0x10] sm:$0xff]  ;;  %v7380_v32 = vld [vmem:[%s9640_s1 + $0x26] sm:$0x3] }
 0x47d   : > { %3949 = vmatpush.bf16.msrb.mxu2 %v3860_v7  ;;  %3962 = vmatpush.bf16.msrb.mxu3 %v3862_v43  ;;  %v4887_v7 = vld [vmem:[#allocation2 + $0x16] sm:$0x3] }
 0x47e   : > { %7383 = vmatmul.msk.bf16.vlgmr.msra.gmra.mxu2 %vm302_vm4, %v7380_v32  ;;  %7384 = vmatmul.msk.bf16.vlgmr.msra.gmra.mxu3 %vm302_vm4, %v7380_v32 }
 0x47f   : > { %7381 = vmatmul.msk.bf16.vlgmr.msra.gmra.mxu0 %vm302_vm4, %v7380_v32  ;;  %7382 = vmatmul.msk.bf16.vlgmr.msra.gmra.mxu1 %vm302_vm4, %v7380_v32 }
 0x481   : > { %v3981_v33 = vld.sshfl [vmem:[#allocation1 + $0x20] sm:$0xff pattern:$0x73625140]  ;;  %v3983_v36 = vld.sshfl [vmem:[#allocation1 + $0x28] sm:$0xff pattern:$0x73625140] }
 0x482   : > { %v3985_v44 = vld.sshfl [vmem:[#allocation1 + $0x30] sm:$0xff pattern:$0x73625140]  ;;  %v3987_v6 = vld.sshfl [vmem:[#allocation1 + $0x38] sm:$0xff pattern:$0x73625140]  ;;  %4001 = vrot.lane.b32.xlu2 %v3981_v33, %s7593_s27 }
 0x483   : > { %4160 = vst [vmem:[#allocation1 + $0x20] ss:$4 sm:$0xff] %v3829_v50  ;;  %v4161_v8 = vld.sshfl [vmem:[#allocation1] sm:$0xff pattern:$0x73625140] }
 0x484   : > { %v4163_v26 = vld.sshfl [vmem:[#allocation1 + $0x8] sm:$0xff pattern:$0x73625140]  ;;  %v4165_v54 = vld.sshfl [vmem:[#allocation1 + $0x10] sm:$0xff pattern:$0x73625140]  ;;  %4007 = vrot.lane.b32.xlu0 %v3987_v6, %s7593_s27  ;;  %4009 = vrot.lane.b32.xlu1 %v3991_v19, %s7593_s27 }
 0x485   : > { %v4167_v37 = vld.sshfl [vmem:[#allocation1 + $0x18] sm:$0xff pattern:$0x73625140] }
 0x486   : > { %4178 = vst [vmem:[#allocation1] ss:$4 sm:$0xff] %v4153_v10 }
 0x48a   : > { %v4169_v59 = vld.sshfl [vmem:[#allocation1 + $0x20] sm:$0xff pattern:$0x73625140]  ;;  %v4171_v5 = vld.sshfl [vmem:[#allocation1 + $0x28] sm:$0xff pattern:$0x73625140]  ;;  %4005 = vrot.lane.b32.xlu2 %v3985_v44, %s7593_s27 }
 0x48b   : > { %v4173_v38 = vld.sshfl [vmem:[#allocation1 + $0x30] sm:$0xff pattern:$0x73625140]  ;;  %v4175_v30 = vld.sshfl [vmem:[#allocation1 + $0x38] sm:$0xff pattern:$0x73625140] }
 0x48c   : > { %4356 = vst [vmem:[#allocation1 + $0x20] ss:$4 sm:$0xff] %v3829_v50  ;;  %4187 = vrot.lane.b32.xlu1 %v4167_v37, %s7594_s28  ;;  %4185 = vrot.lane.b32.xlu0 %v4165_v54, %s7594_s28  ;;  %v5080_v54 = vld [vmem:[#allocation2 + $0x8] sm:$0xff] }
 0x48d   : > { %v4179_v0 = vld.sshfl [vmem:[#allocation1] sm:$0xff pattern:$0x73625140] }
 0x48e   : > { %4353 = vst [vmem:[#allocation1] ss:$4 sm:$0xff] %v8733_v23  ;;  %7387 = vmatmul.msk.bf16.vlgmr.msrb.gmra.mxu2 %vm302_vm4, %v7380_v32  ;;  %7388 = vmatmul.msk.bf16.vlgmr.msrb.gmra.mxu3 %vm302_vm4, %v7380_v32 }
 0x48f   : > { %7385 = vmatmul.msk.bf16.vlgmr.msrb.gmra.mxu0 %vm302_vm4, %v7380_v32  ;;  %7386 = vmatmul.msk.bf16.vlgmr.msrb.gmra.mxu1 %vm302_vm4, %v7380_v32 }
 0x492   : > { %4003 = vrot.lane.b32.xlu2 %v3983_v36, %s7593_s27 }
 0x493   : > { %v4365_v39 = vld.sshfl [vmem:[#allocation1 + $0x20] sm:$0xff pattern:$0x73625140]  ;;  %v8773_v62 = vld.sshfl [vmem:[#allocation1 + $0x28] sm:$0xff pattern:$0x73625140] }
 0x494   : > { %v4369_v31 = vld.sshfl [vmem:[#allocation1 + $0x30] sm:$0xff pattern:$0x73625140]  ;;  %v4371_v20 = vld.sshfl [vmem:[#allocation1 + $0x38] sm:$0xff pattern:$0x73625140]  ;;  %4183 = vrot.lane.b32.xlu1 %v4163_v26, %s7594_s28  ;;  %4181 = vrot.lane.b32.xlu0 %v4161_v8, %s7594_s28 }
 0x495   : > { %v4357_v55 = vld.sshfl [vmem:[#allocation1] sm:$0xff pattern:$0x73625140]  ;;  %v4359_v52 = vld.sshfl [vmem:[#allocation1 + $0x8] sm:$0xff pattern:$0x73625140] }
 0x496   : > { %v4361_v24 = vld.sshfl [vmem:[#allocation1 + $0x10] sm:$0xff pattern:$0x73625140]  ;;  %v4363_v25 = vld.sshfl [vmem:[#allocation1 + $0x18] sm:$0xff pattern:$0x73625140] }
 0x497   : > { %4374 = vst [vmem:[#allocation1] ss:$4 sm:$0xff] %v4349_v22 }
 0x498   : > { %4550 = vst [vmem:[#allocation1 + $0x20] ss:$4 sm:$0xff] %v8749_v13 }
 0x49a   : > { %4189 = vrot.lane.b32.xlu2 %v4169_v59, %s7594_s28 }
 0x49c   : > { %4195 = vrot.lane.b32.xlu0 %v4175_v30, %s7594_s28  ;;  %4197 = vrot.lane.b32.xlu1 %v4179_v0, %s7594_s28 }
 0x49e   : > { %v4375_v23 = vld.sshfl [vmem:[#allocation1] sm:$0xff pattern:$0x73625140] }
 0x49f   : > { %4547 = vst [vmem:[#allocation1] ss:$4 sm:$0xff] %v8724_v18  ;;  %v8782_v17 = vld.sshfl [vmem:[#allocation1 + $0x20] sm:$0xff pattern:$0x73625140] }
 0x4a0   : > { %v8784_v42 = vld.sshfl [vmem:[#allocation1 + $0x28] sm:$0xff pattern:$0x73625140]  ;;  %v8786_v48 = vld.sshfl [vmem:[#allocation1 + $0x30] sm:$0xff pattern:$0x73625140] }
 0x4a1   : > { %v8788_v4 = vld.sshfl [vmem:[#allocation1 + $0x38] sm:$0xff pattern:$0x73625140] }
 0x4a2   : > { %4699 = vst [vmem:[#allocation1 + $0x20] ss:$4 sm:$0xff] %v8749_v13  ;;  %4193 = vrot.lane.b32.xlu2 %v4173_v38, %s7594_s28 }
 0x4a4   : > { %4383 = vrot.lane.b32.xlu1 %v4363_v25, %s7593_s27  ;;  %4381 = vrot.lane.b32.xlu0 %v4361_v24, %s7593_s27  ;;  %v7379_v25 = vld [vmem:[%s9640_s1 + $0x24] sm:$0x3] }
 0x4a6   : > { %v8794_v49 = vld.sshfl [vmem:[#allocation1] sm:$0xff pattern:$0x73625140]  ;;  %v8796_v3 = vld.sshfl [vmem:[#allocation1 + $0x8] sm:$0xff pattern:$0x73625140] }
 0x4a7   : > { %v8798_v34 = vld.sshfl [vmem:[#allocation1 + $0x10] sm:$0xff pattern:$0x73625140]  ;;  %v8800_v61 = vld.sshfl [vmem:[#allocation1 + $0x18] sm:$0xff pattern:$0x73625140] }
 0x4a8   : > { %4696 = vst [vmem:[#allocation1] ss:$4 sm:$0xff] %v8724_v18 }
 0x4a9   : > { %v4708_v12 = vld.sshfl [vmem:[#allocation1 + $0x20] sm:$0xff pattern:$0x73625140]  ;;  %v8803_v35 = vld.sshfl [vmem:[#allocation1 + $0x28] sm:$0xff pattern:$0x73625140] }
 0x4aa   : > { %v8805_v60 = vld.sshfl [vmem:[#allocation1 + $0x30] sm:$0xff pattern:$0x73625140]  ;;  %v4714_v2 = vld.sshfl [vmem:[#allocation1 + $0x38] sm:$0xff pattern:$0x73625140]  ;;  %4191 = vrot.lane.b32.xlu2 %v4171_v5, %s7594_s28 }
 0x4ab   : > { %4894 = vst [vmem:[#allocation1 + $0x20] ss:$4 sm:$0xff] %v8749_v13 }
 0x4ac   : > { %4379 = vrot.lane.b32.xlu1 %v4359_v52, %s7593_s27  ;;  %4377 = vrot.lane.b32.xlu0 %v4357_v55, %s7593_s27 }
 0x4af   : > { %v4700_v1 = vld.sshfl [vmem:[#allocation1] sm:$0xff pattern:$0x73625140]  ;;  %v4702_v50 = vld.sshfl [vmem:[#allocation1 + $0x8] sm:$0xff pattern:$0x73625140] }
 0x4b0   : > { %v4704_v28 = vld.sshfl [vmem:[#allocation1 + $0x10] sm:$0xff pattern:$0x73625140]  ;;  %v4706_v9 = vld.sshfl [vmem:[#allocation1 + $0x18] sm:$0xff pattern:$0x73625140] }
 0x4b1   : > { %4717 = vst [vmem:[#allocation1] ss:$4 sm:$0xff] %v4692_v47 }
 0x4b2   : > { %v8811_v40 = vld.sshfl [vmem:[#allocation1 + $0x20] sm:$0xff pattern:$0x73625140]  ;;  %v8813_v51 = vld.sshfl [vmem:[#allocation1 + $0x28] sm:$0xff pattern:$0x73625140]  ;;  %4385 = vrot.lane.b32.xlu2 %v4365_v39, %s7593_s27 }
 0x4b3   : > { %v8816_v46 = vld.sshfl [vmem:[#allocation1 + $0x30] sm:$0xff pattern:$0x73625140]  ;;  %v8818_v13 = vld.sshfl [vmem:[#allocation1 + $0x38] sm:$0xff pattern:$0x73625140] }
 0x4b4   : > { %5088 = vst [vmem:[#allocation1 + $0x20] ss:$4 sm:$0xff] %v5081_v29  ;;  %4391 = vrot.lane.b32.xlu0 %v4371_v20, %s7593_s27  ;;  %4393 = vrot.lane.b32.xlu1 %v4375_v23, %s7593_s27 }
 0x4b8   : > { %v4718_v41 = vld.sshfl [vmem:[#allocation1] sm:$0xff pattern:$0x73625140] }
 0x4b9   : > { %4891 = vst [vmem:[#allocation1] ss:$4 sm:$0xff] %v8724_v18 }
 0x4ba   : > { %4389 = vrot.lane.b32.xlu2 %v4369_v31, %s7593_s27 }
 0x4bb   : > { %v8831_v15 = vld.sshfl [vmem:[#allocation1 + $0x20] sm:$0xff pattern:$0x73625140]  ;;  %v8833_v27 = vld.sshfl [vmem:[#allocation1 + $0x28] sm:$0xff pattern:$0x73625140] }
 0x4bc   : > { %v8835_v53 = vld.sshfl [vmem:[#allocation1 + $0x30] sm:$0xff pattern:$0x73625140]  ;;  %v8837_v63 = vld.sshfl [vmem:[#allocation1 + $0x38] sm:$0xff pattern:$0x73625140]  ;;  %4726 = vrot.lane.b32.xlu1 %v4706_v9, %s7594_s28  ;;  %4724 = vrot.lane.b32.xlu0 %v4704_v28, %s7594_s28 }
 0x4bd   : > { %5237 = vst [vmem:[#allocation1 + $0x20] ss:$4 sm:$0xff] %v5081_v29 }
 0x4c0   : > { %v4895_v43 = vld.sshfl [vmem:[#allocation1] sm:$0xff pattern:$0x73625140]  ;;  %v4897_v19 = vld.sshfl [vmem:[#allocation1 + $0x8] sm:$0xff pattern:$0x73625140] }
 0x4c1   : > { %v4899_v33 = vld.sshfl [vmem:[#allocation1 + $0x10] sm:$0xff pattern:$0x73625140]  ;;  %v4901_v18 = vld.sshfl [vmem:[#allocation1 + $0x18] sm:$0xff pattern:$0x73625140] }
 0x4c2   : > { %4912 = vst [vmem:[#allocation1] ss:$4 sm:$0xff] %v4887_v7  ;;  %4387 = vrot.lane.b32.xlu2 %v8773_v62, %s7593_s27 }
 0x4c4   : > { %4722 = vrot.lane.b32.xlu1 %v4702_v50, %s7594_s28  ;;  %4720 = vrot.lane.b32.xlu0 %v4700_v1, %s7594_s28  ;;  %v8845_v36 = vld.sshfl [vmem:[#allocation1 + $0x20] sm:$0xff pattern:$0x73625140]  ;;  %v8849_v44 = vld.sshfl [vmem:[#allocation1 + $0x38] sm:$0xff pattern:$0x73625140] }
 0x4c5   : > { %v8851_v6 = vld.sshfl [vmem:[#allocation1 + $0x30] sm:$0xff pattern:$0x73625140]  ;;  %v8856_v8 = vld.sshfl [vmem:[#allocation1 + $0x28] sm:$0xff pattern:$0x73625140] }
 0x4c6   : > { %5437 = vst [vmem:[#allocation1 + $0x30] ss:$2 sm:$0xff] %v8142_v11 }
 0x4c7   : > { %5435 = vst [vmem:[#allocation1 + $0x20] ss:$2 sm:$0xff] %v8136_v57  ;;  %v5230_v57 = vld [vmem:[#allocation2 + $0x18] sm:$0x3] }
 0x4c9   : > { %v4913_v26 = vld.sshfl [vmem:[#allocation1] sm:$0xff pattern:$0x73625140] }
 0x4ca   : > { %5085 = vst [vmem:[#allocation1] ss:$4 sm:$0xff] %v5080_v54  ;;  %4728 = vrot.lane.b32.xlu2 %v4708_v12, %s7594_s28 }
 0x4cc   : > { %4734 = vrot.lane.b32.xlu0 %v4714_v2, %s7594_s28  ;;  %4736 = vrot.lane.b32.xlu1 %v4718_v41, %s7594_s28 }
 0x4d1   : > { %v8862_v10 = vld.sshfl [vmem:[#allocation1 + $0x10] sm:$0xff pattern:$0x73625140]  ;;  %v8864_v37 = vld.sshfl [vmem:[#allocation1 + $0x18] sm:$0xff pattern:$0x73625140] }
 0x4d2   : > { %v8866_v59 = vld.sshfl [vmem:[#allocation1] sm:$0xff pattern:$0x73625140]  ;;  %v8868_v11 = vld.sshfl [vmem:[#allocation1 + $0x8] sm:$0xff pattern:$0x73625140]  ;;  %4732 = vrot.lane.b32.xlu2 %v8805_v60, %s7594_s28 }
 0x4d3   : > { %5234 = vst [vmem:[#allocation1] ss:$4 sm:$0xff] %v5080_v54 }
 0x4d4   : > { %4921 = vrot.lane.b32.xlu1 %v4901_v18, %s7593_s27  ;;  %4919 = vrot.lane.b32.xlu0 %v4899_v33, %s7593_s27 }
 0x4da   : > { %4730 = vrot.lane.b32.xlu2 %v8803_v35, %s7594_s28  ;;  %v5244_v5 = vld.sshfl [vmem:[#allocation1 + $0x18] sm:$0xff pattern:$0x73625140]  ;;  %v5242_v38 = vld.sshfl [vmem:[#allocation1 + $0x10] sm:$0xff pattern:$0x73625140] }
 0x4db   : > { %v5240_v30 = vld.sshfl [vmem:[#allocation1 + $0x8] sm:$0xff pattern:$0x73625140]  ;;  %v5238_v0 = vld.sshfl [vmem:[#allocation1] sm:$0xff pattern:$0x73625140] }
 0x4dc   : > { %4917 = vrot.lane.b32.xlu1 %v4897_v19, %s7593_s27  ;;  %4915 = vrot.lane.b32.xlu0 %v4895_v43, %s7593_s27  ;;  %v4002_v39 = vpop.permute.xlu2 %4001  ;;  %5255 = vst [vmem:[#allocation1] ss:$4 sm:$0xff] %v5230_v57 }
 0x4dd   : > { %5433 = vst [vmem:[#allocation1 + $0x10] ss:$2 sm:$0xff] %v7742_v56 }
 0x4e2   : > { %4923 = vrot.lane.b32.xlu2 %v8811_v40, %s7593_s27 }
 0x4e3   : > { %v5256_v62 = vld.sshfl [vmem:[#allocation1] sm:$0xff pattern:$0x73625140] }
 0x4e4   : > { %4929 = vrot.lane.b32.xlu0 %v8818_v13, %s7593_s27  ;;  %4931 = vrot.lane.b32.xlu1 %v4913_v26, %s7593_s27  ;;  %v4006_v22 = vpop.permute.xlu2 %4005  ;;  %5431 = vst [vmem:[#allocation1] ss:$2 sm:$0xff] %v7770_v14 }
 0x4e6   : > { %v4000_v31 = vpop.permute.xlu1 %3999  ;;  %v3998_v20 = vpop.permute.xlu0 %3997 }
 0x4e7   : > { %v4015_v55 = vsel %vm302_vm4, %v4000_v31, %v4002_v39  ;;  %v4014_v52 = vsel %vm302_vm4, %v3998_v20, %v4000_v31  ;;  %v7397_v31 = vld [vmem:[%s9640_s1 + $0x28] sm:$0x3] }
 0x4e8   : > { %v4033_v56 = vsel %vm219_vm0, %v4015_v55, 0  ;;  %v4030_v24 = vsel %vm219_vm0, %v4014_v52, 0 }
 0x4e9   : > { %4080 = vmatpush.bf16.msra.mxu2 %v4030_v24  ;;  %4093 = vmatpush.bf16.msra.mxu3 %v4033_v56 }
 0x4ea   : > { %4927 = vrot.lane.b32.xlu2 %v8816_v46, %s7593_s27 }
 0x4ec   : > { %7391 = vmatmul.msk.bf16.vlgmr.msra.gmra.mxu2 %vm302_vm4, %v7379_v25  ;;  %7392 = vmatmul.msk.bf16.vlgmr.msra.gmra.mxu3 %vm302_vm4, %v7379_v25  ;;  %v4004_v14 = vpop.permute.xlu2 %4003 }
 0x4ed   : > { %5264 = vrot.lane.b32.xlu1 %v5244_v5, %s7594_s28  ;;  %5262 = vrot.lane.b32.xlu0 %v5242_v38, %s7594_s28  ;;  %v4016_v23 = vsel %vm302_vm4, %v4002_v39, %v4004_v14  ;;  %v4017_v12 = vsel %vm302_vm4, %v4004_v14, %v4006_v22 }
 0x4ee   : > { %v3996_v35 = vpop.permute.xlu1 %3995  ;;  %v3994_v60 = vpop.permute.xlu0 %3993  ;;  %v4036_v2 = vsel %vm219_vm0, %v4016_v23, 0  ;;  %v4039_v47 = vsel %vm219_vm0, %v4017_v12, 0 }
 0x4ef   : > { %v4013_v1 = vsel %vm302_vm4, %v3996_v35, %v3998_v20  ;;  %v4012_v50 = vsel %vm302_vm4, %v3994_v60, %v3996_v35 }
 0x4f0   : > { %v4027_v28 = vsel %vm219_vm0, %v4013_v1, 0  ;;  %v4024_v9 = vsel %vm219_vm0, %v4012_v50, 0 }
 0x4f1   : > { %4054 = vmatpush.bf16.msra.mxu0 %v4024_v9  ;;  %4067 = vmatpush.bf16.msra.mxu1 %v4027_v28 }
 0x4f2   : > { %4925 = vrot.lane.b32.xlu2 %v8813_v51, %s7593_s27 }
 0x4f4   : > { %7389 = vmatmul.msk.bf16.vlgmr.msra.gmra.mxu0 %vm302_vm4, %v7379_v25  ;;  %7390 = vmatmul.msk.bf16.vlgmr.msra.gmra.mxu1 %vm302_vm4, %v7379_v25  ;;  %v4190_v29 = vpop.permute.xlu2 %4189 }
 0x4f5   : > { %4106 = vmatpush.bf16.msrb.mxu0 %v4036_v2  ;;  %4119 = vmatpush.bf16.msrb.mxu1 %v4039_v47 }
 0x4f6   : > { %5260 = vrot.lane.b32.xlu1 %v5240_v30, %s7594_s28  ;;  %5258 = vrot.lane.b32.xlu0 %v5238_v0, %s7594_s28  ;;  %v4008_v40 = vpop.permute.xlu0 %4007  ;;  %v4010_v46 = vpop.permute.xlu1 %4009 }
 0x4f7   : > { %v4018_v13 = vsel %vm302_vm4, %v4006_v22, %v4008_v40  ;;  %v4019_v32 = vsel %vm302_vm4, %v4008_v40, %v4010_v46 }
 0x4f8   : > { %v4042_v41 = vsel %vm219_vm0, %v4018_v13, 0  ;;  %v4045_v7 = vsel %vm219_vm0, %v4019_v32, 0 }
 0x4f9   : > { %4132 = vmatpush.bf16.msrb.mxu2 %v4042_v41  ;;  %4145 = vmatpush.bf16.msrb.mxu3 %v4045_v7 }
 0x4fa   : > { %5266 = vrot.lane.b32.xlu2 %v8845_v36, %s7594_s28 }
 0x4fc   : > { %7395 = vmatmul.msk.bf16.vlgmr.msrb.gmra.mxu2 %vm302_vm4, %v7379_v25  ;;  %7396 = vmatmul.msk.bf16.vlgmr.msrb.gmra.mxu3 %vm302_vm4, %v7379_v25  ;;  %v4194_v51 = vpop.permute.xlu2 %4193 }
 0x4fe   : > { %5272 = vrot.lane.b32.xlu0 %v8849_v44, %s7594_s28  ;;  %5274 = vrot.lane.b32.xlu1 %v5256_v62, %s7594_s28  ;;  %v4188_v43 = vpop.permute.xlu1 %4187  ;;  %v4186_v19 = vpop.permute.xlu0 %4185 }
 0x4ff   : > { %v4203_v33 = vsel %vm4199_vm5, %v4188_v43, %v4190_v29  ;;  %v4202_v18 = vsel %vm4199_vm5, %v4186_v19, %v4188_v43 }
 0x500   : > { %v4221_v26 = vsel %vm219_vm0, %v4203_v33, 0  ;;  %v4218_v36 = vsel %vm219_vm0, %v4202_v18, 0 }
 0x501   : > { %4268 = vmatpush.bf16.msra.mxu2 %v4218_v36  ;;  %4281 = vmatpush.bf16.msra.mxu3 %v4221_v26  ;;  %v7406_v36 = vld [vmem:[%s9640_s1 + $0x2a] sm:$0x3] }
 0x502   : > { %5270 = vrot.lane.b32.xlu2 %v8851_v6, %s7594_s28 }
 0x504   : > { %7393 = vmatmul.msk.bf16.vlgmr.msrb.gmra.mxu0 %vm302_vm4, %v7379_v25  ;;  %7394 = vmatmul.msk.bf16.vlgmr.msrb.gmra.mxu1 %vm302_vm4, %v7379_v25  ;;  %v4192_v44 = vpop.permute.xlu2 %4191 }
 0x505   : > { %v4204_v54 = vsel %vm4199_vm5, %v4190_v29, %v4192_v44  ;;  %v4205_v57 = vsel %vm4199_vm5, %v4192_v44, %v4194_v51  ;;  %v4566_v44 = vsel %vm219_vm0, %v8798_v34, 0  ;;  %v8991_v34 = vpop.f32.mrf.mxu2 }
 0x506   : > { %v4184_v5 = vpop.permute.xlu1 %4183  ;;  %v4182_v38 = vpop.permute.xlu0 %4181  ;;  %v4224_v30 = vsel %vm219_vm0, %v4204_v54, 0  ;;  %v4227_v0 = vsel %vm219_vm0, %v4205_v57, 0  ;;  %v4568_v54 = vsel %vm219_vm0, %v8800_v61, 0 }
 0x507   : > { %v4201_v39 = vsel %vm4199_vm5, %v4184_v5, %v4186_v19  ;;  %v4200_v62 = vsel %vm4199_vm5, %v4182_v38, %v4184_v5  ;;  %v8981_v57 = vpop.f32.mrf.mxu0  ;;  %v8983_v5 = vpop.f32.mrf.mxu1  ;;  %v4562_v38 = vsel %vm219_vm0, %v8794_v49, 0  ;;  %v4576_v49 = vsel %vm219_vm0, %v8788_v4, 0 }
 0x508   : > { %v4215_v6 = vsel %vm219_vm0, %v4201_v39, 0  ;;  %v4212_v22 = vsel %vm219_vm0, %v4200_v62, 0  ;;  %v8993_v61 = vpop.f32.mrf.mxu3  ;;  %v4574_v62 = vsel %vm219_vm0, %v8786_v48, 0  ;;  %v4570_v48 = vsel %vm219_vm0, %v8782_v17, 0 }
 0x509   : > { %4242 = vmatpush.bf16.msra.mxu0 %v4212_v22  ;;  %4255 = vmatpush.bf16.msra.mxu1 %v4215_v6  ;;  %v4572_v4 = vsel %vm219_vm0, %v8784_v42, 0 }
 0x50a   : > { %5268 = vrot.lane.b32.xlu2 %v8856_v8, %s7594_s28 }
 0x50c   : > { %7400 = vmatmul.msk.bf16.vlgmr.msra.gmra.mxu2 %vm302_vm4, %v7397_v31  ;;  %7401 = vmatmul.msk.bf16.vlgmr.msra.gmra.mxu3 %vm302_vm4, %v7397_v31  ;;  %v4386_v20 = vpop.permute.xlu2 %4385 }
 0x50d   : > { %4294 = vmatpush.bf16.msrb.mxu0 %v4224_v30  ;;  %4307 = vmatpush.bf16.msrb.mxu1 %v4227_v0  ;;  %v4564_v30 = vsel %vm219_vm0, %v8796_v3, 0  ;;  %v3901_v3 = vpop.f32.mrf.mxu2 }
 0x50e   : > { %v4196_v55 = vpop.permute.xlu0 %4195  ;;  %v4198_v52 = vpop.permute.xlu1 %4197 }
 0x50f   : > { %v4206_v56 = vsel %vm4199_vm5, %v4194_v51, %v4196_v55  ;;  %v4207_v24 = vsel %vm4199_vm5, %v4196_v55, %v4198_v52  ;;  %v3875_v0 = vpop.f32.mrf.mxu0  ;;  %v3888_v39 = vpop.f32.mrf.mxu1 }
 0x510   : > { %v4230_v25 = vsel %vm219_vm0, %v4206_v56, 0  ;;  %v4233_v14 = vsel %vm219_vm0, %v4207_v24, 0  ;;  %v3914_v6 = vpop.f32.mrf.mxu3 }
 0x511   : > { %4320 = vmatpush.bf16.msrb.mxu2 %v4230_v25  ;;  %4333 = vmatpush.bf16.msrb.mxu3 %v4233_v14 }
 0x514   : > { %7398 = vmatmul.msk.bf16.vlgmr.msra.gmra.mxu0 %vm302_vm4, %v7397_v31  ;;  %7399 = vmatmul.msk.bf16.vlgmr.msra.gmra.mxu1 %vm302_vm4, %v7397_v31  ;;  %v4390_v8 = vpop.permute.xlu2 %4389 }
 0x515   : > { %v9011_v56 = vpop.f32.mrf.mxu2 }
 0x516   : > { %v4384_v23 = vpop.permute.xlu1 %4383  ;;  %v4382_v12 = vpop.permute.xlu0 %4381 }
 0x517   : > { %v4398_v35 = vsel %vm302_vm4, %v4384_v23, %v4386_v20  ;;  %v4397_v60 = vsel %vm302_vm4, %v4382_v12, %v4384_v23  ;;  %v9003_v55 = vpop.f32.mrf.mxu1 }
 0x518   : > { %v4416_v2 = vsel %vm219_vm0, %v4398_v35, 0  ;;  %v4413_v47 = vsel %vm219_vm0, %v4397_v60, 0  ;;  %v9013_v24 = vpop.f32.mrf.mxu3 }
 0x519   : > { %4463 = vmatpush.bf16.msra.mxu2 %v4413_v47  ;;  %4476 = vmatpush.bf16.msra.mxu3 %v4416_v2 }
 0x51c   : > { %7404 = vmatmul.msk.bf16.vlgmr.msrb.gmra.mxu2 %vm302_vm4, %v7397_v31  ;;  %7405 = vmatmul.msk.bf16.vlgmr.msrb.gmra.mxu3 %vm302_vm4, %v7397_v31  ;;  %v4388_v1 = vpop.permute.xlu2 %4387 }
 0x51d   : > { %v4399_v13 = vsel %vm302_vm4, %v4386_v20, %v4388_v1  ;;  %v4400_v32 = vsel %vm302_vm4, %v4388_v1, %v4390_v8  ;;  %v9001_v20 = vpop.f32.mrf.mxu0  ;;  %v3953_v2 = vpop.f32.mrf.mxu2 }
 0x51e   : > { %v4380_v50 = vpop.permute.xlu1 %4379  ;;  %v4378_v28 = vpop.permute.xlu0 %4377  ;;  %v4419_v41 = vsel %vm219_vm0, %v4399_v13, 0  ;;  %v4422_v7 = vsel %vm219_vm0, %v4400_v32, 0 }
 0x51f   : > { %v4396_v9 = vsel %vm302_vm4, %v4380_v50, %v4382_v12  ;;  %v4395_v29 = vsel %vm302_vm4, %v4378_v28, %v4380_v50  ;;  %v3940_v17 = vpop.f32.mrf.mxu1 }
 0x520   : > { %v4410_v40 = vsel %vm219_vm0, %v4396_v9, 0  ;;  %v4407_v46 = vsel %vm219_vm0, %v4395_v29, 0  ;;  %v3966_v47 = vpop.f32.mrf.mxu3 }
 0x521   : > { %4437 = vmatpush.bf16.msra.mxu0 %v4407_v46  ;;  %4450 = vmatpush.bf16.msra.mxu1 %v4410_v40 }
 0x524   : > { %7402 = vmatmul.msk.bf16.vlgmr.msrb.gmra.mxu0 %vm302_vm4, %v7397_v31  ;;  %7403 = vmatmul.msk.bf16.vlgmr.msrb.gmra.mxu1 %vm302_vm4, %v7397_v31  ;;  %v4729_v52 = vpop.permute.xlu2 %4728 }
 0x525   : > { %4489 = vmatpush.bf16.msrb.mxu0 %v4419_v41  ;;  %4502 = vmatpush.bf16.msrb.mxu1 %v4422_v7  ;;  %v3927_v23 = vpop.f32.mrf.mxu0 }
 0x526   : > { %v4392_v51 = vpop.permute.xlu0 %4391  ;;  %v4394_v43 = vpop.permute.xlu1 %4393 }
 0x527   : > { %v4401_v19 = vsel %vm302_vm4, %v4390_v8, %v4392_v51  ;;  %v4402_v33 = vsel %vm302_vm4, %v4392_v51, %v4394_v43  ;;  %v7415_v8 = vld [vmem:[%s9640_s1 + $0x2c] sm:$0x3] }
 0x528   : > { %v4425_v18 = vsel %vm219_vm0, %v4401_v19, 0  ;;  %v4428_v26 = vsel %vm219_vm0, %v4402_v33, 0 }
 0x529   : > { %4515 = vmatpush.bf16.msrb.mxu2 %v4425_v18  ;;  %4528 = vmatpush.bf16.msrb.mxu3 %v4428_v26 }
 0x52c   : > { %7409 = vmatmul.msk.bf16.vlgmr.msra.gmra.mxu2 %vm302_vm4, %v7406_v36  ;;  %7410 = vmatmul.msk.bf16.vlgmr.msra.gmra.mxu3 %vm302_vm4, %v7406_v36  ;;  %v4733_v28 = vpop.permute.xlu2 %4732 }
 0x52d   : > { %4611 = vmatpush.bf16.msra.mxu2 %v4566_v44  ;;  %4624 = vmatpush.bf16.msra.mxu3 %v4568_v54 }
 0x52e   : > { %v4727_v22 = vpop.permute.xlu1 %4726  ;;  %v4725_v31 = vpop.permute.xlu0 %4724 }
 0x52f   : > { %v4741_v25 = vsel %vm4199_vm5, %v4727_v22, %v4729_v52  ;;  %v4740_v14 = vsel %vm4199_vm5, %v4725_v31, %v4727_v22 }
 0x530   : > { %v4759_v12 = vsel %vm219_vm0, %v4741_v25, 0  ;;  %v4756_v42 = vsel %vm219_vm0, %v4740_v14, 0 }
 0x534   : > { %7407 = vmatmul.msk.bf16.vlgmr.msra.gmra.mxu0 %vm302_vm4, %v7406_v36  ;;  %7408 = vmatmul.msk.bf16.vlgmr.msra.gmra.mxu1 %vm302_vm4, %v7406_v36  ;;  %v4731_v51 = vpop.permute.xlu2 %4730 }
 0x535   : > { %4585 = vmatpush.bf16.msra.mxu0 %v4562_v38  ;;  %4598 = vmatpush.bf16.msra.mxu1 %v4564_v30  ;;  %v4742_v43 = vsel %vm4199_vm5, %v4729_v52, %v4731_v51  ;;  %v4743_v19 = vsel %vm4199_vm5, %v4731_v51, %v4733_v28  ;;  %v7424_v30 = vld [vmem:[%s9640_s1 + $0x2e] sm:$0x3] }
 0x536   : > { %v4723_v35 = vpop.permute.xlu1 %4722  ;;  %v4721_v60 = vpop.permute.xlu0 %4720  ;;  %v4762_v26 = vsel %vm219_vm0, %v4742_v43, 0 }
 0x537   : > { %v4739_v1 = vsel %vm4199_vm5, %v4723_v35, %v4725_v31  ;;  %v4738_v50 = vsel %vm4199_vm5, %v4721_v60, %v4723_v35 }
 0x538   : > { %v4753_v9 = vsel %vm219_vm0, %v4739_v1, 0  ;;  %v4750_v29 = vsel %vm219_vm0, %v4738_v50, 0 }
 0x53c   : > { %7413 = vmatmul.msk.bf16.vlgmr.msrb.gmra.mxu2 %vm302_vm4, %v7406_v36  ;;  %7414 = vmatmul.msk.bf16.vlgmr.msrb.gmra.mxu3 %vm302_vm4, %v7406_v36  ;;  %v4924_v44 = vpop.permute.xlu2 %4923 }
 0x53d   : > { %4663 = vmatpush.bf16.msrb.mxu2 %v4574_v62  ;;  %4676 = vmatpush.bf16.msrb.mxu3 %v4576_v49 }
 0x53e   : > { %v4735_v40 = vpop.permute.xlu0 %4734  ;;  %v4737_v46 = vpop.permute.xlu1 %4736 }
 0x53f   : > { %v4744_v13 = vsel %vm4199_vm5, %v4733_v28, %v4735_v40  ;;  %v4745_v32 = vsel %vm4199_vm5, %v4735_v40, %v4737_v46 }
 0x540   : > { %v4768_v41 = vsel %vm219_vm0, %v4744_v13, 0  ;;  %v4771_v7 = vsel %vm219_vm0, %v4745_v32, 0 }
 0x544   : > { %7411 = vmatmul.msk.bf16.vlgmr.msrb.gmra.mxu0 %vm302_vm4, %v7406_v36  ;;  %7412 = vmatmul.msk.bf16.vlgmr.msrb.gmra.mxu1 %vm302_vm4, %v7406_v36  ;;  %v4765_v36 = vsel %vm219_vm0, %v4743_v19, 0  ;;  %v4928_v23 = vpop.permute.xlu2 %4927 }
 0x545   : > { %4637 = vmatpush.bf16.msrb.mxu0 %v4570_v48  ;;  %4650 = vmatpush.bf16.msrb.mxu1 %v4572_v4 }
 0x546   : > { %v4922_v33 = vpop.permute.xlu1 %4921  ;;  %v4920_v18 = vpop.permute.xlu0 %4919 }
 0x547   : > { %v4936_v54 = vsel %vm302_vm4, %v4922_v33, %v4924_v44  ;;  %v4935_v38 = vsel %vm302_vm4, %v4920_v18, %v4922_v33 }
 0x548   : > { %v4954_v0 = vsel %vm219_vm0, %v4936_v54, 0  ;;  %v4951_v39 = vsel %vm219_vm0, %v4935_v38, 0 }
 0x54c   : > { %7418 = vmatmul.msk.bf16.vlgmr.msra.gmra.mxu2 %vm302_vm4, %v7415_v8  ;;  %7419 = vmatmul.msk.bf16.vlgmr.msra.gmra.mxu3 %vm302_vm4, %v7415_v8  ;;  %v4926_v50 = vpop.permute.xlu2 %4925 }
 0x54d   : > { %4806 = vmatpush.bf16.msra.mxu2 %v4756_v42  ;;  %4819 = vmatpush.bf16.msra.mxu3 %v4759_v12  ;;  %v4938_v40 = vsel %vm302_vm4, %v4926_v50, %v4928_v23 }
 0x54e   : > { %v4918_v62 = vpop.permute.xlu1 %4917  ;;  %v4916_v49 = vpop.permute.xlu0 %4915  ;;  %v4960_v19 = vsel %vm219_vm0, %v4938_v40, 0 }
 0x54f   : > { %v4934_v22 = vsel %vm302_vm4, %v4918_v62, %v4920_v18  ;;  %v4933_v31 = vsel %vm302_vm4, %v4916_v49, %v4918_v62 }
 0x550   : > { %v4948_v17 = vsel %vm219_vm0, %v4934_v22, 0  ;;  %v4945_v12 = vsel %vm219_vm0, %v4933_v31, 0  ;;  %v5112_v31 = vsel %vm219_vm0, %v8835_v53, 0  ;;  %v5108_v53 = vsel %vm219_vm0, %v8831_v15, 0 }
 0x554   : > { %7416 = vmatmul.msk.bf16.vlgmr.msra.gmra.mxu0 %vm302_vm4, %v7415_v8  ;;  %7417 = vmatmul.msk.bf16.vlgmr.msra.gmra.mxu1 %vm302_vm4, %v7415_v8 }
 0x555   : > { %4780 = vmatpush.bf16.msra.mxu0 %v4750_v29  ;;  %4793 = vmatpush.bf16.msra.mxu1 %v4753_v9  ;;  %v4937_v29 = vsel %vm302_vm4, %v4924_v44, %v4926_v50 }
 0x556   : > { %v4932_v42 = vpop.permute.xlu1 %4931  ;;  %v4957_v43 = vsel %vm219_vm0, %v4937_v29, 0 }
 0x55c   : > { %7422 = vmatmul.msk.bf16.vlgmr.msrb.gmra.mxu2 %vm302_vm4, %v7415_v8  ;;  %7423 = vmatmul.msk.bf16.vlgmr.msrb.gmra.mxu3 %vm302_vm4, %v7415_v8 }
 0x55d   : > { %4858 = vmatpush.bf16.msrb.mxu2 %v4768_v41  ;;  %4871 = vmatpush.bf16.msrb.mxu3 %v4771_v7 }
 0x564   : > { %7420 = vmatmul.msk.bf16.vlgmr.msrb.gmra.mxu0 %vm302_vm4, %v7415_v8  ;;  %7421 = vmatmul.msk.bf16.vlgmr.msrb.gmra.mxu1 %vm302_vm4, %v7415_v8 }
 0x565   : > { %4832 = vmatpush.bf16.msrb.mxu0 %v4762_v26  ;;  %4845 = vmatpush.bf16.msrb.mxu1 %v4765_v36  ;;  %v5106_v26 = vsel %vm219_vm0, %v8864_v37, 0  ;;  %v5102_v37 = vsel %vm219_vm0, %v8868_v11, 0 }
 0x56c   : > { %7427 = vmatmul.msk.bf16.vlgmr.msra.gmra.mxu2 %vm302_vm4, %v7424_v30  ;;  %7428 = vmatmul.msk.bf16.vlgmr.msra.gmra.mxu3 %vm302_vm4, %v7424_v30 }
 0x56d   : > { %5001 = vmatpush.bf16.msra.mxu2 %v4951_v39  ;;  %5014 = vmatpush.bf16.msra.mxu3 %v4954_v0 }
 0x56f   : > { %v4082_v3 = vpop.f32.mrf.mxu2  ;;  %v4095_v6 = vpop.f32.mrf.mxu3 }
 0x570   : > { %v4083_v48 = vadd.f32 %v4082_v3, %v8991_v34  ;;  %v4096_v4 = vadd.f32 %v4095_v6, %v8993_v61  ;;  %v4930_v34 = vpop.permute.xlu0 %4929 }
 0x571   : > { %v4056_v52 = vpop.f32.mrf.mxu0  ;;  %v4069_v25 = vpop.f32.mrf.mxu1  ;;  %v4939_v60 = vsel %vm302_vm4, %v4928_v23, %v4930_v34 }
 0x572   : > { %v4057_v14 = vadd.f32 %v4056_v52, %v8981_v57  ;;  %v4070_v8 = vadd.f32 %v4069_v25, %v8983_v5  ;;  %v4940_v57 = vsel %vm302_vm4, %v4930_v34, %v4932_v42  ;;  %v4963_v47 = vsel %vm219_vm0, %v4939_v60, 0  ;;  %v5267_v34 = vpop.permute.xlu2 %5266 }
 0x573   : > { %v4966_v1 = vsel %vm219_vm0, %v4940_v57, 0 }
 0x574   : > { %7425 = vmatmul.msk.bf16.vlgmr.msra.gmra.mxu0 %vm302_vm4, %v7424_v30  ;;  %7426 = vmatmul.msk.bf16.vlgmr.msra.gmra.mxu1 %vm302_vm4, %v7424_v30 }
 0x575   : > { %4975 = vmatpush.bf16.msra.mxu0 %v4945_v12  ;;  %4988 = vmatpush.bf16.msra.mxu1 %v4948_v17 }
 0x577   : > { %v4084_v61 = vpop.f32.mrf.mxu2  ;;  %v4097_v35 = vpop.f32.mrf.mxu3 }
 0x578   : > { %v5263_v23 = vpop.permute.xlu0 %5262 }
 0x579   : > { %v4058_v5 = vpop.f32.mrf.mxu0  ;;  %v4071_v2 = vpop.f32.mrf.mxu1 }
 0x57a   : > { %v7442_v2 = vld [vmem:[%s9640_s1 + $0x32] sm:$0x3] }
 0x57c   : > { %7431 = vmatmul.msk.bf16.vlgmr.msrb.gmra.mxu2 %vm302_vm4, %v7424_v30  ;;  %7432 = vmatmul.msk.bf16.vlgmr.msrb.gmra.mxu3 %vm302_vm4, %v7424_v30 }
 0x57d   : > { %5053 = vmatpush.bf16.msrb.mxu2 %v4963_v47  ;;  %5066 = vmatpush.bf16.msrb.mxu3 %v4966_v1 }
 0x57f   : > { %v4134_v28 = vpop.f32.mrf.mxu2  ;;  %v4147_v9 = vpop.f32.mrf.mxu3 }
 0x580   : > { %v4135_v46 = vadd.f32 %v4134_v28, %v9011_v56  ;;  %v4148_v13 = vadd.f32 %v4147_v9, %v9013_v24  ;;  %v5259_v1 = vpop.permute.xlu0 %5258 }
 0x581   : > { %v4108_v32 = vpop.f32.mrf.mxu0  ;;  %v4121_v41 = vpop.f32.mrf.mxu1 }
 0x582   : > { %v4109_v7 = vadd.f32 %v4108_v32, %v9001_v20  ;;  %v4122_v51 = vadd.f32 %v4121_v41, %v9003_v55  ;;  %v7433_v20 = vld [vmem:[%s9640_s1 + $0x30] sm:$0x3]  ;;  %v5104_v55 = vsel %vm219_vm0, %v8862_v10, 0  ;;  %v5100_v10 = vsel %vm219_vm0, %v8866_v59, 0 }
 0x584   : > { %7429 = vmatmul.msk.bf16.vlgmr.msrb.gmra.mxu0 %vm302_vm4, %v7424_v30  ;;  %7430 = vmatmul.msk.bf16.vlgmr.msrb.gmra.mxu1 %vm302_vm4, %v7424_v30 }
 0x585   : > { %5027 = vmatpush.bf16.msrb.mxu0 %v4957_v43  ;;  %5040 = vmatpush.bf16.msrb.mxu1 %v4960_v19 }
 0x587   : > { %v4136_v33 = vpop.f32.mrf.mxu2  ;;  %v4149_v56 = vpop.f32.mrf.mxu3 }
 0x588   : > { %v5273_v33 = vpop.permute.xlu0 %5272 }
 0x589   : > { %v4110_v18 = vpop.f32.mrf.mxu0  ;;  %v4123_v24 = vpop.f32.mrf.mxu1 }
 0x58c   : > { %7436 = vmatmul.msk.bf16.vlgmr.msra.gmra.mxu2 %vm302_vm4, %v7433_v20  ;;  %7437 = vmatmul.msk.bf16.vlgmr.msra.gmra.mxu3 %vm302_vm4, %v7433_v20 }
 0x58d   : > { %5149 = vmatpush.bf16.msra.mxu2 %v5104_v55  ;;  %5162 = vmatpush.bf16.msra.mxu3 %v5106_v26 }
 0x58f   : > { %v4270_v36 = vpop.f32.mrf.mxu2  ;;  %v4283_v44 = vpop.f32.mrf.mxu3 }
 0x590   : > { %v4341_v54 = vadd.f32 %v4270_v36, %v4083_v48  ;;  %v4342_v38 = vadd.f32 %v4283_v44, %v4096_v4  ;;  %v5114_v48 = vsel %vm219_vm0, %v8837_v63, 0  ;;  %v5110_v63 = vsel %vm219_vm0, %v8833_v27, 0 }
 0x591   : > { %v4244_v30 = vpop.f32.mrf.mxu0  ;;  %v4257_v0 = vpop.f32.mrf.mxu1 }
 0x592   : > { %v4339_v39 = vadd.f32 %v4244_v30, %v4057_v14  ;;  %v4340_v62 = vadd.f32 %v4257_v0, %v4070_v8  ;;  %v5265_v8 = vpop.permute.xlu1 %5264 }
 0x593   : > { %v5279_v35 = vsel %vm4199_vm5, %v5265_v8, %v5267_v34  ;;  %v5278_v60 = vsel %vm4199_vm5, %v5263_v23, %v5265_v8 }
 0x594   : > { %7434 = vmatmul.msk.bf16.vlgmr.msra.gmra.mxu0 %vm302_vm4, %v7433_v20  ;;  %7435 = vmatmul.msk.bf16.vlgmr.msra.gmra.mxu1 %vm302_vm4, %v7433_v20  ;;  %v5297_v15 = vsel %vm219_vm0, %v5279_v35, 0  ;;  %v5294_v47 = vsel %vm219_vm0, %v5278_v60, 0 }
 0x595   : > { %5123 = vmatpush.bf16.msra.mxu0 %v5100_v10  ;;  %5136 = vmatpush.bf16.msra.mxu1 %v5102_v37 }
 0x597   : > { %v4272_v49 = vpop.f32.mrf.mxu2  ;;  %v4285_v3 = vpop.f32.mrf.mxu3 }
 0x599   : > { %v4246_v6 = vpop.f32.mrf.mxu0  ;;  %v4259_v22 = vpop.f32.mrf.mxu1 }
 0x59a   : > { %v5261_v27 = vpop.permute.xlu1 %5260 }
 0x59b   : > { %v5277_v9 = vsel %vm4199_vm5, %v5261_v27, %v5263_v23  ;;  %v5276_v29 = vsel %vm4199_vm5, %v5259_v1, %v5261_v27 }
 0x59c   : > { %7440 = vmatmul.msk.bf16.vlgmr.msrb.gmra.mxu2 %vm302_vm4, %v7433_v20  ;;  %7441 = vmatmul.msk.bf16.vlgmr.msrb.gmra.mxu3 %vm302_vm4, %v7433_v20  ;;  %v5291_v43 = vsel %vm219_vm0, %v5277_v9, 0  ;;  %v5288_v19 = vsel %vm219_vm0, %v5276_v29, 0 }
 0x59d   : > { %5201 = vmatpush.bf16.msrb.mxu2 %v5112_v31  ;;  %5214 = vmatpush.bf16.msrb.mxu3 %v5114_v48 }
 0x59f   : > { %v4322_v59 = vpop.f32.mrf.mxu2  ;;  %v4335_v11 = vpop.f32.mrf.mxu3 }
 0x5a0   : > { %v9098_v4 = vadd.f32 %v4322_v59, %v4135_v46  ;;  %v9100_v52 = vadd.f32 %v4335_v11, %v4148_v13 }
 0x5a1   : > { %v4296_v25 = vpop.f32.mrf.mxu0  ;;  %v4309_v14 = vpop.f32.mrf.mxu1 }
 0x5a2   : > { %v9102_v17 = vadd.f32 %v4296_v25, %v4109_v7  ;;  %v9104_v12 = vadd.f32 %v4309_v14, %v4122_v51  ;;  %v5271_v51 = vpop.permute.xlu2 %5270  ;;  %v5275_v56 = vpop.permute.xlu1 %5274  ;;  %v7451_v25 = vld [vmem:[%s9640_s1 + $0x34] sm:$0x3] }
 0x5a3   : > { %v5283_v55 = vsel %vm4199_vm5, %v5273_v33, %v5275_v56 }
 0x5a4   : > { %7438 = vmatmul.msk.bf16.vlgmr.msrb.gmra.mxu0 %vm302_vm4, %v7433_v20  ;;  %7439 = vmatmul.msk.bf16.vlgmr.msrb.gmra.mxu1 %vm302_vm4, %v7433_v20  ;;  %v5282_v20 = vsel %vm4199_vm5, %v5271_v51, %v5273_v33 }
 0x5a5   : > { %5175 = vmatpush.bf16.msrb.mxu0 %v5108_v53  ;;  %5188 = vmatpush.bf16.msrb.mxu1 %v5110_v63  ;;  %v5306_v44 = vsel %vm219_vm0, %v5282_v20, 0 }
 0x5a7   : > { %v4324_v42 = vpop.f32.mrf.mxu2  ;;  %v4337_v61 = vpop.f32.mrf.mxu3 }
 0x5a9   : > { %v4298_v57 = vpop.f32.mrf.mxu0  ;;  %v4311_v5 = vpop.f32.mrf.mxu1 }
 0x5ac   : > { %7445 = vmatmul.msk.bf16.vlgmr.msra.gmra.mxu2 %vm302_vm4, %v7442_v2  ;;  %7446 = vmatmul.msk.bf16.vlgmr.msra.gmra.mxu3 %vm302_vm4, %v7442_v2 }
 0x5ad   : > { %5344 = vmatpush.bf16.msra.mxu2 %v5294_v47  ;;  %5357 = vmatpush.bf16.msra.mxu3 %v5297_v15 }
 0x5af   : > { %v4465_v50 = vpop.f32.mrf.mxu2  ;;  %v4478_v28 = vpop.f32.mrf.mxu3 }
 0x5b0   : > { %v4536_v40 = vadd.f32 %v4465_v50, %v4341_v54  ;;  %v4537_v46 = vadd.f32 %v4478_v28, %v4342_v38  ;;  %v5309_v54 = vsel %vm219_vm0, %v5283_v55, 0  ;;  %v5269_v38 = vpop.permute.xlu2 %5268 }
 0x5b1   : > { %v4439_v13 = vpop.f32.mrf.mxu0  ;;  %v4452_v32 = vpop.f32.mrf.mxu1 }
 0x5b2   : > { %v4534_v41 = vadd.f32 %v4439_v13, %v4339_v39  ;;  %v4535_v7 = vadd.f32 %v4452_v32, %v4340_v62  ;;  %v5280_v39 = vsel %vm4199_vm5, %v5267_v34, %v5269_v38  ;;  %v5281_v62 = vsel %vm4199_vm5, %v5269_v38, %v5271_v51 }
 0x5b3   : > { %v5300_v31 = vsel %vm219_vm0, %v5280_v39, 0  ;;  %v5303_v48 = vsel %vm219_vm0, %v5281_v62, 0 }
 0x5b4   : > { %7443 = vmatmul.msk.bf16.vlgmr.msra.gmra.mxu0 %vm302_vm4, %v7442_v2  ;;  %7444 = vmatmul.msk.bf16.vlgmr.msra.gmra.mxu1 %vm302_vm4, %v7442_v2 }
 0x5b5   : > { %5318 = vmatpush.bf16.msra.mxu0 %v5288_v19  ;;  %5331 = vmatpush.bf16.msra.mxu1 %v5291_v43 }
 0x5b7   : > { %v4467_v18 = vpop.f32.mrf.mxu2  ;;  %v4480_v24 = vpop.f32.mrf.mxu3 }
 0x5b9   : > { %v4441_v26 = vpop.f32.mrf.mxu0  ;;  %v4454_v36 = vpop.f32.mrf.mxu1 }
 0x5bc   : > { %7449 = vmatmul.msk.bf16.vlgmr.msrb.gmra.mxu2 %vm302_vm4, %v7442_v2  ;;  %7450 = vmatmul.msk.bf16.vlgmr.msrb.gmra.mxu3 %vm302_vm4, %v7442_v2 }
 0x5bd   : > { %5396 = vmatpush.bf16.msrb.mxu2 %v5306_v44  ;;  %5409 = vmatpush.bf16.msrb.mxu3 %v5309_v54 }
 0x5bf   : > { %v4517_v30 = vpop.f32.mrf.mxu2  ;;  %v4530_v0 = vpop.f32.mrf.mxu3 }
 0x5c0   : > { %v4540_v10 = vadd.f32 %v4517_v30, %v9098_v4  ;;  %v4541_v37 = vadd.f32 %v4530_v0, %v9100_v52 }
 0x5c1   : > { %v4491_v49 = vpop.f32.mrf.mxu0  ;;  %v4504_v3 = vpop.f32.mrf.mxu1 }
 0x5c2   : > { %v4538_v6 = vadd.f32 %v4491_v49, %v9102_v17  ;;  %v4539_v22 = vadd.f32 %v4504_v3, %v9104_v12 }
 0x5c4   : > { %7447 = vmatmul.msk.bf16.vlgmr.msrb.gmra.mxu0 %vm302_vm4, %v7442_v2  ;;  %7448 = vmatmul.msk.bf16.vlgmr.msrb.gmra.mxu1 %vm302_vm4, %v7442_v2 }
 0x5c5   : > { %5370 = vmatpush.bf16.msrb.mxu0 %v5300_v31  ;;  %5383 = vmatpush.bf16.msrb.mxu1 %v5303_v48 }
 0x5c7   : > { %v4519_v59 = vpop.f32.mrf.mxu2  ;;  %v4532_v11 = vpop.f32.mrf.mxu3 }
 0x5c9   : > { %v4493_v4 = vpop.f32.mrf.mxu0  ;;  %v4506_v52 = vpop.f32.mrf.mxu1 }
 0x5cc   : > { %7454 = vmatmul.msk.bf16.vlgmr.msra.gmra.mxu2 %vm302_vm4, %v7451_v25  ;;  %7455 = vmatmul.msk.bf16.vlgmr.msra.gmra.mxu3 %vm302_vm4, %v7451_v25 }
 0x5cf   : > { %v4613_v14 = vpop.f32.mrf.mxu2  ;;  %v4626_v8 = vpop.f32.mrf.mxu3 }
 0x5d0   : > { %v4684_v23 = vadd.f32 %v4613_v14, %v4536_v40  ;;  %v4685_v17 = vadd.f32 %v4626_v8, %v4537_v46 }
 0x5d1   : > { %v4587_v12 = vpop.f32.mrf.mxu0  ;;  %v4600_v53 = vpop.f32.mrf.mxu1 }
 0x5d2   : > { %v4682_v63 = vadd.f32 %v4587_v12, %v4534_v41  ;;  %v4683_v34 = vadd.f32 %v4600_v53, %v4535_v7 }
 0x5d4   : > { %7452 = vmatmul.msk.bf16.vlgmr.msra.gmra.mxu0 %vm302_vm4, %v7451_v25  ;;  %7453 = vmatmul.msk.bf16.vlgmr.msra.gmra.mxu1 %vm302_vm4, %v7451_v25 }
 0x5d7   : > { %v4615_v42 = vpop.f32.mrf.mxu2  ;;  %v4628_v61 = vpop.f32.mrf.mxu3 }
 0x5d9   : > { %v4589_v35 = vpop.f32.mrf.mxu0  ;;  %v4602_v60 = vpop.f32.mrf.mxu1 }
 0x5dc   : > { %7458 = vmatmul.msk.bf16.vlgmr.msrb.gmra.mxu2 %vm302_vm4, %v7451_v25  ;;  %7459 = vmatmul.msk.bf16.vlgmr.msrb.gmra.mxu3 %vm302_vm4, %v7451_v25 }
 0x5df   : > { %v4665_v57 = vpop.f32.mrf.mxu2  ;;  %v4678_v5 = vpop.f32.mrf.mxu3 }
 0x5e0   : > { %v4688_v2 = vadd.f32 %v4665_v57, %v4540_v10  ;;  %v4689_v15 = vadd.f32 %v4678_v5, %v4541_v37 }
 0x5e1   : > { %v4639_v47 = vpop.f32.mrf.mxu0  ;;  %v4652_v27 = vpop.f32.mrf.mxu1 }
 0x5e2   : > { %v4686_v1 = vadd.f32 %v4639_v47, %v4538_v6  ;;  %v4687_v50 = vadd.f32 %v4652_v27, %v4539_v22 }
 0x5e4   : > { %7456 = vmatmul.msk.bf16.vlgmr.msrb.gmra.mxu0 %vm302_vm4, %v7451_v25  ;;  %7457 = vmatmul.msk.bf16.vlgmr.msrb.gmra.mxu1 %vm302_vm4, %v7451_v25 }
 0x5e7   : > { %v4667_v28 = vpop.f32.mrf.mxu2  ;;  %v4680_v9 = vpop.f32.mrf.mxu3 }
 0x5e9   : > { %v4641_v29 = vpop.f32.mrf.mxu0  ;;  %v4654_v40 = vpop.f32.mrf.mxu1 }
 0x5ef   : > { %v4808_v46 = vpop.f32.mrf.mxu2  ;;  %v4821_v13 = vpop.f32.mrf.mxu3 }
 0x5f0   : > { %v4879_v32 = vadd.f32 %v4808_v46, %v4684_v23  ;;  %v4880_v41 = vadd.f32 %v4821_v13, %v4685_v17 }
 0x5f1   : > { %v4782_v7 = vpop.f32.mrf.mxu0  ;;  %v4795_v51 = vpop.f32.mrf.mxu1 }
 0x5f2   : > { %v4877_v43 = vadd.f32 %v4782_v7, %v4682_v63  ;;  %v4878_v19 = vadd.f32 %v4795_v51, %v4683_v34 }
 0x5f7   : > { %v4810_v33 = vpop.f32.mrf.mxu2  ;;  %v4823_v56 = vpop.f32.mrf.mxu3 }
 0x5f9   : > { %v4784_v18 = vpop.f32.mrf.mxu0  ;;  %v4797_v24 = vpop.f32.mrf.mxu1 }
 0x5fa   : > { %v5440_v24 = vld.sshfl [vmem:[#allocation1 + $0x10] sm:$0xff pattern:$0x75316420] }
 0x5ff   : > { %v4860_v20 = vpop.f32.mrf.mxu2  ;;  %v4873_v55 = vpop.f32.mrf.mxu3 }
 0x600   : > { %v9154_v26 = vadd.f32 %v4860_v20, %v4688_v2  ;;  %v9156_v36 = vadd.f32 %v4873_v55, %v4689_v15 }
 0x601   : > { %v4834_v44 = vpop.f32.mrf.mxu0  ;;  %v4847_v54 = vpop.f32.mrf.mxu1 }
 0x602   : > { %v9158_v38 = vadd.f32 %v4834_v44, %v4686_v1  ;;  %v9160_v30 = vadd.f32 %v4847_v54, %v4687_v50  ;;  %v5441_v54 = vld.sshfl [vmem:[#allocation1 + $0x18] sm:$0xff pattern:$0x75316420] }
 0x607   : > { %v4862_v0 = vpop.f32.mrf.mxu2  ;;  %v4875_v39 = vpop.f32.mrf.mxu3 }
 0x608   : > { %v5438_v39 = vld.sshfl [vmem:[#allocation1] sm:$0xff pattern:$0x75316420] }
 0x609   : > { %v4836_v62 = vpop.f32.mrf.mxu0  ;;  %v4849_v10 = vpop.f32.mrf.mxu1 }
 0x60f   : > { %v5003_v37 = vpop.f32.mrf.mxu2  ;;  %v5016_v49 = vpop.f32.mrf.mxu3 }
 0x610   : > { %v5074_v28 = vadd.f32 %v5003_v37, %v4879_v32  ;;  %v5075_v9 = vadd.f32 %v5016_v49, %v4880_v41  ;;  %v5439_v41 = vld.sshfl [vmem:[#allocation1 + $0x8] sm:$0xff pattern:$0x75316420] }
 0x611   : > { %v4977_v3 = vpop.f32.mrf.mxu0  ;;  %v4990_v6 = vpop.f32.mrf.mxu1 }
 0x612   : > { %v5072_v29 = vadd.f32 %v4977_v3, %v4877_v43  ;;  %v5073_v40 = vadd.f32 %v4990_v6, %v4878_v19 }
 0x617   : > { %v5005_v22 = vpop.f32.mrf.mxu2  ;;  %v5018_v31 = vpop.f32.mrf.mxu3 }
 0x619   : > { %v4979_v48 = vpop.f32.mrf.mxu0  ;;  %v4992_v59 = vpop.f32.mrf.mxu1 }
 0x61f   : > { %v9162_v11 = vpop.f32.mrf.mxu2  ;;  %v9164_v4 = vpop.f32.mrf.mxu3 }
 0x621   : > { %v9166_v52 = vpop.f32.mrf.mxu0  ;;  %v9168_v25 = vpop.f32.mrf.mxu1 }
 0x627   : > { %v5057_v14 = vpop.f32.mrf.mxu2  ;;  %v5070_v8 = vpop.f32.mrf.mxu3 }
 0x629   : > { %v5031_v23 = vpop.f32.mrf.mxu0  ;;  %v5044_v17 = vpop.f32.mrf.mxu1 }
 0x62f   : > { %v5151_v12 = vpop.f32.mrf.mxu2  ;;  %v5164_v53 = vpop.f32.mrf.mxu3 }
 0x630   : > { %v5222_v46 = vadd.f32 %v5151_v12, %v5074_v28  ;;  %v5223_v13 = vadd.f32 %v5164_v53, %v5075_v9 }
 0x631   : > { %v5125_v63 = vpop.f32.mrf.mxu0  ;;  %v5138_v34 = vpop.f32.mrf.mxu1 }
 0x632   : > { %v5220_v7 = vadd.f32 %v5125_v63, %v5072_v29  ;;  %v5221_v51 = vadd.f32 %v5138_v34, %v5073_v40 }
 0x637   : > { %v5153_v42 = vpop.f32.mrf.mxu2  ;;  %v5166_v61 = vpop.f32.mrf.mxu3 }
 0x639   : > { %v5127_v35 = vpop.f32.mrf.mxu0  ;;  %v5140_v60 = vpop.f32.mrf.mxu1 }
 0x63f   : > { %v5203_v57 = vpop.f32.mrf.mxu2  ;;  %v5216_v5 = vpop.f32.mrf.mxu3 }
 0x641   : > { %v5177_v2 = vpop.f32.mrf.mxu0  ;;  %v5190_v15 = vpop.f32.mrf.mxu1 }
 0x647   : > { %v5205_v47 = vpop.f32.mrf.mxu2  ;;  %v5218_v27 = vpop.f32.mrf.mxu3 }
 0x648   : > { %v5078_v27 = vadd.f32 %v9162_v11, %v9154_v26 }
 0x649   : > { %v5179_v1 = vpop.f32.mrf.mxu0  ;;  %v5192_v50 = vpop.f32.mrf.mxu1 }
 0x64a   : > { %v5079_v1 = vadd.f32 %v9164_v4, %v9156_v36  ;;  %v5226_v28 = vadd.f32 %v5203_v57, %v5078_v27 }
 0x64c   : > { %v5227_v9 = vadd.f32 %v5216_v5, %v5079_v1 }
 0x64f   : > { %v5346_v33 = vpop.f32.mrf.mxu2  ;;  %v5359_v56 = vpop.f32.mrf.mxu3 }
 0x650   : > { %v5417_v18 = vadd.f32 %v5346_v33, %v5222_v46  ;;  %v5418_v20 = vadd.f32 %v5359_v56, %v5223_v13  ;;  %v5444_v13 = vld.sshfl [vmem:[#allocation1 + $0x30] sm:$0xff pattern:$0x75316420]  ;;  %v5442_v56 = vld.sshfl [vmem:[#allocation1 + $0x20] sm:$0xff pattern:$0x75316420] }
 0x651   : > { %v5320_v55 = vpop.f32.mrf.mxu0  ;;  %v5333_v44 = vpop.f32.mrf.mxu1 }
 0x652   : > { %v5415_v0 = vadd.f32 %v5320_v55, %v5220_v7  ;;  %v5416_v62 = vadd.f32 %v5333_v44, %v5221_v51  ;;  %v5425_v10 = vmax.f32 %v5417_v18, 0.0  ;;  %v5426_v32 = vmax.f32 %v5418_v20, 0.0  ;;  %v5445_v51 = vld.sshfl [vmem:[#allocation1 + $0x38] sm:$0xff pattern:$0x75316420] }
 0x654   : > { %v5423_v43 = vmax.f32 %v5415_v0, 0.0  ;;  %v5424_v19 = vmax.f32 %v5416_v62, 0.0  ;;  %v5456_v37 = vmul.f32 %v5440_v24, %v5425_v10  ;;  %v5457_v49 = vmul.f32 %v5441_v54, %v5426_v32 }
 0x656   : > { %v5454_v3 = vmul.f32 %v5438_v39, %v5423_v43  ;;  %v5455_v6 = vmul.f32 %v5439_v41, %v5424_v19  ;;  %v5463_v22 = vpack.c.bf16 %v5457_v49, %v5456_v37  ;;  %v5503_v31 = vrot.slane %v5457_v49, 4 }
 0x657   : > { %v5348_v14 = vpop.f32.mrf.mxu2  ;;  %v5361_v8 = vpop.f32.mrf.mxu3 }
 0x658   : > { %v5462_v48 = vpack.c.bf16 %v5455_v6, %v5454_v3  ;;  %v5502_v59 = vrot.slane %v5455_v6, 4  ;;  %v5471_v23 = vrot.slane %v5463_v22, 4  ;;  %v5472_v17 = vrot.slane %v5463_v22, 6 }
 0x659   : > { %v5507_v12 = vsel %vm227_vm2, %v5456_v37, %v5503_v31  ;;  %v5322_v53 = vpop.f32.mrf.mxu0  ;;  %v5335_v63 = vpop.f32.mrf.mxu1 }
 0x65a   : > { %v5470_v34 = vrot.slane %v5462_v48, 2  ;;  %v9172_v42 = vadd.f32 %v5507_v12, %v8712_v21  ;;  %v5506_v61 = vsel %vm227_vm2, %v5454_v3, %v5502_v59  ;;  %v5481_v60 = vsel %vm223_vm1, %v5471_v23, %v5472_v17 }
 0x65b   : > { %v9176_v35 = vadd.f32 %v5506_v61, %v8717_v45  ;;  %v5076_v21 = vadd.f32 %v9166_v52, %v9158_v38  ;;  %v5077_v45 = vadd.f32 %v9168_v25, %v9160_v30  ;;  %v5443_v30 = vld.sshfl [vmem:[#allocation1 + $0x28] sm:$0xff pattern:$0x75316420] }
 0x65c   : > { %v5478_v47 = vsel %vm219_vm0, %v5462_v48, %v5470_v34 }
 0x65d   : > { %v9185_v50 = vsel %vm227_vm2, %v5478_v47, %v5481_v60  ;;  %v5224_v29 = vadd.f32 %v5177_v2, %v5076_v21  ;;  %v5225_v40 = vadd.f32 %v5190_v15, %v5077_v45 }
 0x65e   : > { %5492 = vst [vmem:[#allocation2 + $0x6] sm:$0xff] %v9185_v50 }
 0x65f   : > { %v5398_v46 = vpop.f32.mrf.mxu2  ;;  %v5411_v26 = vpop.f32.mrf.mxu3 }
 0x660   : > { %v5421_v11 = vadd.f32 %v5398_v46, %v5226_v28  ;;  %v5422_v36 = vadd.f32 %v5411_v26, %v5227_v9 }
 0x661   : > { %v5372_v4 = vpop.f32.mrf.mxu0  ;;  %v5385_v7 = vpop.f32.mrf.mxu1 }
 0x662   : > { %v5419_v33 = vadd.f32 %v5372_v4, %v5224_v29  ;;  %v5420_v38 = vadd.f32 %v5385_v7, %v5225_v40  ;;  %v5429_v52 = vmax.f32 %v5421_v11, 0.0  ;;  %v5430_v18 = vmax.f32 %v5422_v36, 0.0 }
 0x664   : > { %v5427_v25 = vmax.f32 %v5419_v33, 0.0  ;;  %v5428_v24 = vmax.f32 %v5420_v38, 0.0  ;;  %v5460_v5 = vmul.f32 %v5444_v13, %v5429_v52  ;;  %v5461_v2 = vmul.f32 %v5445_v51, %v5430_v18 }
 0x665   : > { %v5523_v57 = vld [vmem:[#allocation2 + $0x2] sm:$0xff] }
 0x666   : > { %5528 = vst [vmem:[#allocation1] ss:$4 sm:$0xff] %v5523_v57  ;;  %v5458_v15 = vmul.f32 %v5442_v56, %v5427_v25  ;;  %v5459_v20 = vmul.f32 %v5443_v30, %v5428_v24  ;;  %v5465_v55 = vpack.c.bf16 %v5461_v2, %v5460_v5  ;;  %v5505_v44 = vrot.slane %v5461_v2, 4  ;;  %v5518_v22 = vld [vmem:[#allocation2] sm:$0xff] }
 0x667   : > { %v5400_v39 = vpop.f32.mrf.mxu2  ;;  %v5413_v62 = vpop.f32.mrf.mxu3 }
 0x668   : > { %v5464_v54 = vpack.c.bf16 %v5459_v20, %v5458_v15  ;;  %v5504_v0 = vrot.slane %v5459_v20, 4  ;;  %v5474_v10 = vrot.slane %v5465_v55, 4  ;;  %v5475_v32 = vrot.slane %v5465_v55, 6 }
 0x669   : > { %v5509_v41 = vsel %vm227_vm2, %v5460_v5, %v5505_v44  ;;  %v5374_v43 = vpop.f32.mrf.mxu0  ;;  %v5387_v19 = vpop.f32.mrf.mxu1  ;;  %v6042_v5 = vld [vmem:[#allocation2 + $0x4] sm:$0xff] }
 0x66a   : > { %v5473_v37 = vrot.slane %v5464_v54, 2  ;;  %v9194_v49 = vadd.f32 %v5509_v41, %v8741_v58  ;;  %v5508_v3 = vsel %vm227_vm2, %v5458_v15, %v5504_v0  ;;  %v5488_v31 = vsel %vm223_vm1, %v5474_v10, %v5475_v32 }
 0x66b   : > { %v9198_v6 = vadd.f32 %v5508_v3, %v8744_v16  ;;  %vm5706_vm1 = vcmask 64512  }
 0x66c   : > { %v5485_v48 = vsel %vm219_vm0, %v5464_v54, %v5473_v37 }
 0x66d   : > { %v5532_v59 = vld.sshfl [vmem:[#allocation1] sm:$0xff pattern:$0x73625140]  ;;  %v5533_v14 = vld.sshfl [vmem:[#allocation1 + $0x8] sm:$0xff pattern:$0x73625140]  ;;  %v9203_v8 = vsel %vm227_vm2, %v5485_v48, %v5488_v31 }
 0x66e   : > { %v5534_v23 = vld.sshfl [vmem:[#allocation1 + $0x10] sm:$0xff pattern:$0x73625140]  ;;  %v5535_v17 = vld.sshfl [vmem:[#allocation1 + $0x18] sm:$0xff pattern:$0x73625140] }
 0x66f   : > { %5664 = vst [vmem:[#allocation1] ss:$4 sm:$0xff] %v5518_v22  ;;  %v5543_v58 = vsel %vm219_vm0, %v5532_v59, 0  ;;  %v5545_v12 = vsel %vm219_vm0, %v5533_v14, 0  ;;  %v5547_v16 = vsel %vm219_vm0, %v5534_v23, 0  ;;  %v5549_v53 = vsel %vm219_vm0, %v5535_v17, 0 }
 0x670   : > { %5493 = vst [vmem:[#allocation2 + $0xe] sm:$0xff] %v9203_v8  ;;  %5566 = vmatpush.bf16.msra.mxu0 %v5543_v58  ;;  %5579 = vmatpush.bf16.msra.mxu1 %v5545_v12  ;;  %v6387_v58 = vld [vmem:[#allocation2 + $0x16] sm:$0x3] }
 0x671   : > { %5592 = vmatpush.bf16.msra.mxu2 %v5547_v16  ;;  %5605 = vmatpush.bf16.msra.mxu3 %v5549_v53 }
 0x676   : > { %v5668_v63 = vld.sshfl [vmem:[#allocation1] sm:$0xff pattern:$0x73625140]  ;;  %v5670_v60 = vld.sshfl [vmem:[#allocation1 + $0x8] sm:$0xff pattern:$0x73625140] }
 0x677   : > { %v5520_v34 = vld [vmem:[#allocation2 + $0x10] sm:$0x3]  ;;  %v5672_v47 = vld.sshfl [vmem:[#allocation1 + $0x10] sm:$0xff pattern:$0x73625140] }
 0x678   : > { %v9210_v61 = vld [vmem:[#allocation2 + $0xa] sm:$0xff]  ;;  %5692 = vrot.lane.b32.xlu2 %v5672_v47, %s7595_s23  ;;  %v5848_v38 = vld [vmem:[#allocation2 + $0x12] sm:$0x3]  ;;  %v6044_v55 = vld [vmem:[#allocation2 + $0x14] sm:$0x3] }
 0x679   : > { %5531 = vst [vmem:[#allocation1 + $0x20] ss:$4 sm:$0xff] %v9210_v61  ;;  %v5674_v27 = vld.sshfl [vmem:[#allocation1 + $0x18] sm:$0xff pattern:$0x73625140]  ;;  %v9215_v1 = vld [vmem:[#allocation2 + $0x8] sm:$0xff] }
 0x67a   : > { %5685 = vst [vmem:[#allocation1] ss:$4 sm:$0xff] %v5520_v34  ;;  %5694 = vrot.lane.b32.xlu0 %v5674_v27, %s7595_s23  ;;  %v6043_v18 = vld [vmem:[#allocation2 + $0xc] sm:$0xff] }
 0x67b   : > { %v6581_v59 = vld [vmem:[#allocation2 + $0x10] sm:$0xff] }
 0x680   : > { %v5536_v21 = vld.sshfl [vmem:[#allocation1 + $0x20] sm:$0xff pattern:$0x73625140]  ;;  %v5537_v45 = vld.sshfl [vmem:[#allocation1 + $0x28] sm:$0xff pattern:$0x73625140] }
 0x681   : > { %v5538_v28 = vld.sshfl [vmem:[#allocation1 + $0x30] sm:$0xff pattern:$0x73625140]  ;;  %v5539_v9 = vld.sshfl [vmem:[#allocation1 + $0x38] sm:$0xff pattern:$0x73625140] }
 0x682   : > { %5667 = vst [vmem:[#allocation1 + $0x20] ss:$4 sm:$0xff] %v9215_v1  ;;  %v5686_v29 = vld.sshfl [vmem:[#allocation1] sm:$0xff pattern:$0x73625140]  ;;  %v5551_v40 = vsel %vm219_vm0, %v5536_v21, 0  ;;  %5690 = vrot.lane.b32.xlu0 %v5670_v60, %s7595_s23 }
 0x683   : > { %5852 = vst [vmem:[#allocation1] ss:$4 sm:$0xff] %v5523_v57  ;;  %5618 = vmatpush.bf16.msrb.mxu0 %v5551_v40  ;;  %v5553_v46 = vsel %vm219_vm0, %v5537_v45, 0  ;;  %v5555_v26 = vsel %vm219_vm0, %v5538_v28, 0  ;;  %v5557_v11 = vsel %vm219_vm0, %v5539_v9, 0 }
 0x684   : > { %5631 = vmatpush.bf16.msrb.mxu1 %v5553_v46  ;;  %5644 = vmatpush.bf16.msrb.mxu2 %v5555_v26  ;;  %v7461_v21 = vld [vmem:[%s9640_s1 + $0x38] sm:$0x3]  ;;  %v6582_v46 = vld [vmem:[#allocation2 + $0x18] sm:$0x3] }
 0x685   : > { %5657 = vmatpush.bf16.msrb.mxu3 %v5557_v11  ;;  %7464 = vmatmul.msk.bf16.vlgmr.msra.gmra.mxu2 %vm302_vm4, %v7461_v21 }
 0x686   : > { %7463 = vmatmul.msk.bf16.vlgmr.msra.gmra.mxu1 %vm302_vm4, %v7461_v21  ;;  %7465 = vmatmul.msk.bf16.vlgmr.msra.gmra.mxu3 %vm302_vm4, %v7461_v21 }
 0x687   : > { %7462 = vmatmul.msk.bf16.vlgmr.msra.gmra.mxu0 %vm302_vm4, %v7461_v21 }
 0x689   : > { %v5676_v13 = vld.sshfl [vmem:[#allocation1 + $0x20] sm:$0xff pattern:$0x73625140]  ;;  %v5678_v36 = vld.sshfl [vmem:[#allocation1 + $0x28] sm:$0xff pattern:$0x73625140] }
 0x68a   : > { %v5680_v4 = vld.sshfl [vmem:[#allocation1 + $0x30] sm:$0xff pattern:$0x73625140]  ;;  %v5682_v7 = vld.sshfl [vmem:[#allocation1 + $0x38] sm:$0xff pattern:$0x73625140]  ;;  %5696 = vrot.lane.b32.xlu1 %v5676_v13, %s7595_s23  ;;  %5704 = vrot.lane.b32.xlu0 %v5686_v29, %s7595_s23 }
 0x68b   : > { %5855 = vst [vmem:[#allocation1 + $0x20] ss:$4 sm:$0xff] %v9210_v61  ;;  %v5856_v51 = vld.sshfl [vmem:[#allocation1] sm:$0xff pattern:$0x73625140]  ;;  %5702 = vrot.lane.b32.xlu2 %v5682_v7, %s7595_s23 }
 0x68c   : > { %v5858_v33 = vld.sshfl [vmem:[#allocation1 + $0x8] sm:$0xff pattern:$0x73625140]  ;;  %v5860_v56 = vld.sshfl [vmem:[#allocation1 + $0x10] sm:$0xff pattern:$0x73625140] }
 0x68d   : > { %v5862_v52 = vld.sshfl [vmem:[#allocation1 + $0x18] sm:$0xff pattern:$0x73625140] }
 0x68e   : > { %5873 = vst [vmem:[#allocation1] ss:$4 sm:$0xff] %v5848_v38 }
 0x692   : > { %v5864_v30 = vld.sshfl [vmem:[#allocation1 + $0x20] sm:$0xff pattern:$0x73625140]  ;;  %v5866_v25 = vld.sshfl [vmem:[#allocation1 + $0x28] sm:$0xff pattern:$0x73625140]  ;;  %5688 = vrot.lane.b32.xlu1 %v5668_v63, %s7595_s23  ;;  %5882 = vrot.lane.b32.xlu0 %v5862_v52, %s7596_s24 }
 0x693   : > { %v5868_v24 = vld.sshfl [vmem:[#allocation1 + $0x30] sm:$0xff pattern:$0x73625140]  ;;  %v5870_v57 = vld.sshfl [vmem:[#allocation1 + $0x38] sm:$0xff pattern:$0x73625140]  ;;  %5698 = vrot.lane.b32.xlu2 %v5678_v36, %s7595_s23 }
 0x694   : > { %6051 = vst [vmem:[#allocation1 + $0x20] ss:$4 sm:$0xff] %v6043_v18 }
 0x695   : > { %v5874_v2 = vld.sshfl [vmem:[#allocation1] sm:$0xff pattern:$0x73625140]  ;;  %7468 = vmatmul.msk.bf16.vlgmr.msrb.gmra.mxu2 %vm302_vm4, %v7461_v21 }
 0x696   : > { %6048 = vst [vmem:[#allocation1] ss:$4 sm:$0xff] %v6042_v5  ;;  %7467 = vmatmul.msk.bf16.vlgmr.msrb.gmra.mxu1 %vm302_vm4, %v7461_v21  ;;  %7469 = vmatmul.msk.bf16.vlgmr.msrb.gmra.mxu3 %vm302_vm4, %v7461_v21 }
 0x697   : > { %7466 = vmatmul.msk.bf16.vlgmr.msrb.gmra.mxu0 %vm302_vm4, %v7461_v21 }
 0x69a   : > { %5700 = vrot.lane.b32.xlu1 %v5680_v4, %s7595_s23  ;;  %5878 = vrot.lane.b32.xlu0 %v5858_v33, %s7596_s24 }
 0x69b   : > { %v6060_v15 = vld.sshfl [vmem:[#allocation1 + $0x20] sm:$0xff pattern:$0x73625140]  ;;  %v9231_v20 = vld.sshfl [vmem:[#allocation1 + $0x28] sm:$0xff pattern:$0x73625140]  ;;  %5880 = vrot.lane.b32.xlu2 %v5860_v56, %s7596_s24 }
 0x69c   : > { %v9235_v44 = vld.sshfl [vmem:[#allocation1 + $0x30] sm:$0xff pattern:$0x73625140]  ;;  %v6066_v54 = vld.sshfl [vmem:[#allocation1 + $0x38] sm:$0xff pattern:$0x73625140] }
 0x69d   : > { %v6052_v0 = vld.sshfl [vmem:[#allocation1] sm:$0xff pattern:$0x73625140]  ;;  %v6054_v39 = vld.sshfl [vmem:[#allocation1 + $0x8] sm:$0xff pattern:$0x73625140] }
 0x69e   : > { %v6056_v62 = vld.sshfl [vmem:[#allocation1 + $0x10] sm:$0xff pattern:$0x73625140]  ;;  %v6058_v10 = vld.sshfl [vmem:[#allocation1 + $0x18] sm:$0xff pattern:$0x73625140] }
 0x69f   : > { %6069 = vst [vmem:[#allocation1] ss:$4 sm:$0xff] %v6044_v55  ;;  %v6925_v56 = vld [vmem:[#allocation2 + $0x1a] sm:$0x3] }
 0x6a0   : > { %6245 = vst [vmem:[#allocation1 + $0x20] ss:$4 sm:$0xff] %v9203_v8 }
 0x6a2   : > { %5884 = vrot.lane.b32.xlu1 %v5864_v30, %s7596_s24  ;;  %5892 = vrot.lane.b32.xlu0 %v5874_v2, %s7596_s24  ;;  %v9331_v2 = vld [vmem:[%s9640_s1 + $0x36] sm:$0x3] }
 0x6a3   : > { %5890 = vrot.lane.b32.xlu2 %v5870_v57, %s7596_s24 }
 0x6a6   : > { %v6070_v32 = vld.sshfl [vmem:[#allocation1] sm:$0xff pattern:$0x73625140] }
 0x6a7   : > { %6242 = vst [vmem:[#allocation1] ss:$4 sm:$0xff] %v9185_v50  ;;  %v9242_v41 = vld.sshfl [vmem:[#allocation1 + $0x20] sm:$0xff pattern:$0x73625140] }
 0x6a8   : > { %v9244_v43 = vld.sshfl [vmem:[#allocation1 + $0x28] sm:$0xff pattern:$0x73625140]  ;;  %v9246_v19 = vld.sshfl [vmem:[#allocation1 + $0x30] sm:$0xff pattern:$0x73625140] }
 0x6a9   : > { %v9248_v37 = vld.sshfl [vmem:[#allocation1 + $0x38] sm:$0xff pattern:$0x73625140] }
 0x6aa   : > { %6394 = vst [vmem:[#allocation1 + $0x20] ss:$4 sm:$0xff] %v9203_v8  ;;  %5876 = vrot.lane.b32.xlu1 %v5856_v51, %s7596_s24  ;;  %6078 = vrot.lane.b32.xlu0 %v6058_v10, %s7595_s23 }
 0x6ab   : > { %5886 = vrot.lane.b32.xlu2 %v5866_v25, %s7596_s24 }
 0x6ae   : > { %v9254_v3 = vld.sshfl [vmem:[#allocation1] sm:$0xff pattern:$0x73625140]  ;;  %v9256_v22 = vld.sshfl [vmem:[#allocation1 + $0x8] sm:$0xff pattern:$0x73625140] }
 0x6af   : > { %v9258_v31 = vld.sshfl [vmem:[#allocation1 + $0x10] sm:$0xff pattern:$0x73625140]  ;;  %v9260_v48 = vld.sshfl [vmem:[#allocation1 + $0x18] sm:$0xff pattern:$0x73625140] }
 0x6b0   : > { %6391 = vst [vmem:[#allocation1] ss:$4 sm:$0xff] %v9185_v50  ;;  %v6776_v50 = vld [vmem:[#allocation2 + $0x12] sm:$0xff] }
 0x6b1   : > { %v6403_v14 = vld.sshfl [vmem:[#allocation1 + $0x20] sm:$0xff pattern:$0x73625140]  ;;  %v6405_v23 = vld.sshfl [vmem:[#allocation1 + $0x28] sm:$0xff pattern:$0x73625140] }
 0x6b2   : > { %v9263_v8 = vld.sshfl [vmem:[#allocation1 + $0x30] sm:$0xff pattern:$0x73625140]  ;;  %v6409_v17 = vld.sshfl [vmem:[#allocation1 + $0x38] sm:$0xff pattern:$0x73625140]  ;;  %5888 = vrot.lane.b32.xlu1 %v5868_v24, %s7596_s24  ;;  %6074 = vrot.lane.b32.xlu0 %v6054_v39, %s7595_s23 }
 0x6b3   : > { %6589 = vst [vmem:[#allocation1 + $0x20] ss:$4 sm:$0xff] %v6581_v59  ;;  %6076 = vrot.lane.b32.xlu2 %v6056_v62, %s7595_s23 }
 0x6b7   : > { %v6395_v12 = vld.sshfl [vmem:[#allocation1] sm:$0xff pattern:$0x73625140]  ;;  %v6397_v16 = vld.sshfl [vmem:[#allocation1 + $0x8] sm:$0xff pattern:$0x73625140] }
 0x6b8   : > { %v6399_v53 = vld.sshfl [vmem:[#allocation1 + $0x10] sm:$0xff pattern:$0x73625140]  ;;  %v6401_v63 = vld.sshfl [vmem:[#allocation1 + $0x18] sm:$0xff pattern:$0x73625140] }
 0x6b9   : > { %6412 = vst [vmem:[#allocation1] ss:$4 sm:$0xff] %v6387_v58 }
 0x6ba   : > { %v6598_v34 = vld.sshfl [vmem:[#allocation1 + $0x20] sm:$0xff pattern:$0x73625140]  ;;  %v9268_v60 = vld.sshfl [vmem:[#allocation1 + $0x28] sm:$0xff pattern:$0x73625140]  ;;  %6080 = vrot.lane.b32.xlu1 %v6060_v15, %s7595_s23  ;;  %6088 = vrot.lane.b32.xlu0 %v6070_v32, %s7595_s23 }
 0x6bb   : > { %v9271_v47 = vld.sshfl [vmem:[#allocation1 + $0x30] sm:$0xff pattern:$0x73625140]  ;;  %v6604_v27 = vld.sshfl [vmem:[#allocation1 + $0x38] sm:$0xff pattern:$0x73625140]  ;;  %6086 = vrot.lane.b32.xlu2 %v6066_v54, %s7595_s23 }
 0x6bc   : > { %6783 = vst [vmem:[#allocation1 + $0x20] ss:$4 sm:$0xff] %v6776_v50 }
 0x6c0   : > { %v6413_v45 = vld.sshfl [vmem:[#allocation1] sm:$0xff pattern:$0x73625140] }
 0x6c1   : > { %6586 = vst [vmem:[#allocation1] ss:$4 sm:$0xff] %v9215_v1 }
 0x6c2   : > { %6072 = vrot.lane.b32.xlu1 %v6052_v0, %s7595_s23  ;;  %6421 = vrot.lane.b32.xlu0 %v6401_v63, %s7596_s24 }
 0x6c3   : > { %v9284_v28 = vld.sshfl [vmem:[#allocation1 + $0x20] sm:$0xff pattern:$0x73625140]  ;;  %v9286_v9 = vld.sshfl [vmem:[#allocation1 + $0x28] sm:$0xff pattern:$0x73625140]  ;;  %6082 = vrot.lane.b32.xlu2 %v9231_v20, %s7595_s23 }
 0x6c4   : > { %v9291_v29 = vld.sshfl [vmem:[#allocation1 + $0x30] sm:$0xff pattern:$0x73625140]  ;;  %v9293_v40 = vld.sshfl [vmem:[#allocation1 + $0x38] sm:$0xff pattern:$0x73625140] }
 0x6c5   : > { %6932 = vst [vmem:[#allocation1 + $0x20] ss:$4 sm:$0xff] %v6776_v50 }
 0x6c8   : > { %v6590_v26 = vld.sshfl [vmem:[#allocation1] sm:$0xff pattern:$0x73625140]  ;;  %v6592_v11 = vld.sshfl [vmem:[#allocation1 + $0x8] sm:$0xff pattern:$0x73625140] }
 0x6c9   : > { %v6594_v1 = vld.sshfl [vmem:[#allocation1 + $0x10] sm:$0xff pattern:$0x73625140]  ;;  %v6596_v13 = vld.sshfl [vmem:[#allocation1 + $0x18] sm:$0xff pattern:$0x73625140] }
 0x6ca   : > { %6607 = vst [vmem:[#allocation1] ss:$4 sm:$0xff] %v6582_v46  ;;  %6084 = vrot.lane.b32.xlu1 %v9235_v44, %s7595_s23  ;;  %6417 = vrot.lane.b32.xlu0 %v6397_v16, %s7596_s24 }
 0x6cb   : > { %6419 = vrot.lane.b32.xlu2 %v6399_v53, %s7596_s24 }
 0x6cc   : > { %v6943_v50 = vld.sshfl [vmem:[#allocation1 + $0x28] sm:$0xff pattern:$0x73625140] }
 0x6d1   : > { %v6608_v36 = vld.sshfl [vmem:[#allocation1] sm:$0xff pattern:$0x73625140] }
 0x6d2   : > { %6780 = vst [vmem:[#allocation1] ss:$4 sm:$0xff] %v9210_v61  ;;  %6423 = vrot.lane.b32.xlu1 %v6403_v14, %s7596_s24  ;;  %6431 = vrot.lane.b32.xlu0 %v6413_v45, %s7596_s24  ;;  %v5693_v25 = vpop.permute.xlu2 %5692  ;;  %v6941_v14 = vld.sshfl [vmem:[#allocation1 + $0x20] sm:$0xff pattern:$0x73625140] }
 0x6d3   : > { %6429 = vrot.lane.b32.xlu2 %v6409_v17, %s7596_s24 }
 0x6d9   : > { %v9307_v4 = vld.sshfl [vmem:[#allocation1] sm:$0xff pattern:$0x73625140]  ;;  %v9309_v7 = vld.sshfl [vmem:[#allocation1 + $0x8] sm:$0xff pattern:$0x73625140] }
 0x6da   : > { %v9311_v51 = vld.sshfl [vmem:[#allocation1 + $0x10] sm:$0xff pattern:$0x73625140]  ;;  %v9313_v33 = vld.sshfl [vmem:[#allocation1 + $0x18] sm:$0xff pattern:$0x73625140]  ;;  %6415 = vrot.lane.b32.xlu1 %v6395_v12, %s7596_s24  ;;  %6616 = vrot.lane.b32.xlu0 %v6596_v13, %s7595_s23 }
 0x6db   : > { %6929 = vst [vmem:[#allocation1] ss:$4 sm:$0xff] %v9210_v61  ;;  %6425 = vrot.lane.b32.xlu2 %v6405_v23, %s7596_s24  ;;  %v6947_v23 = vld.sshfl [vmem:[#allocation1 + $0x38] sm:$0xff pattern:$0x73625140] }
 0x6e2   : > { %v6933_v38 = vld.sshfl [vmem:[#allocation1] sm:$0xff pattern:$0x73625140]  ;;  %6427 = vrot.lane.b32.xlu1 %v9263_v8, %s7596_s24  ;;  %v6939_v52 = vld.sshfl [vmem:[#allocation1 + $0x18] sm:$0xff pattern:$0x73625140]  ;;  %6612 = vrot.lane.b32.xlu0 %v6592_v11, %s7595_s23 }
 0x6e3   : > { %6614 = vrot.lane.b32.xlu2 %v6594_v1, %s7595_s23  ;;  %v6935_v18 = vld.sshfl [vmem:[#allocation1 + $0x8] sm:$0xff pattern:$0x73625140]  ;;  %v6937_v30 = vld.sshfl [vmem:[#allocation1 + $0x10] sm:$0xff pattern:$0x73625140] }
 0x6e4   : > { %6950 = vst [vmem:[#allocation1] ss:$4 sm:$0xff] %v6925_v56 }
 0x6e5   : > { %v5703_v5 = vpop.permute.xlu2 %5702 }
 0x6ea   : > { %6618 = vrot.lane.b32.xlu1 %v6598_v34, %s7595_s23  ;;  %6626 = vrot.lane.b32.xlu0 %v6608_v36, %s7595_s23  ;;  %v6945_v36 = vld.sshfl [vmem:[#allocation1 + $0x30] sm:$0xff pattern:$0x73625140] }
 0x6eb   : > { %6624 = vrot.lane.b32.xlu2 %v6604_v27, %s7595_s23  ;;  %v6951_v59 = vld.sshfl [vmem:[#allocation1] sm:$0xff pattern:$0x73625140] }
 0x6ec   : > { %v5695_v61 = vpop.permute.xlu0 %5694 }
 0x6ed   : > { %v5709_v24 = vsel %vm5706_vm1, %v5693_v25, %v5695_v61  ;;  %v5699_v44 = vpop.permute.xlu2 %5698 }
 0x6ee   : > { %v5725_v57 = vsel %vm219_vm0, %v5709_v24, 0 }
 0x6ef   : > { %5775 = vmatpush.bf16.msra.mxu2 %v5725_v57 }
 0x6f2   : > { %6610 = vrot.lane.b32.xlu1 %v6590_v26, %s7595_s23  ;;  %7472 = vmatmul.msk.bf16.vlgmr.msra.gmra.mxu2 %vm302_vm4, %v9331_v2 }
 0x6f3   : > { %6959 = vrot.lane.b32.xlu0 %v6939_v52, %s7596_s24  ;;  %6620 = vrot.lane.b32.xlu2 %v9268_v60, %s7595_s23 }
 0x6f4   : > { %v5691_v15 = vpop.permute.xlu0 %5690 }
 0x6f5   : > { %v5708_v20 = vsel %vm5706_vm1, %v5691_v15, %v5693_v25  ;;  %v5881_v8 = vpop.permute.xlu2 %5880 }
 0x6f6   : > { %v5722_v55 = vsel %vm219_vm0, %v5708_v20, 0 }
 0x6f7   : > { %5762 = vmatpush.bf16.msra.mxu1 %v5722_v55 }
 0x6fa   : > { %6622 = vrot.lane.b32.xlu1 %v9271_v47, %s7595_s23  ;;  %7471 = vmatmul.msk.bf16.vlgmr.msra.gmra.mxu1 %vm302_vm4, %v9331_v2 }
 0x6fb   : > { %6955 = vrot.lane.b32.xlu0 %v6935_v18, %s7596_s24  ;;  %6957 = vrot.lane.b32.xlu2 %v6937_v30, %s7596_s24 }
 0x6fc   : > { %v5697_v54 = vpop.permute.xlu1 %5696  ;;  %v5705_v0 = vpop.permute.xlu0 %5704 }
 0x6fd   : > { %v5710_v39 = vsel %vm5706_vm1, %v5695_v61, %v5697_v54  ;;  %v5714_v62 = vsel %vm5706_vm1, %v5703_v5, %v5705_v0  ;;  %v5711_v17 = vsel %vm5706_vm1, %v5697_v54, %v5699_v44  ;;  %v5891_v45 = vpop.permute.xlu2 %5890 }
 0x6fe   : > { %v5728_v10 = vsel %vm219_vm0, %v5710_v39, 0  ;;  %v5740_v32 = vsel %vm219_vm0, %v5714_v62, 0  ;;  %v5731_v63 = vsel %vm219_vm0, %v5711_v17, 0 }
 0x6ff   : > { %5788 = vmatpush.bf16.msra.mxu3 %v5728_v10 }
 0x702   : > { %7473 = vmatmul.msk.bf16.vlgmr.msra.gmra.mxu3 %vm302_vm4, %v9331_v2  ;;  %6961 = vrot.lane.b32.xlu1 %v6941_v14, %s7596_s24 }
 0x703   : > { %5840 = vmatpush.bf16.msrb.mxu3 %v5740_v32  ;;  %6969 = vrot.lane.b32.xlu0 %v6951_v59, %s7596_s24 }
 0x704   : > { %6967 = vrot.lane.b32.xlu2 %v6947_v23, %s7596_s24  ;;  %v5689_v58 = vpop.permute.xlu1 %5688  ;;  %v5883_v12 = vpop.permute.xlu0 %5882 }
 0x705   : > { %v5707_v16 = vsel %vm5706_vm1, %v5689_v58, %v5691_v15  ;;  %v5897_v34 = vsel %vm5894_vm6, %v5881_v8, %v5883_v12  ;;  %v5887_v61 = vpop.permute.xlu2 %5886 }
 0x706   : > { %v5719_v53 = vsel %vm219_vm0, %v5707_v16, 0  ;;  %v5913_v1 = vsel %vm219_vm0, %v5897_v34, 0 }
 0x707   : > { %5749 = vmatpush.bf16.msra.mxu0 %v5719_v53 }
 0x70a   : > { %7470 = vmatmul.msk.bf16.vlgmr.msra.gmra.mxu0 %vm302_vm4, %v9331_v2  ;;  %6953 = vrot.lane.b32.xlu1 %v6933_v38, %s7596_s24 }
 0x70b   : > { %5801 = vmatpush.bf16.msrb.mxu0 %v5731_v63 }
 0x70c   : > { %6963 = vrot.lane.b32.xlu2 %v6943_v50, %s7596_s24  ;;  %v5701_v60 = vpop.permute.xlu1 %5700  ;;  %v5879_v47 = vpop.permute.xlu0 %5878 }
 0x70d   : > { %v5712_v27 = vsel %vm5706_vm1, %v5699_v44, %v5701_v60  ;;  %v5713_v21 = vsel %vm5706_vm1, %v5701_v60, %v5703_v5  ;;  %v5896_v46 = vsel %vm5894_vm6, %v5879_v47, %v5881_v8  ;;  %v7478_v44 = vld [vmem:[%s9640_s1 + $0x3a] sm:$0x3]  ;;  %v6077_v54 = vpop.permute.xlu2 %6076 }
 0x70e   : > { %v5734_v26 = vsel %vm219_vm0, %v5712_v27, 0  ;;  %v5737_v11 = vsel %vm219_vm0, %v5713_v21, 0  ;;  %v5910_v13 = vsel %vm219_vm0, %v5896_v46, 0  ;;  %v9416_v46 = vpop.f32.mrf.mxu1 }
 0x70f   : > { %5814 = vmatpush.bf16.msrb.mxu1 %v5734_v26  ;;  %5827 = vmatpush.bf16.msrb.mxu2 %v5737_v11 }
 0x712   : > { %7475 = vmatmul.msk.bf16.vlgmr.msrb.gmra.mxu1 %vm302_vm4, %v9331_v2  ;;  %7476 = vmatmul.msk.bf16.vlgmr.msrb.gmra.mxu2 %vm302_vm4, %v9331_v2 }
 0x713   : > { %5950 = vmatpush.bf16.msra.mxu1 %v5910_v13  ;;  %5963 = vmatpush.bf16.msra.mxu2 %v5913_v1 }
 0x714   : > { %7477 = vmatmul.msk.bf16.vlgmr.msrb.gmra.mxu3 %vm302_vm4, %v9331_v2  ;;  %6965 = vrot.lane.b32.xlu1 %v6945_v36, %s7596_s24  ;;  %v5885_v56 = vpop.permute.xlu1 %5884  ;;  %v5893_v38 = vpop.permute.xlu0 %5892 }
 0x715   : > { %v5898_v52 = vsel %vm5894_vm6, %v5883_v12, %v5885_v56  ;;  %v5902_v18 = vsel %vm5894_vm6, %v5891_v45, %v5893_v38  ;;  %v5899_v24 = vsel %vm5894_vm6, %v5885_v56, %v5887_v61  ;;  %v6087_v17 = vpop.permute.xlu2 %6086  ;;  %v7487_v56 = vld [vmem:[%s9640_s1 + $0x3c] sm:$0x3]  ;;  %v9425_v38 = vpop.f32.mrf.mxu2 }
 0x716   : > { %v5916_v30 = vsel %vm219_vm0, %v5898_v52, 0  ;;  %v5928_v25 = vsel %vm219_vm0, %v5902_v18, 0  ;;  %v5919_v55 = vsel %vm219_vm0, %v5899_v24, 0  ;;  %v6259_v52 = vsel %vm219_vm0, %v9256_v22, 0  ;;  %v5583_v18 = vpop.f32.mrf.mxu1  ;;  %v9438_v24 = vpop.f32.mrf.mxu0 }
 0x717   : > { %5976 = vmatpush.bf16.msra.mxu3 %v5916_v30  ;;  %v6261_v30 = vsel %vm219_vm0, %v9258_v31, 0  ;;  %v6257_v22 = vsel %vm219_vm0, %v9254_v3, 0  ;;  %v6269_v3 = vsel %vm219_vm0, %v9246_v19, 0 }
 0x71a   : > { %7474 = vmatmul.msk.bf16.vlgmr.msrb.gmra.mxu0 %vm302_vm4, %v9331_v2 }
 0x71b   : > { %6028 = vmatpush.bf16.msrb.mxu3 %v5928_v25  ;;  %v6263_v25 = vsel %vm219_vm0, %v9260_v48, 0 }
 0x71c   : > { %v5877_v57 = vpop.permute.xlu1 %5876  ;;  %v6079_v5 = vpop.permute.xlu0 %6078 }
 0x71d   : > { %v5895_v15 = vsel %vm5894_vm6, %v5877_v57, %v5879_v47  ;;  %v6092_v2 = vsel %vm5706_vm1, %v6077_v54, %v6079_v5  ;;  %v6083_v47 = vpop.permute.xlu2 %6082  ;;  %v5596_v57 = vpop.f32.mrf.mxu2 }
 0x71e   : > { %v5907_v20 = vsel %vm219_vm0, %v5895_v15, 0  ;;  %v6108_v23 = vsel %vm219_vm0, %v6092_v2, 0  ;;  %v5570_v31 = vpop.f32.mrf.mxu0 }
 0x71f   : > { %5937 = vmatpush.bf16.msra.mxu0 %v5907_v20 }
 0x722   : > { %7480 = vmatmul.msk.bf16.vlgmr.msra.gmra.mxu1 %vm302_vm4, %v7478_v44  ;;  %7481 = vmatmul.msk.bf16.vlgmr.msra.gmra.mxu2 %vm302_vm4, %v7478_v44 }
 0x723   : > { %5989 = vmatpush.bf16.msrb.mxu0 %v5919_v55  ;;  %v6267_v55 = vsel %vm219_vm0, %v9244_v43, 0  ;;  %v6265_v43 = vsel %vm219_vm0, %v9242_v41, 0 }
 0x724   : > { %7482 = vmatmul.msk.bf16.vlgmr.msra.gmra.mxu3 %vm302_vm4, %v7478_v44  ;;  %v5889_v0 = vpop.permute.xlu1 %5888  ;;  %v6075_v39 = vpop.permute.xlu0 %6074 }
 0x725   : > { %v5900_v62 = vsel %vm5894_vm6, %v5887_v61, %v5889_v0  ;;  %v5901_v10 = vsel %vm5894_vm6, %v5889_v0, %v5891_v45  ;;  %v6091_v32 = vsel %vm5706_vm1, %v6075_v39, %v6077_v54  ;;  %v9436_v61 = vpop.f32.mrf.mxu3  ;;  %v9445_v20 = vpop.f32.mrf.mxu2  ;;  %v6271_v54 = vsel %vm219_vm0, %v9248_v37, 0  ;;  %v7496_v37 = vld [vmem:[%s9640_s1 + $0x3e] sm:$0x3] }
 0x726   : > { %v5922_v59 = vsel %vm219_vm0, %v5900_v62, 0  ;;  %v5925_v14 = vsel %vm219_vm0, %v5901_v10, 0  ;;  %v6105_v8 = vsel %vm219_vm0, %v6091_v32, 0  ;;  %v9458_v0 = vpop.f32.mrf.mxu0  ;;  %v6420_v10 = vpop.permute.xlu2 %6419 }
 0x727   : > { %6002 = vmatpush.bf16.msrb.mxu1 %v5922_v59  ;;  %6015 = vmatpush.bf16.msrb.mxu2 %v5925_v14 }
 0x72a   : > { %7479 = vmatmul.msk.bf16.vlgmr.msra.gmra.mxu0 %vm302_vm4, %v7478_v44 }
 0x72b   : > { %6145 = vmatpush.bf16.msra.mxu1 %v6105_v8  ;;  %6158 = vmatpush.bf16.msra.mxu2 %v6108_v23 }
 0x72c   : > { %v6081_v58 = vpop.permute.xlu1 %6080  ;;  %v6089_v12 = vpop.permute.xlu0 %6088 }
 0x72d   : > { %v6093_v16 = vsel %vm5706_vm1, %v6079_v5, %v6081_v58  ;;  %v6097_v63 = vsel %vm5706_vm1, %v6087_v17, %v6089_v12  ;;  %v6094_v21 = vsel %vm5706_vm1, %v6081_v58, %v6083_v47  ;;  %v9443_v5 = vpop.f32.mrf.mxu1  ;;  %v5609_v15 = vpop.f32.mrf.mxu3 }
 0x72e   : > { %v6111_v53 = vsel %vm219_vm0, %v6093_v16, 0  ;;  %v6123_v50 = vsel %vm219_vm0, %v6097_v63, 0  ;;  %v6114_v45 = vsel %vm219_vm0, %v6094_v21, 0  ;;  %v5648_v62 = vpop.f32.mrf.mxu2  ;;  %v5622_v14 = vpop.f32.mrf.mxu0 }
 0x72f   : > { %6171 = vmatpush.bf16.msra.mxu3 %v6111_v53  ;;  %v6430_v16 = vpop.permute.xlu2 %6429 }
 0x732   : > { %7484 = vmatmul.msk.bf16.vlgmr.msrb.gmra.mxu1 %vm302_vm4, %v7478_v44  ;;  %7485 = vmatmul.msk.bf16.vlgmr.msrb.gmra.mxu2 %vm302_vm4, %v7478_v44 }
 0x734   : > { %7486 = vmatmul.msk.bf16.vlgmr.msrb.gmra.mxu3 %vm302_vm4, %v7478_v44  ;;  %v6073_v34 = vpop.permute.xlu1 %6072  ;;  %v6422_v48 = vpop.permute.xlu0 %6421 }
 0x735   : > { %6223 = vmatpush.bf16.msrb.mxu3 %v6123_v50  ;;  %v6090_v60 = vsel %vm5706_vm1, %v6073_v34, %v6075_v39  ;;  %v9456_v2 = vpop.f32.mrf.mxu3  ;;  %v6435_v23 = vsel %vm5894_vm6, %v6420_v10, %v6422_v48 }
 0x736   : > { %v6102_v27 = vsel %vm219_vm0, %v6090_v60, 0  ;;  %v6451_v41 = vsel %vm219_vm0, %v6435_v23, 0 }
 0x737   : > { %6132 = vmatpush.bf16.msra.mxu0 %v6102_v27  ;;  %v6426_v60 = vpop.permute.xlu2 %6425 }
 0x73a   : > { %7483 = vmatmul.msk.bf16.vlgmr.msrb.gmra.mxu0 %vm302_vm4, %v7478_v44  ;;  %v5635_v44 = vpop.f32.mrf.mxu1 }
 0x73b   : > { %6184 = vmatpush.bf16.msrb.mxu0 %v6114_v45 }
 0x73c   : > { %v6085_v26 = vpop.permute.xlu1 %6084  ;;  %v6418_v32 = vpop.permute.xlu0 %6417 }
 0x73d   : > { %v6095_v11 = vsel %vm5706_vm1, %v6083_v47, %v6085_v26  ;;  %v6096_v1 = vsel %vm5706_vm1, %v6085_v26, %v6087_v17  ;;  %v6434_v19 = vsel %vm5894_vm6, %v6418_v32, %v6420_v10  ;;  %v5661_v59 = vpop.f32.mrf.mxu3 }
 0x73e   : > { %v6117_v13 = vsel %vm219_vm0, %v6095_v11, 0  ;;  %v6120_v36 = vsel %vm219_vm0, %v6096_v1, 0  ;;  %v6448_v17 = vsel %vm219_vm0, %v6434_v19, 0 }
 0x73f   : > { %6197 = vmatpush.bf16.msrb.mxu1 %v6117_v13  ;;  %6210 = vmatpush.bf16.msrb.mxu2 %v6120_v36 }
 0x742   : > { %7489 = vmatmul.msk.bf16.vlgmr.msra.gmra.mxu1 %vm302_vm4, %v7487_v56  ;;  %7490 = vmatmul.msk.bf16.vlgmr.msra.gmra.mxu2 %vm302_vm4, %v7487_v56 }
 0x743   : > { %6293 = vmatpush.bf16.msra.mxu1 %v6259_v52  ;;  %6306 = vmatpush.bf16.msra.mxu2 %v6261_v30 }
 0x744   : > { %7491 = vmatmul.msk.bf16.vlgmr.msra.gmra.mxu3 %vm302_vm4, %v7487_v56  ;;  %v6424_v39 = vpop.permute.xlu1 %6423  ;;  %v6432_v63 = vpop.permute.xlu0 %6431 }
 0x745   : > { %6319 = vmatpush.bf16.msra.mxu3 %v6263_v25  ;;  %v6436_v8 = vsel %vm5894_vm6, %v6422_v48, %v6424_v39  ;;  %v6440_v27 = vsel %vm5894_vm6, %v6430_v16, %v6432_v63  ;;  %v6437_v36 = vsel %vm5894_vm6, %v6424_v39, %v6426_v60  ;;  %v6615_v25 = vpop.permute.xlu2 %6614 }
 0x746   : > { %v6454_v12 = vsel %vm219_vm0, %v6436_v8, 0  ;;  %v6466_v11 = vsel %vm219_vm0, %v6440_v27, 0  ;;  %v6457_v57 = vsel %vm219_vm0, %v6437_v36, 0 }
 0x74a   : > { %7488 = vmatmul.msk.bf16.vlgmr.msra.gmra.mxu0 %vm302_vm4, %v7487_v56 }
 0x74b   : > { %6280 = vmatpush.bf16.msra.mxu0 %v6257_v22 }
 0x74c   : > { %v6416_v58 = vpop.permute.xlu1 %6415  ;;  %v6617_v45 = vpop.permute.xlu0 %6616 }
 0x74d   : > { %v6433_v53 = vsel %vm5894_vm6, %v6416_v58, %v6418_v32  ;;  %v6630_v48 = vsel %vm5706_vm1, %v6615_v25, %v6617_v45  ;;  %v6625_v62 = vpop.permute.xlu2 %6624 }
 0x74e   : > { %v6445_v50 = vsel %vm219_vm0, %v6433_v53, 0 }
 0x752   : > { %7493 = vmatmul.msk.bf16.vlgmr.msrb.gmra.mxu1 %vm302_vm4, %v7487_v56  ;;  %7494 = vmatmul.msk.bf16.vlgmr.msrb.gmra.mxu2 %vm302_vm4, %v7487_v56 }
 0x753   : > { %6345 = vmatpush.bf16.msrb.mxu1 %v6267_v55  ;;  %6358 = vmatpush.bf16.msrb.mxu2 %v6269_v3 }
 0x754   : > { %7495 = vmatmul.msk.bf16.vlgmr.msrb.gmra.mxu3 %vm302_vm4, %v7487_v56  ;;  %v6428_v34 = vpop.permute.xlu1 %6427  ;;  %v6613_v22 = vpop.permute.xlu0 %6612 }
 0x755   : > { %6371 = vmatpush.bf16.msrb.mxu3 %v6271_v54  ;;  %v6438_v47 = vsel %vm5894_vm6, %v6426_v60, %v6428_v34  ;;  %v6439_v21 = vsel %vm5894_vm6, %v6428_v34, %v6430_v16  ;;  %v6629_v31 = vsel %vm5706_vm1, %v6613_v22, %v6615_v25  ;;  %v6646_v54 = vsel %vm219_vm0, %v6630_v48, 0 }
 0x756   : > { %v6460_v26 = vsel %vm219_vm0, %v6438_v47, 0  ;;  %v6463_v1 = vsel %vm219_vm0, %v6439_v21, 0  ;;  %v6643_v44 = vsel %vm219_vm0, %v6629_v31, 0  ;;  %v6801_v25 = vsel %vm219_vm0, %v9313_v33, 0 }
 0x75a   : > { %7492 = vmatmul.msk.bf16.vlgmr.msrb.gmra.mxu0 %vm302_vm4, %v7487_v56 }
 0x75b   : > { %6332 = vmatpush.bf16.msrb.mxu0 %v6265_v43 }
 0x75c   : > { %v6619_v52 = vpop.permute.xlu1 %6618  ;;  %v6627_v23 = vpop.permute.xlu0 %6626 }
 0x75d   : > { %v6631_v55 = vsel %vm5706_vm1, %v6617_v45, %v6619_v52 }
 0x75e   : > { %v6649_v39 = vsel %vm219_vm0, %v6631_v55, 0 }
 0x762   : > { %7498 = vmatmul.msk.bf16.vlgmr.msra.gmra.mxu1 %vm302_vm4, %v7496_v37  ;;  %7499 = vmatmul.msk.bf16.vlgmr.msra.gmra.mxu2 %vm302_vm4, %v7496_v37 }
 0x763   : > { %6488 = vmatpush.bf16.msra.mxu1 %v6448_v17  ;;  %6501 = vmatpush.bf16.msra.mxu2 %v6451_v41  ;;  %v6621_v17 = vpop.permute.xlu2 %6620 }
 0x764   : > { %7500 = vmatmul.msk.bf16.vlgmr.msra.gmra.mxu3 %vm302_vm4, %v7496_v37  ;;  %v6611_v3 = vpop.permute.xlu1 %6610 }
 0x765   : > { %6514 = vmatpush.bf16.msra.mxu3 %v6454_v12  ;;  %v6628_v32 = vsel %vm5706_vm1, %v6611_v3, %v6613_v22  ;;  %v6960_v3 = vpop.permute.xlu0 %6959 }
 0x766   : > { %v6640_v59 = vsel %vm219_vm0, %v6628_v32, 0 }
 0x76a   : > { %7497 = vmatmul.msk.bf16.vlgmr.msra.gmra.mxu0 %vm302_vm4, %v7496_v37 }
 0x76b   : > { %6475 = vmatpush.bf16.msra.mxu0 %v6445_v50 }
 0x76c   : > { %v6623_v14 = vpop.permute.xlu1 %6622 }
 0x76d   : > { %v6633_v58 = vsel %vm5706_vm1, %v6621_v17, %v6623_v14  ;;  %v6634_v16 = vsel %vm5706_vm1, %v6623_v14, %v6625_v62 }
 0x76e   : > { %v6658_v50 = vsel %vm219_vm0, %v6634_v16, 0 }
 0x772   : > { %7502 = vmatmul.msk.bf16.vlgmr.msrb.gmra.mxu1 %vm302_vm4, %v7496_v37  ;;  %7503 = vmatmul.msk.bf16.vlgmr.msrb.gmra.mxu2 %vm302_vm4, %v7496_v37 }
 0x773   : > { %6540 = vmatpush.bf16.msrb.mxu1 %v6460_v26  ;;  %6553 = vmatpush.bf16.msrb.mxu2 %v6463_v1 }
 0x774   : > { %7504 = vmatmul.msk.bf16.vlgmr.msrb.gmra.mxu3 %vm302_vm4, %v7496_v37 }
 0x775   : > { %6566 = vmatpush.bf16.msrb.mxu3 %v6466_v11  ;;  %v5777_v13 = vpop.f32.mrf.mxu2 }
 0x776   : > { %v9489_v56 = vadd.f32 %v5777_v13, %v9425_v38  ;;  %v7505_v38 = vld [vmem:[%s9640_s1 + $0x40] sm:$0x3] }
 0x777   : > { %v5764_v18 = vpop.f32.mrf.mxu1 }
 0x778   : > { %v9492_v30 = vadd.f32 %v5764_v18, %v9416_v46 }
 0x77a   : > { %7501 = vmatmul.msk.bf16.vlgmr.msrb.gmra.mxu0 %vm302_vm4, %v7496_v37 }
 0x77b   : > { %6527 = vmatpush.bf16.msrb.mxu0 %v6457_v57 }
 0x77d   : > { %v5779_v15 = vpop.f32.mrf.mxu2 }
 0x77f   : > { %v5766_v46 = vpop.f32.mrf.mxu1 }
 0x782   : > { %7507 = vmatmul.msk.bf16.vlgmr.msra.gmra.mxu1 %vm302_vm4, %v7505_v38  ;;  %7508 = vmatmul.msk.bf16.vlgmr.msra.gmra.mxu2 %vm302_vm4, %v7505_v38 }
 0x783   : > { %6683 = vmatpush.bf16.msra.mxu1 %v6643_v44  ;;  %6696 = vmatpush.bf16.msra.mxu2 %v6646_v54  ;;  %v6809_v54 = vsel %vm219_vm0, %v9293_v40, 0  ;;  %v6956_v40 = vpop.permute.xlu0 %6955 }
 0x784   : > { %7509 = vmatmul.msk.bf16.vlgmr.msra.gmra.mxu3 %vm302_vm4, %v7505_v38 }
 0x785   : > { %6709 = vmatpush.bf16.msra.mxu3 %v6649_v39  ;;  %v5790_v10 = vpop.f32.mrf.mxu3 }
 0x786   : > { %v5791_v43 = vadd.f32 %v5790_v10, %v9436_v61  ;;  %v6635_v61 = vsel %vm5706_vm1, %v6625_v62, %v6627_v23 }
 0x787   : > { %v5751_v19 = vpop.f32.mrf.mxu0  ;;  %v6661_v63 = vsel %vm219_vm0, %v6635_v61, 0 }
 0x788   : > { %v5752_v37 = vadd.f32 %v5751_v19, %v9438_v24  ;;  %v6655_v24 = vsel %vm219_vm0, %v6633_v58, 0 }
 0x78a   : > { %7506 = vmatmul.msk.bf16.vlgmr.msra.gmra.mxu0 %vm302_vm4, %v7505_v38 }
 0x78b   : > { %6670 = vmatpush.bf16.msra.mxu0 %v6640_v59  ;;  %v6958_v59 = vpop.permute.xlu2 %6957 }
 0x78d   : > { %v5792_v8 = vpop.f32.mrf.mxu3 }
 0x78e   : > { %v6972_v8 = vsel %vm5894_vm6, %v6956_v40, %v6958_v59 }
 0x78f   : > { %v5753_v41 = vpop.f32.mrf.mxu0  ;;  %v5816_v12 = vpop.f32.mrf.mxu1 }
 0x790   : > { %v5817_v53 = vadd.f32 %v5816_v12, %v9443_v5  ;;  %v6632_v5 = vsel %vm5706_vm1, %v6619_v52, %v6621_v17  ;;  %v7523_v41 = vld [vmem:[%s9640_s1 + $0x44] sm:$0x3]  ;;  %v6973_v12 = vsel %vm5894_vm6, %v6958_v59, %v6960_v3 }
 0x791   : > { %v6652_v11 = vsel %vm219_vm0, %v6632_v5, 0 }
 0x792   : > { %7511 = vmatmul.msk.bf16.vlgmr.msrb.gmra.mxu1 %vm302_vm4, %v7505_v38  ;;  %7512 = vmatmul.msk.bf16.vlgmr.msrb.gmra.mxu2 %vm302_vm4, %v7505_v38 }
 0x793   : > { %6735 = vmatpush.bf16.msrb.mxu1 %v6655_v24  ;;  %6748 = vmatpush.bf16.msrb.mxu2 %v6658_v50  ;;  %v6989_v24 = vsel %vm219_vm0, %v6973_v12, 0  ;;  %v6968_v50 = vpop.permute.xlu2 %6967 }
 0x794   : > { %7513 = vmatmul.msk.bf16.vlgmr.msrb.gmra.mxu3 %vm302_vm4, %v7505_v38 }
 0x795   : > { %6761 = vmatpush.bf16.msrb.mxu3 %v6661_v63  ;;  %v5829_v34 = vpop.f32.mrf.mxu2 }
 0x796   : > { %v5830_v60 = vadd.f32 %v5829_v34, %v9445_v20  ;;  %v7514_v20 = vld [vmem:[%s9640_s1 + $0x42] sm:$0x3] }
 0x797   : > { %v5842_v47 = vpop.f32.mrf.mxu3  ;;  %v5803_v21 = vpop.f32.mrf.mxu0 }
 0x798   : > { %v5843_v27 = vadd.f32 %v5842_v47, %v9456_v2  ;;  %v5818_v45 = vpop.f32.mrf.mxu1  ;;  %v5804_v26 = vadd.f32 %v5803_v21, %v9458_v0  ;;  %v6797_v2 = vsel %vm219_vm0, %v9309_v7, 0  ;;  %v6799_v0 = vsel %vm219_vm0, %v9311_v51, 0 }
 0x799   : > { %v6795_v7 = vsel %vm219_vm0, %v9307_v4, 0  ;;  %v6807_v4 = vsel %vm219_vm0, %v9291_v29, 0  ;;  %v6803_v29 = vsel %vm219_vm0, %v9284_v28, 0 }
 0x79a   : > { %7510 = vmatmul.msk.bf16.vlgmr.msrb.gmra.mxu0 %vm302_vm4, %v7505_v38 }
 0x79b   : > { %6722 = vmatpush.bf16.msrb.mxu0 %v6652_v11 }
 0x79d   : > { %v5831_v1 = vpop.f32.mrf.mxu2 }
 0x79f   : > { %v5844_v13 = vpop.f32.mrf.mxu3  ;;  %v5805_v36 = vpop.f32.mrf.mxu0 }
 0x7a0   : > { %v5952_v18 = vpop.f32.mrf.mxu1  ;;  %v6970_v13 = vpop.permute.xlu0 %6969 }
 0x7a1   : > { %v6035_v52 = vadd.f32 %v5952_v18, %v9492_v30  ;;  %v6964_v18 = vpop.permute.xlu2 %6963 }
 0x7a2   : > { %7516 = vmatmul.msk.bf16.vlgmr.msra.gmra.mxu1 %vm302_vm4, %v7514_v20  ;;  %7517 = vmatmul.msk.bf16.vlgmr.msra.gmra.mxu2 %vm302_vm4, %v7514_v20 }
 0x7a3   : > { %6831 = vmatpush.bf16.msra.mxu1 %v6797_v2  ;;  %6844 = vmatpush.bf16.msra.mxu2 %v6799_v0 }
 0x7a4   : > { %7518 = vmatmul.msk.bf16.vlgmr.msra.gmra.mxu3 %vm302_vm4, %v7514_v20 }
 0x7a5   : > { %6857 = vmatpush.bf16.msra.mxu3 %v6801_v25  ;;  %v5965_v57 = vpop.f32.mrf.mxu2  ;;  %v6978_v25 = vsel %vm5894_vm6, %v6968_v50, %v6970_v13 }
 0x7a6   : > { %v6036_v30 = vadd.f32 %v5965_v57, %v9489_v56  ;;  %v6805_v56 = vsel %vm219_vm0, %v9286_v9, 0  ;;  %v6962_v9 = vpop.permute.xlu1 %6961 }
 0x7a7   : > { %v5978_v22 = vpop.f32.mrf.mxu3  ;;  %v5939_v31 = vpop.f32.mrf.mxu0  ;;  %v6974_v61 = vsel %vm5894_vm6, %v6960_v3, %v6962_v9 }
 0x7a8   : > { %v6037_v15 = vadd.f32 %v5978_v22, %v5791_v43  ;;  %v5954_v38 = vpop.f32.mrf.mxu1  ;;  %v6034_v48 = vadd.f32 %v5939_v31, %v5752_v37  ;;  %v6992_v63 = vsel %vm219_vm0, %v6974_v61, 0 }
 0x7aa   : > { %7515 = vmatmul.msk.bf16.vlgmr.msra.gmra.mxu0 %vm302_vm4, %v7514_v20 }
 0x7ab   : > { %6818 = vmatpush.bf16.msra.mxu0 %v6795_v7 }
 0x7ad   : > { %v5967_v51 = vpop.f32.mrf.mxu2 }
 0x7ae   : > { %v6954_v28 = vpop.permute.xlu1 %6953  ;;  %v6975_v51 = vsel %vm5894_vm6, %v6962_v9, %v6964_v18 }
 0x7af   : > { %v5980_v55 = vpop.f32.mrf.mxu3  ;;  %v5941_v46 = vpop.f32.mrf.mxu0  ;;  %v6971_v5 = vsel %vm5894_vm6, %v6954_v28, %v6956_v40  ;;  %v6995_v3 = vsel %vm219_vm0, %v6975_v51, 0 }
 0x7b0   : > { %v6004_v33 = vpop.f32.mrf.mxu1  ;;  %v6983_v11 = vsel %vm219_vm0, %v6971_v5, 0 }
 0x7b1   : > { %v9546_v44 = vadd.f32 %v6004_v33, %v5817_v53  ;;  %v6986_v53 = vsel %vm219_vm0, %v6972_v8, 0 }
 0x7b2   : > { %7520 = vmatmul.msk.bf16.vlgmr.msrb.gmra.mxu1 %vm302_vm4, %v7514_v20  ;;  %7521 = vmatmul.msk.bf16.vlgmr.msrb.gmra.mxu2 %vm302_vm4, %v7514_v20 }
 0x7b3   : > { %6883 = vmatpush.bf16.msrb.mxu1 %v6805_v56  ;;  %6896 = vmatpush.bf16.msrb.mxu2 %v6807_v4 }
 0x7b4   : > { %7522 = vmatmul.msk.bf16.vlgmr.msrb.gmra.mxu3 %vm302_vm4, %v7514_v20 }
 0x7b5   : > { %6909 = vmatpush.bf16.msrb.mxu3 %v6809_v54  ;;  %v6017_v39 = vpop.f32.mrf.mxu2 }
 0x7b6   : > { %v9557_v62 = vadd.f32 %v6017_v39, %v5830_v60  ;;  %v6966_v1 = vpop.permute.xlu1 %6965 }
 0x7b7   : > { %v6030_v10 = vpop.f32.mrf.mxu3  ;;  %v5991_v32 = vpop.f32.mrf.mxu0  ;;  %v6977_v57 = vsel %vm5894_vm6, %v6966_v1, %v6968_v50 }
 0x7b8   : > { %v9559_v43 = vadd.f32 %v6030_v10, %v5843_v27  ;;  %v6006_v19 = vpop.f32.mrf.mxu1  ;;  %v9561_v37 = vadd.f32 %v5991_v32, %v5804_v26  ;;  %v7001_v31 = vsel %vm219_vm0, %v6977_v57, 0 }
 0x7ba   : > { %7519 = vmatmul.msk.bf16.vlgmr.msrb.gmra.mxu0 %vm302_vm4, %v7514_v20 }
 0x7bb   : > { %6870 = vmatpush.bf16.msrb.mxu0 %v6803_v29 }
 0x7bd   : > { %v6019_v14 = vpop.f32.mrf.mxu2 }
 0x7bf   : > { %v6032_v23 = vpop.f32.mrf.mxu3  ;;  %v5993_v17 = vpop.f32.mrf.mxu0 }
 0x7c0   : > { %v6147_v58 = vpop.f32.mrf.mxu1 }
 0x7c1   : > { %v6230_v16 = vadd.f32 %v6147_v58, %v6035_v52  ;;  %v6976_v52 = vsel %vm5894_vm6, %v6964_v18, %v6966_v1 }
 0x7c2   : > { %7525 = vmatmul.msk.bf16.vlgmr.msra.gmra.mxu1 %vm302_vm4, %v7523_v41  ;;  %7526 = vmatmul.msk.bf16.vlgmr.msra.gmra.mxu2 %vm302_vm4, %v7523_v41  ;;  %v6998_v22 = vsel %vm219_vm0, %v6976_v52, 0 }
 0x7c3   : > { %7026 = vmatpush.bf16.msra.mxu1 %v6986_v53  ;;  %7039 = vmatpush.bf16.msra.mxu2 %v6989_v24 }
 0x7c4   : > { %7527 = vmatmul.msk.bf16.vlgmr.msra.gmra.mxu3 %vm302_vm4, %v7523_v41 }
 0x7c5   : > { %7052 = vmatpush.bf16.msra.mxu3 %v6992_v63  ;;  %v6160_v34 = vpop.f32.mrf.mxu2 }
 0x7c6   : > { %v6231_v60 = vadd.f32 %v6160_v34, %v6036_v30 }
 0x7c7   : > { %v6173_v47 = vpop.f32.mrf.mxu3  ;;  %v6134_v21 = vpop.f32.mrf.mxu0 }
 0x7c8   : > { %v6232_v27 = vadd.f32 %v6173_v47, %v6037_v15  ;;  %v6149_v45 = vpop.f32.mrf.mxu1  ;;  %v6229_v26 = vadd.f32 %v6134_v21, %v6034_v48  ;;  %v7004_v15 = vsel %vm219_vm0, %v6978_v25, 0 }
 0x7ca   : > { %7524 = vmatmul.msk.bf16.vlgmr.msra.gmra.mxu0 %vm302_vm4, %v7523_v41 }
 0x7cb   : > { %7013 = vmatpush.bf16.msra.mxu0 %v6983_v11 }
 0x7cd   : > { %v6162_v36 = vpop.f32.mrf.mxu2 }
 0x7cf   : > { %v6175_v20 = vpop.f32.mrf.mxu3  ;;  %v6136_v2 = vpop.f32.mrf.mxu0 }
 0x7d0   : > { %v6199_v0 = vpop.f32.mrf.mxu1 }
 0x7d1   : > { %v6234_v30 = vadd.f32 %v6199_v0, %v9546_v44 }
 0x7d2   : > { %7529 = vmatmul.msk.bf16.vlgmr.msrb.gmra.mxu1 %vm302_vm4, %v7523_v41  ;;  %7530 = vmatmul.msk.bf16.vlgmr.msrb.gmra.mxu2 %vm302_vm4, %v7523_v41 }
 0x7d3   : > { %7078 = vmatpush.bf16.msrb.mxu1 %v6998_v22  ;;  %7091 = vmatpush.bf16.msrb.mxu2 %v7001_v31 }
 0x7d4   : > { %7531 = vmatmul.msk.bf16.vlgmr.msrb.gmra.mxu3 %vm302_vm4, %v7523_v41 }
 0x7d5   : > { %7104 = vmatpush.bf16.msrb.mxu3 %v7004_v15  ;;  %v6212_v38 = vpop.f32.mrf.mxu2 }
 0x7d6   : > { %v6235_v48 = vadd.f32 %v6212_v38, %v9557_v62  ;;  %v7532_v62 = vld [vmem:[%s9640_s1 + $0x46] sm:$0x3] }
 0x7d7   : > { %v6225_v7 = vpop.f32.mrf.mxu3  ;;  %v6186_v46 = vpop.f32.mrf.mxu0 }
 0x7d8   : > { %v6236_v55 = vadd.f32 %v6225_v7, %v9559_v43  ;;  %v6201_v33 = vpop.f32.mrf.mxu1  ;;  %v6233_v44 = vadd.f32 %v6186_v46, %v9561_v37 }
 0x7da   : > { %7528 = vmatmul.msk.bf16.vlgmr.msrb.gmra.mxu0 %vm302_vm4, %v7523_v41 }
 0x7db   : > { %7065 = vmatpush.bf16.msrb.mxu0 %v6995_v3 }
 0x7dd   : > { %v6214_v56 = vpop.f32.mrf.mxu2 }
 0x7df   : > { %v6227_v4 = vpop.f32.mrf.mxu3  ;;  %v6188_v54 = vpop.f32.mrf.mxu0 }
 0x7e0   : > { %v6295_v39 = vpop.f32.mrf.mxu1 }
 0x7e1   : > { %v6378_v10 = vadd.f32 %v6295_v39, %v6230_v16 }
 0x7e2   : > { %7534 = vmatmul.msk.bf16.vlgmr.msra.gmra.mxu1 %vm302_vm4, %v7532_v62  ;;  %7535 = vmatmul.msk.bf16.vlgmr.msra.gmra.mxu2 %vm302_vm4, %v7532_v62 }
 0x7e4   : > { %7536 = vmatmul.msk.bf16.vlgmr.msra.gmra.mxu3 %vm302_vm4, %v7532_v62 }
 0x7e5   : > { %v6308_v43 = vpop.f32.mrf.mxu2 }
 0x7e6   : > { %v6379_v32 = vadd.f32 %v6308_v43, %v6231_v60 }
 0x7e7   : > { %v6321_v19 = vpop.f32.mrf.mxu3  ;;  %v6282_v37 = vpop.f32.mrf.mxu0 }
 0x7e8   : > { %v6380_v9 = vadd.f32 %v6321_v19, %v6232_v27  ;;  %v6297_v59 = vpop.f32.mrf.mxu1  ;;  %v6377_v29 = vadd.f32 %v6282_v37, %v6229_v26 }
 0x7ea   : > { %7533 = vmatmul.msk.bf16.vlgmr.msra.gmra.mxu0 %vm302_vm4, %v7532_v62 }
 0x7ed   : > { %v6310_v40 = vpop.f32.mrf.mxu2 }
 0x7ef   : > { %v6323_v14 = vpop.f32.mrf.mxu3  ;;  %v6284_v23 = vpop.f32.mrf.mxu0 }
 0x7f0   : > { %v6347_v8 = vpop.f32.mrf.mxu1 }
 0x7f1   : > { %v6382_v17 = vadd.f32 %v6347_v8, %v6234_v30 }
 0x7f2   : > { %7538 = vmatmul.msk.bf16.vlgmr.msrb.gmra.mxu1 %vm302_vm4, %v7532_v62  ;;  %7539 = vmatmul.msk.bf16.vlgmr.msrb.gmra.mxu2 %vm302_vm4, %v7532_v62 }
 0x7f4   : > { %7540 = vmatmul.msk.bf16.vlgmr.msrb.gmra.mxu3 %vm302_vm4, %v7532_v62 }
 0x7f5   : > { %v6360_v58 = vpop.f32.mrf.mxu2 }
 0x7f6   : > { %v6383_v41 = vadd.f32 %v6360_v58, %v6235_v48 }
 0x7f7   : > { %v6373_v12 = vpop.f32.mrf.mxu3  ;;  %v6334_v16 = vpop.f32.mrf.mxu0 }
 0x7f8   : > { %v6384_v61 = vadd.f32 %v6373_v12, %v6236_v55  ;;  %v6349_v53 = vpop.f32.mrf.mxu1  ;;  %v6381_v28 = vadd.f32 %v6334_v16, %v6233_v44 }
 0x7fa   : > { %7537 = vmatmul.msk.bf16.vlgmr.msrb.gmra.mxu0 %vm302_vm4, %v7532_v62 }
 0x7fd   : > { %v6362_v24 = vpop.f32.mrf.mxu2 }
 0x7ff   : > { %v6375_v63 = vpop.f32.mrf.mxu3  ;;  %v6336_v50 = vpop.f32.mrf.mxu0 }
 0x800   : > { %v6490_v34 = vpop.f32.mrf.mxu1 }
 0x801   : > { %v6573_v60 = vadd.f32 %v6490_v34, %v6378_v10 }
 0x805   : > { %v6503_v47 = vpop.f32.mrf.mxu2 }
 0x806   : > { %v6574_v5 = vadd.f32 %v6503_v47, %v6379_v32 }
 0x807   : > { %v6516_v27 = vpop.f32.mrf.mxu3  ;;  %v6477_v45 = vpop.f32.mrf.mxu0 }
 0x808   : > { %v6575_v21 = vadd.f32 %v6516_v27, %v6380_v9  ;;  %v6492_v26 = vpop.f32.mrf.mxu1  ;;  %v6572_v11 = vadd.f32 %v6477_v45, %v6377_v29 }
 0x80d   : > { %v6505_v1 = vpop.f32.mrf.mxu2 }
 0x80f   : > { %v6518_v13 = vpop.f32.mrf.mxu3  ;;  %v6479_v36 = vpop.f32.mrf.mxu0 }
 0x810   : > { %v6542_v18 = vpop.f32.mrf.mxu1 }
 0x811   : > { %v6577_v20 = vadd.f32 %v6542_v18, %v6382_v17 }
 0x815   : > { %v6555_v52 = vpop.f32.mrf.mxu2 }
 0x816   : > { %v9608_v2 = vadd.f32 %v6555_v52, %v6383_v41 }
 0x817   : > { %v6568_v0 = vpop.f32.mrf.mxu3  ;;  %v6529_v57 = vpop.f32.mrf.mxu0 }
 0x818   : > { %v9610_v25 = vadd.f32 %v6568_v0, %v6384_v61  ;;  %v6544_v30 = vpop.f32.mrf.mxu1  ;;  %v9612_v22 = vadd.f32 %v6529_v57, %v6381_v28 }
 0x81d   : > { %v6557_v15 = vpop.f32.mrf.mxu2 }
 0x81f   : > { %v6570_v31 = vpop.f32.mrf.mxu3  ;;  %v6531_v38 = vpop.f32.mrf.mxu0 }
 0x820   : > { %v6685_v48 = vpop.f32.mrf.mxu1 }
 0x821   : > { %v6768_v7 = vadd.f32 %v6685_v48, %v6573_v60 }
 0x825   : > { %v6698_v51 = vpop.f32.mrf.mxu2 }
 0x826   : > { %v6769_v60 = vadd.f32 %v6698_v51, %v6574_v5 }
 0x827   : > { %v6711_v55 = vpop.f32.mrf.mxu3  ;;  %v6672_v46 = vpop.f32.mrf.mxu0 }
 0x828   : > { %v6687_v33 = vpop.f32.mrf.mxu1  ;;  %v6770_v47 = vadd.f32 %v6711_v55, %v6575_v21  ;;  %v6767_v27 = vadd.f32 %v6672_v46, %v6572_v11 }
 0x82d   : > { %v6700_v44 = vpop.f32.mrf.mxu2 }
 0x82f   : > { %v6713_v3 = vpop.f32.mrf.mxu3  ;;  %v6674_v56 = vpop.f32.mrf.mxu0 }
 0x830   : > { %v6737_v4 = vpop.f32.mrf.mxu1 }
 0x831   : > { %v6772_v54 = vadd.f32 %v6737_v4, %v6577_v20 }
 0x835   : > { %v6750_v39 = vpop.f32.mrf.mxu2 }
 0x836   : > { %v6773_v4 = vadd.f32 %v6750_v39, %v9608_v2 }
 0x837   : > { %v6763_v62 = vpop.f32.mrf.mxu3  ;;  %v6724_v10 = vpop.f32.mrf.mxu0 }
 0x838   : > { %v6739_v43 = vpop.f32.mrf.mxu1 }
 0x839   : > { %v6774_v43 = vadd.f32 %v6763_v62, %v9610_v25 }
 0x83d   : > { %v6752_v32 = vpop.f32.mrf.mxu2 }
 0x83e   : > { %v6771_v32 = vadd.f32 %v6724_v10, %v9612_v22 }
 0x83f   : > { %v6765_v19 = vpop.f32.mrf.mxu3  ;;  %v6726_v9 = vpop.f32.mrf.mxu0 }
 0x840   : > { %v6833_v37 = vpop.f32.mrf.mxu1 }
 0x841   : > { %v6916_v50 = vadd.f32 %v6833_v37, %v6768_v7 }
 0x845   : > { %v6846_v59 = vpop.f32.mrf.mxu2 }
 0x846   : > { %v6917_v45 = vadd.f32 %v6846_v59, %v6769_v60 }
 0x847   : > { %v6859_v29 = vpop.f32.mrf.mxu3  ;;  %v6820_v40 = vpop.f32.mrf.mxu0 }
 0x848   : > { %v6835_v14 = vpop.f32.mrf.mxu1  ;;  %v6918_v26 = vadd.f32 %v6859_v29, %v6770_v47  ;;  %v6915_v13 = vadd.f32 %v6820_v40, %v6767_v27 }
 0x84d   : > { %v6848_v23 = vpop.f32.mrf.mxu2 }
 0x84f   : > { %v6861_v8 = vpop.f32.mrf.mxu3  ;;  %v6822_v17 = vpop.f32.mrf.mxu0 }
 0x850   : > { %v6885_v58 = vpop.f32.mrf.mxu1 }
 0x851   : > { %v6920_v3 = vadd.f32 %v6885_v58, %v6772_v54 }
 0x855   : > { %v6898_v41 = vpop.f32.mrf.mxu2 }
 0x856   : > { %v6921_v19 = vadd.f32 %v6898_v41, %v6773_v4 }
 0x857   : > { %v6911_v12 = vpop.f32.mrf.mxu3  ;;  %v6872_v61 = vpop.f32.mrf.mxu0 }
 0x858   : > { %v6887_v16 = vpop.f32.mrf.mxu1  ;;  %v6922_v9 = vadd.f32 %v6911_v12, %v6774_v43 }
 0x85d   : > { %v6900_v53 = vpop.f32.mrf.mxu2 }
 0x85f   : > { %v6913_v28 = vpop.f32.mrf.mxu3  ;;  %v6874_v24 = vpop.f32.mrf.mxu0 }
 0x860   : > { %v7028_v63 = vpop.f32.mrf.mxu1 }
 0x861   : > { %v7111_v34 = vadd.f32 %v7028_v63, %v6916_v50 }
 0x863   : > { %v7119_v36 = vmax.f32 %v7111_v34, 0.0 }
 0x865   : > { %v7041_v1 = vpop.f32.mrf.mxu2  ;;  %v7134_v31 = vrot.slane %v7119_v36, 4 }
 0x866   : > { %v7112_v20 = vadd.f32 %v7041_v1, %v6917_v45 }
 0x867   : > { %v7054_v18 = vpop.f32.mrf.mxu3  ;;  %v7015_v0 = vpop.f32.mrf.mxu0 }
 0x868   : > { %v7113_v52 = vadd.f32 %v7054_v18, %v6918_v26  ;;  %v7030_v57 = vpop.f32.mrf.mxu1  ;;  %v7110_v30 = vadd.f32 %v7015_v0, %v6915_v13  ;;  %v7120_v48 = vmax.f32 %v7112_v20, 0.0 }
 0x86a   : > { %v7121_v15 = vmax.f32 %v7113_v52, 0.0  ;;  %v7118_v38 = vmax.f32 %v7110_v30, 0.0 }
 0x86c   : > { %v7135_v7 = vrot.slane %v7121_v15, 4  ;;  %v7138_v5 = vsel %vm227_vm2, %v7118_v38, %v7134_v31 }
 0x86d   : > { %v7146_v11 = vadd.f32 %v7138_v5, %v9176_v35  ;;  %v7043_v51 = vpop.f32.mrf.mxu2  ;;  %v6919_v35 = vadd.f32 %v6872_v61, %v6771_v32 }
 0x86e   : > { %v7139_v21 = vsel %vm227_vm2, %v7120_v48, %v7135_v7 }
 0x86f   : > { %v7147_v55 = vadd.f32 %v7139_v21, %v9172_v42  ;;  %v7056_v46 = vpop.f32.mrf.mxu3  ;;  %7150 = vst [vmem:[%s9619_s21] sm:$0xff] %v7146_v11  ;;  %v7017_v33 = vpop.f32.mrf.mxu0 }
 0x870   : > { %v7080_v44 = vpop.f32.mrf.mxu1 }
 0x871   : > { %7151 = vst [vmem:[%s9619_s21 + $0x8] sm:$0xff] %v7147_v55  ;;  %v7115_v56 = vadd.f32 %v7080_v44, %v6920_v3 }
 0x873   : > { %v7123_v59 = vmax.f32 %v7115_v56, 0.0 }
 0x875   : > { %v7093_v37 = vpop.f32.mrf.mxu2  ;;  %v7136_v17 = vrot.slane %v7123_v59, 4 }
 0x876   : > { %v7116_v42 = vadd.f32 %v7093_v37, %v6921_v19 }
 0x877   : > { %v7106_v29 = vpop.f32.mrf.mxu3  ;;  %v7067_v14 = vpop.f32.mrf.mxu0 }
 0x878   : > { %v7117_v40 = vadd.f32 %v7106_v29, %v6922_v9  ;;  %v7082_v54 = vpop.f32.mrf.mxu1  ;;  %v7114_v23 = vadd.f32 %v7067_v14, %v6919_v35  ;;  %v7124_v39 = vmax.f32 %v7116_v42, 0.0 }
 0x87a   : > { %v7125_v8 = vmax.f32 %v7117_v40, 0.0  ;;  %v7122_v2 = vmax.f32 %v7114_v23, 0.0 }
 0x87c   : > { %v7137_v25 = vrot.slane %v7125_v8, 4  ;;  %v7140_v22 = vsel %vm227_vm2, %v7122_v2, %v7136_v17 }
 0x87d   : > { %v7148_v10 = vadd.f32 %v7140_v22, %v9198_v6  ;;  %v7095_v58 = vpop.f32.mrf.mxu2 }
 0x87e   : > { %v7141_v62 = vsel %vm227_vm2, %v7124_v39, %v7137_v25 }
 0x87f   : > { %v7149_v41 = vadd.f32 %v7141_v62, %v9194_v49  ;;  %v7108_v12 = vpop.f32.mrf.mxu3  ;;  %7152 = vst [vmem:[%s9619_s21 + $0x10] sm:$0xff] %v7148_v10  ;;  %v7069_v61 = vpop.f32.mrf.mxu0 }
 0x881   : > { %7153 = vst [vmem:[%s9619_s21 + $0x18] sm:$0xff] %v7149_v41 }
 0x882 PF: > { %s13_s12 = sadd.s32 1, %s7577_s12  }
 0x883   : > { %p10_p4 = scmp.ge.s32.totalorder %s13_s12, 4  }
 0x885   :  { %12 = sbr.rel (!%p10_p4) target bundleno = 1 (0x1), region = 145 }

</bundles_post_ra>
